<compile_context>
chip_gen: v5e
topology: v5e:2x2
jax: 0.10.0
libtpu: 0.0.40
codegen_flags: <defaults>
</compile_context>

<pallas_src>
import functools

import jax
import jax.numpy as jnp
from jax.experimental import pallas as pl
from jax.experimental.pallas import tpu as pltpu


def _round_up(x, m):
    return ((x + m - 1) // m) * m


def _softplus(x):
    # Numerically stable softplus: log(1 + exp(x))  (matches jax.nn.softplus)
    return jnp.maximum(x, 0.0) + jnp.log1p(jnp.exp(-jnp.abs(x)))


def _decoder_kernel(
    z_ref,
    # emb trunk: Linear(z,h0) ReLU, Linear(h0,h0) ReLU, Linear(h0,h1) ReLU
    w_e0, b_e0, w_e1, b_e1, w_e2, b_e2,
    # fused mean|sigma heads (3 layers, block-diagonal, lane-padded weights)
    w_h0, b_h0, w_h1, b_h1, w_h2, b_h2,
    out_ref,
    *, x_dim,
):
    def dense(x, w_ref, b_ref, relu):
        y = jnp.dot(x, w_ref[...], preferred_element_type=jnp.float32) + b_ref[...]
        return jnp.maximum(y, 0.0) if relu else y

    z = z_ref[...].astype(jnp.float32)

    # Embedding trunk
    h = dense(z, w_e0, b_e0, relu=True)
    h = dense(h, w_e1, b_e1, relu=True)
    z_emb = dense(h, w_e2, b_e2, relu=True)

    # Fused heads (mean columns first, sigma columns second, zero padding after).
    y = dense(z_emb, w_h0, b_h0, relu=True)
    y = dense(y, w_h1, b_h1, relu=True)
    y = dense(y, w_h2, b_h2, relu=False)

    # Single fused output slab: lanes [0:x_dim] = mean (identity),
    # lanes [x_dim:2*x_dim] = sigma (softplus).  Padding lanes get softplus(0)
    # and are sliced away wrapper-side.  Softplus lands on the EUP slot.
    lane = jax.lax.broadcasted_iota(jnp.int32, y.shape, dimension=1)
    out = jnp.where(lane >= x_dim, _softplus(y), y)
    out_ref[...] = out.astype(out_ref.dtype)


def _fuse_head_params(p):
    """Build block-diagonal, 128-lane-padded fused head weights (once, wrapper-side)."""
    h1 = p["w_m0"].shape[0]          # 256
    h2 = p["w_m0"].shape[1]          # 64
    h3 = p["w_m1"].shape[1]          # 32
    x_dim = p["w_m2"].shape[1]

    w0 = _round_up(2 * h2, 128)      # fused layer-0 width (128 for h2=64)
    w1 = _round_up(2 * h3, 128)      # fused layer-1 width (64 -> 128)
    out_pad = _round_up(2 * x_dim, 128)  # fused output width (one 128 slab for x_dim<=64)

    f32 = jnp.float32

    # Layer 0: concat along output dim, zero-padded to w0 lanes.
    w_h0 = jnp.zeros((h1, w0), f32)
    w_h0 = w_h0.at[:, :h2].set(p["w_m0"]).at[:, h2:2 * h2].set(p["w_s0"])
    b_h0 = jnp.zeros((1, w0), f32)
    b_h0 = b_h0.at[:, :h2].set(p["b_m0"][0]).at[:, h2:2 * h2].set(p["b_s0"][0])

    # Layer 1: block-diagonal, zero-padded to (w0, w1).
    w_h1 = jnp.zeros((w0, w1), f32)
    w_h1 = w_h1.at[:h2, :h3].set(p["w_m1"]).at[h2:2 * h2, h3:2 * h3].set(p["w_s1"])
    b_h1 = jnp.zeros((1, w1), f32)
    b_h1 = b_h1.at[:, :h3].set(p["b_m1"][0]).at[:, h3:2 * h3].set(p["b_s1"][0])

    # Layer 2: block-diagonal into a single output slab; mean in [0:x_dim],
    # sigma in [x_dim:2*x_dim], zero padding elsewhere.
    w_h2 = jnp.zeros((w1, out_pad), f32)
    w_h2 = w_h2.at[:h3, :x_dim].set(p["w_m2"])
    w_h2 = w_h2.at[h3:2 * h3, x_dim:2 * x_dim].set(p["w_s2"])
    b_h2 = jnp.zeros((1, out_pad), f32)
    b_h2 = b_h2.at[:, :x_dim].set(p["b_m2"][0])
    b_h2 = b_h2.at[:, x_dim:2 * x_dim].set(p["b_s2"][0])

    return (w_h0, b_h0, w_h1, b_h1, w_h2, b_h2), out_pad


def decoder_forward(z, params, *, max_batch_tile=1024):
    """z: (B, z_dim) float32.  params: dict of (in,out) weights / (1,out) biases."""
    B, z_dim = z.shape
    x_dim = params["w_m2"].shape[1]

    # ---- fuse the two heads + two outputs into one branch / one slab ----
    fused_head, out_pad = _fuse_head_params(params)

    # ---- batch tiling: grid=(1,) unless the batch exceeds max_batch_tile ----
    B8 = _round_up(max(B, 8), 8)
    tile = min(B8, _round_up(int(max_batch_tile), 8))
    B_pad = _round_up(B8, tile)
    if B_pad != B:
        z = jnp.pad(z, ((0, B_pad - B), (0, 0)))
    grid = (B_pad // tile,)

    trunk = [params[k] for k in ("w_e0", "b_e0", "w_e1", "b_e1", "w_e2", "b_e2")]
    param_vals = trunk + list(fused_head)

    def full_spec(arr):
        # Weights/biases: full array resident in VMEM, same block for every step.
        return pl.BlockSpec(arr.shape, lambda i: (0, 0))

    in_specs = [pl.BlockSpec((tile, z_dim), lambda i: (i, 0))]
    in_specs += [full_spec(p) for p in param_vals]

    out_specs = pl.BlockSpec((tile, out_pad), lambda i: (i, 0))

    out = pl.pallas_call(
        functools.partial(_decoder_kernel, x_dim=x_dim),
        out_shape=jax.ShapeDtypeStruct((B_pad, out_pad), jnp.float32),
        grid_spec=pltpu.PrefetchScalarGridSpec(
            num_scalar_prefetch=0,
            grid=grid,
            in_specs=in_specs,
            out_specs=out_specs,
        ),
        compiler_params=pltpu.CompilerParams(
            dimension_semantics=("parallel",),
        ),
    )(z, *param_vals)

    # Slice away batch padding and split the fused output slab.
    means = out[:B, :x_dim]
    sigs = out[:B, x_dim:2 * x_dim]
    return means, sigs


def init_decoder_params(key, x_dim, z_dim, h_dim=(256, 256, 64, 32)):
    """Deterministic init; weights stored as (in, out), biases as (1, out)."""
    dims = {
        "e0": (z_dim, h_dim[0]),
        "e1": (h_dim[0], h_dim[0]),
        "e2": (h_dim[0], h_dim[1]),
        "m0": (h_dim[1], h_dim[2]),
        "m1": (h_dim[2], h_dim[3]),
        "m2": (h_dim[3], x_dim),
        "s0": (h_dim[1], h_dim[2]),
        "s1": (h_dim[2], h_dim[3]),
        "s2": (h_dim[3], x_dim),
    }
    params = {}
    keys = jax.random.split(key, 2 * len(dims))
    for i, (name, (fan_in, fan_out)) in enumerate(sorted(dims.items())):
        wk, bk = keys[2 * i], keys[2 * i + 1]
        bound = 1.0 / jnp.sqrt(fan_in)  # matches PyTorch Linear default range
        params[f"w_{name}"] = jax.random.uniform(
            wk, (fan_in, fan_out), jnp.float32, -bound, bound
        )
        params[f"b_{name}"] = jax.random.uniform(
            bk, (1, fan_out), jnp.float32, -bound, bound
        )
    return params


def _reference_forward(z, p):
    """Pure-JAX reference (identical math) for a sanity check."""
    relu = lambda x: jnp.maximum(x, 0.0)
    h = relu(z @ p["w_e0"] + p["b_e0"])
    h = relu(h @ p["w_e1"] + p["b_e1"])
    z_emb = relu(h @ p["w_e2"] + p["b_e2"])
    m = relu(z_emb @ p["w_m0"] + p["b_m0"])
    m = relu(m @ p["w_m1"] + p["b_m1"])
    m = m @ p["w_m2"] + p["b_m2"]
    s = relu(z_emb @ p["w_s0"] + p["b_s0"])
    s = relu(s @ p["w_s1"] + p["b_s1"])
    s = s @ p["w_s2"] + p["b_s2"]
    return m, jax.nn.softplus(s)


if __name__ == "__main__":
    key = jax.random.PRNGKey(0)
    k_param, k_z = jax.random.split(key)

    x_dim, z_dim = 16, 8
    batch = 256          # fits a single tile -> grid=(1,): no per-step overhead

    params = init_decoder_params(k_param, x_dim=x_dim, z_dim=z_dim)
    z = jax.random.normal(k_z, (batch, z_dim), dtype=jnp.float32)

    means, sigs = decoder_forward(z, params)
    jax.block_until_ready((means, sigs))

    ref_means, ref_sigs = _reference_forward(z, params)
    assert means.shape == (batch, x_dim) and sigs.shape == (batch, x_dim)
    assert jnp.allclose(means, ref_means, atol=1e-5, rtol=1e-5)
    assert jnp.allclose(sigs, ref_sigs, atol=1e-5, rtol=1e-5)
    assert bool(jnp.all(sigs >= 0.0))

    # Non-multiple-of-8 batch (wrapper pads + slices).
    z_small = jax.random.normal(k_z, (10, z_dim), dtype=jnp.float32)
    m2, s2 = decoder_forward(z_small, params)
    jax.block_until_ready((m2, s2))
    rm2, rs2 = _reference_forward(z_small, params)
    assert jnp.allclose(m2, rm2, atol=1e-5, rtol=1e-5)
    assert jnp.allclose(s2, rs2, atol=1e-5, rtol=1e-5)

    # Batch larger than the tile cap (exercises grid > 1 / parallel sharding).
    z_big = jax.random.normal(k_z, (2048 + 40, z_dim), dtype=jnp.float32)
    m3, s3 = decoder_forward(z_big, params, max_batch_tile=1024)
    jax.block_until_ready((m3, s3))
    rm3, rs3 = _reference_forward(z_big, params)
    assert jnp.allclose(m3, rm3, atol=1e-5, rtol=1e-5)
    assert jnp.allclose(s3, rs3, atol=1e-5, rtol=1e-5)

    print("KERNEL_OK")
</pallas_src>

<mosaic_0001>
module attributes {stable_mosaic.version = 11 : i64} {
  func.func @_decoder_kernel(%arg0: i32, %arg1: memref<256x8xf32, #tpu.memory_space<vmem>>, %arg2: memref<8x256xf32, #tpu.memory_space<vmem>>, %arg3: memref<1x256xf32, #tpu.memory_space<vmem>>, %arg4: memref<256x256xf32, #tpu.memory_space<vmem>>, %arg5: memref<1x256xf32, #tpu.memory_space<vmem>>, %arg6: memref<256x256xf32, #tpu.memory_space<vmem>>, %arg7: memref<1x256xf32, #tpu.memory_space<vmem>>, %arg8: memref<256x128xf32, #tpu.memory_space<vmem>>, %arg9: memref<1x128xf32, #tpu.memory_space<vmem>>, %arg10: memref<128x128xf32, #tpu.memory_space<vmem>>, %arg11: memref<1x128xf32, #tpu.memory_space<vmem>>, %arg12: memref<128x128xf32, #tpu.memory_space<vmem>>, %arg13: memref<1x128xf32, #tpu.memory_space<vmem>>, %arg14: memref<256x128xf32, #tpu.memory_space<vmem>>) attributes {dimension_semantics = [#tpu.dimension_semantics<parallel>], iteration_bounds = array<i64: 1>, scalar_prefetch = 0 : i64, scratch_operands = 0 : i64, tpu.core_type = #tpu.core_type<tc>, window_params = [{transform_indices = @transform_0, window_bounds = array<i64: 256, 8>}, {pipeline_mode = #tpu.pipeline_mode<synchronous>, transform_indices = @transform_1, window_bounds = array<i64: 8, 256>}, {pipeline_mode = #tpu.pipeline_mode<synchronous>, transform_indices = @transform_2, window_bounds = array<i64: 1, 256>}, {pipeline_mode = #tpu.pipeline_mode<synchronous>, transform_indices = @transform_3, window_bounds = array<i64: 256, 256>}, {pipeline_mode = #tpu.pipeline_mode<synchronous>, transform_indices = @transform_4, window_bounds = array<i64: 1, 256>}, {pipeline_mode = #tpu.pipeline_mode<synchronous>, transform_indices = @transform_5, window_bounds = array<i64: 256, 256>}, {pipeline_mode = #tpu.pipeline_mode<synchronous>, transform_indices = @transform_6, window_bounds = array<i64: 1, 256>}, {pipeline_mode = #tpu.pipeline_mode<synchronous>, transform_indices = @transform_7, window_bounds = array<i64: 256, 128>}, {pipeline_mode = #tpu.pipeline_mode<synchronous>, transform_indices = @transform_8, window_bounds = array<i64: 1, 128>}, {pipeline_mode = #tpu.pipeline_mode<synchronous>, transform_indices = @transform_9, window_bounds = array<i64: 128, 128>}, {pipeline_mode = #tpu.pipeline_mode<synchronous>, transform_indices = @transform_10, window_bounds = array<i64: 1, 128>}, {pipeline_mode = #tpu.pipeline_mode<synchronous>, transform_indices = @transform_11, window_bounds = array<i64: 128, 128>}, {pipeline_mode = #tpu.pipeline_mode<synchronous>, transform_indices = @transform_12, window_bounds = array<i64: 1, 128>}, {transform_indices = @transform_13, window_bounds = array<i64: 256, 128>}]} {
    %c0 = arith.constant 0 : index
    %c0_0 = arith.constant 0 : index
    %0 = vector.load %arg1[%c0, %c0_0] : memref<256x8xf32, #tpu.memory_space<vmem>>, vector<256x8xf32>
    %c0_1 = arith.constant 0 : index
    %c0_2 = arith.constant 0 : index
    %1 = vector.load %arg2[%c0_1, %c0_2] : memref<8x256xf32, #tpu.memory_space<vmem>>, vector<8x256xf32>
    %cst = arith.constant dense<0.000000e+00> : vector<256x256xf32>
    %2 = tpu.matmul %0, %1, %cst {dimension_numbers = #tpu.dot_dimension_numbers<[1], [0], [0], [1], [0, 0, 1, 1], [], []>} : vector<256x8xf32>, vector<8x256xf32>, vector<256x256xf32> -> vector<256x256xf32>
    %c0_3 = arith.constant 0 : index
    %c0_4 = arith.constant 0 : index
    %3 = vector.load %arg3[%c0_3, %c0_4] : memref<1x256xf32, #tpu.memory_space<vmem>>, vector<1x256xf32>
    %4 = vector.broadcast %3 : vector<1x256xf32> to vector<256x256xf32>
    %5 = arith.addf %2, %4 : vector<256x256xf32>
    %cst_5 = arith.constant 0.000000e+00 : f32
    %6 = vector.broadcast %cst_5 : f32 to vector<256x256xf32>
    %7 = arith.maximumf %5, %6 : vector<256x256xf32>
    %c0_6 = arith.constant 0 : index
    %c0_7 = arith.constant 0 : index
    %8 = vector.load %arg4[%c0_6, %c0_7] : memref<256x256xf32, #tpu.memory_space<vmem>>, vector<256x256xf32>
    %cst_8 = arith.constant dense<0.000000e+00> : vector<256x256xf32>
    %9 = tpu.matmul %7, %8, %cst_8 {dimension_numbers = #tpu.dot_dimension_numbers<[1], [0], [0], [1], [0, 0, 1, 1], [], []>} : vector<256x256xf32>, vector<256x256xf32>, vector<256x256xf32> -> vector<256x256xf32>
    %c0_9 = arith.constant 0 : index
    %c0_10 = arith.constant 0 : index
    %10 = vector.load %arg5[%c0_9, %c0_10] : memref<1x256xf32, #tpu.memory_space<vmem>>, vector<1x256xf32>
    %11 = vector.broadcast %10 : vector<1x256xf32> to vector<256x256xf32>
    %12 = arith.addf %9, %11 : vector<256x256xf32>
    %cst_11 = arith.constant 0.000000e+00 : f32
    %13 = vector.broadcast %cst_11 : f32 to vector<256x256xf32>
    %14 = arith.maximumf %12, %13 : vector<256x256xf32>
    %c0_12 = arith.constant 0 : index
    %c0_13 = arith.constant 0 : index
    %15 = vector.load %arg6[%c0_12, %c0_13] : memref<256x256xf32, #tpu.memory_space<vmem>>, vector<256x256xf32>
    %cst_14 = arith.constant dense<0.000000e+00> : vector<256x256xf32>
    %16 = tpu.matmul %14, %15, %cst_14 {dimension_numbers = #tpu.dot_dimension_numbers<[1], [0], [0], [1], [0, 0, 1, 1], [], []>} : vector<256x256xf32>, vector<256x256xf32>, vector<256x256xf32> -> vector<256x256xf32>
    %c0_15 = arith.constant 0 : index
    %c0_16 = arith.constant 0 : index
    %17 = vector.load %arg7[%c0_15, %c0_16] : memref<1x256xf32, #tpu.memory_space<vmem>>, vector<1x256xf32>
    %18 = vector.broadcast %17 : vector<1x256xf32> to vector<256x256xf32>
    %19 = arith.addf %16, %18 : vector<256x256xf32>
    %cst_17 = arith.constant 0.000000e+00 : f32
    %20 = vector.broadcast %cst_17 : f32 to vector<256x256xf32>
    %21 = arith.maximumf %19, %20 : vector<256x256xf32>
    %c0_18 = arith.constant 0 : index
    %c0_19 = arith.constant 0 : index
    %22 = vector.load %arg8[%c0_18, %c0_19] : memref<256x128xf32, #tpu.memory_space<vmem>>, vector<256x128xf32>
    %cst_20 = arith.constant dense<0.000000e+00> : vector<256x128xf32>
    %23 = tpu.matmul %21, %22, %cst_20 {dimension_numbers = #tpu.dot_dimension_numbers<[1], [0], [0], [1], [0, 0, 1, 1], [], []>} : vector<256x256xf32>, vector<256x128xf32>, vector<256x128xf32> -> vector<256x128xf32>
    %c0_21 = arith.constant 0 : index
    %c0_22 = arith.constant 0 : index
    %24 = vector.load %arg9[%c0_21, %c0_22] : memref<1x128xf32, #tpu.memory_space<vmem>>, vector<1x128xf32>
    %25 = vector.broadcast %24 : vector<1x128xf32> to vector<256x128xf32>
    %26 = arith.addf %23, %25 : vector<256x128xf32>
    %cst_23 = arith.constant 0.000000e+00 : f32
    %27 = vector.broadcast %cst_23 : f32 to vector<256x128xf32>
    %28 = arith.maximumf %26, %27 : vector<256x128xf32>
    %c0_24 = arith.constant 0 : index
    %c0_25 = arith.constant 0 : index
    %29 = vector.load %arg10[%c0_24, %c0_25] : memref<128x128xf32, #tpu.memory_space<vmem>>, vector<128x128xf32>
    %cst_26 = arith.constant dense<0.000000e+00> : vector<256x128xf32>
    %30 = tpu.matmul %28, %29, %cst_26 {dimension_numbers = #tpu.dot_dimension_numbers<[1], [0], [0], [1], [0, 0, 1, 1], [], []>} : vector<256x128xf32>, vector<128x128xf32>, vector<256x128xf32> -> vector<256x128xf32>
    %c0_27 = arith.constant 0 : index
    %c0_28 = arith.constant 0 : index
    %31 = vector.load %arg11[%c0_27, %c0_28] : memref<1x128xf32, #tpu.memory_space<vmem>>, vector<1x128xf32>
    %32 = vector.broadcast %31 : vector<1x128xf32> to vector<256x128xf32>
    %33 = arith.addf %30, %32 : vector<256x128xf32>
    %cst_29 = arith.constant 0.000000e+00 : f32
    %34 = vector.broadcast %cst_29 : f32 to vector<256x128xf32>
    %35 = arith.maximumf %33, %34 : vector<256x128xf32>
    %c0_30 = arith.constant 0 : index
    %c0_31 = arith.constant 0 : index
    %36 = vector.load %arg12[%c0_30, %c0_31] : memref<128x128xf32, #tpu.memory_space<vmem>>, vector<128x128xf32>
    %cst_32 = arith.constant dense<0.000000e+00> : vector<256x128xf32>
    %37 = tpu.matmul %35, %36, %cst_32 {dimension_numbers = #tpu.dot_dimension_numbers<[1], [0], [0], [1], [0, 0, 1, 1], [], []>} : vector<256x128xf32>, vector<128x128xf32>, vector<256x128xf32> -> vector<256x128xf32>
    %c0_33 = arith.constant 0 : index
    %c0_34 = arith.constant 0 : index
    %38 = vector.load %arg13[%c0_33, %c0_34] : memref<1x128xf32, #tpu.memory_space<vmem>>, vector<1x128xf32>
    %39 = vector.broadcast %38 : vector<1x128xf32> to vector<256x128xf32>
    %40 = arith.addf %37, %39 : vector<256x128xf32>
    %41 = tpu.iota {dimensions = array<i32: 1>} : vector<256x128xi32>
    %c16_i32 = arith.constant 16 : i32
    %42 = vector.broadcast %c16_i32 : i32 to vector<256x128xi32>
    %43 = arith.cmpi sge, %41, %42 : vector<256x128xi32>
    %cst_35 = arith.constant 0.000000e+00 : f32
    %44 = vector.broadcast %cst_35 : f32 to vector<256x128xf32>
    %45 = arith.maximumf %40, %44 : vector<256x128xf32>
    %46 = math.absf %40 : vector<256x128xf32>
    %cst_36 = arith.constant 0.000000e+00 : f32
    %47 = vector.broadcast %cst_36 : f32 to vector<256x128xf32>
    %48 = arith.subf %47, %46 : vector<256x128xf32>
    %49 = math.exp %48 : vector<256x128xf32>
    %50 = math.log1p %49 : vector<256x128xf32>
    %51 = arith.addf %45, %50 : vector<256x128xf32>
    %52 = arith.select %43, %51, %40 : vector<256x128xi1>, vector<256x128xf32>
    %c0_37 = arith.constant 0 : index
    %c0_38 = arith.constant 0 : index
    %53 = vector.load %arg14[%c0_37, %c0_38] : memref<256x128xf32, #tpu.memory_space<vmem>>, vector<256x128xf32>
    tpu.vector_store %arg14[%c0_37, %c0_38], %52 {strides = array<i32>} : memref<256x128xf32, #tpu.memory_space<vmem>>, vector<256x128xf32>,
    return
  }
  func.func @transform_0(%arg0: i32) -> (i32, i32) {
    %c0_i32 = arith.constant 0 : i32
    %c0_i32_0 = arith.constant 0 : i32
    return %arg0, %c0_i32 : i32, i32
  }
  func.func @transform_1(%arg0: i32) -> (i32, i32) {
    %c0_i32 = arith.constant 0 : i32
    %c0_i32_0 = arith.constant 0 : i32
    %c0_i32_1 = arith.constant 0 : i32
    return %c0_i32, %c0_i32_0 : i32, i32
  }
  func.func @transform_2(%arg0: i32) -> (i32, i32) {
    %c0_i32 = arith.constant 0 : i32
    %c0_i32_0 = arith.constant 0 : i32
    %c0_i32_1 = arith.constant 0 : i32
    return %c0_i32, %c0_i32_0 : i32, i32
  }
  func.func @transform_3(%arg0: i32) -> (i32, i32) {
    %c0_i32 = arith.constant 0 : i32
    %c0_i32_0 = arith.constant 0 : i32
    %c0_i32_1 = arith.constant 0 : i32
    return %c0_i32, %c0_i32_0 : i32, i32
  }
  func.func @transform_4(%arg0: i32) -> (i32, i32) {
    %c0_i32 = arith.constant 0 : i32
    %c0_i32_0 = arith.constant 0 : i32
    %c0_i32_1 = arith.constant 0 : i32
    return %c0_i32, %c0_i32_0 : i32, i32
  }
  func.func @transform_5(%arg0: i32) -> (i32, i32) {
    %c0_i32 = arith.constant 0 : i32
    %c0_i32_0 = arith.constant 0 : i32
    %c0_i32_1 = arith.constant 0 : i32
    return %c0_i32, %c0_i32_0 : i32, i32
  }
  func.func @transform_6(%arg0: i32) -> (i32, i32) {
    %c0_i32 = arith.constant 0 : i32
    %c0_i32_0 = arith.constant 0 : i32
    %c0_i32_1 = arith.constant 0 : i32
    return %c0_i32, %c0_i32_0 : i32, i32
  }
  func.func @transform_7(%arg0: i32) -> (i32, i32) {
    %c0_i32 = arith.constant 0 : i32
    %c0_i32_0 = arith.constant 0 : i32
    %c0_i32_1 = arith.constant 0 : i32
    return %c0_i32, %c0_i32_0 : i32, i32
  }
  func.func @transform_8(%arg0: i32) -> (i32, i32) {
    %c0_i32 = arith.constant 0 : i32
    %c0_i32_0 = arith.constant 0 : i32
    %c0_i32_1 = arith.constant 0 : i32
    return %c0_i32, %c0_i32_0 : i32, i32
  }
  func.func @transform_9(%arg0: i32) -> (i32, i32) {
    %c0_i32 = arith.constant 0 : i32
    %c0_i32_0 = arith.constant 0 : i32
    %c0_i32_1 = arith.constant 0 : i32
    return %c0_i32, %c0_i32_0 : i32, i32
  }
  func.func @transform_10(%arg0: i32) -> (i32, i32) {
    %c0_i32 = arith.constant 0 : i32
    %c0_i32_0 = arith.constant 0 : i32
    %c0_i32_1 = arith.constant 0 : i32
    return %c0_i32, %c0_i32_0 : i32, i32
  }
  func.func @transform_11(%arg0: i32) -> (i32, i32) {
    %c0_i32 = arith.constant 0 : i32
    %c0_i32_0 = arith.constant 0 : i32
    %c0_i32_1 = arith.constant 0 : i32
    return %c0_i32, %c0_i32_0 : i32, i32
  }
  func.func @transform_12(%arg0: i32) -> (i32, i32) {
    %c0_i32 = arith.constant 0 : i32
    %c0_i32_0 = arith.constant 0 : i32
    %c0_i32_1 = arith.constant 0 : i32
    return %c0_i32, %c0_i32_0 : i32, i32
  }
  func.func @transform_13(%arg0: i32) -> (i32, i32) {
    %c0_i32 = arith.constant 0 : i32
    %c0_i32_0 = arith.constant 0 : i32
    return %arg0, %c0_i32 : i32, i32
  }
}

</mosaic_0001>

<bundles_post_ra>
// kernel: tpu_custom_call.1
= control target key start
LH: loop header
LB: loop body
LE: loop exit
PB: predicated region body
PF: predicated region fallthrough
CT: control target
= control target key end

     0   :  { %18 = vsyncpa [#allocation3], 0  ;;  %s4762_s0 = inlined_call_operand.vmem [shape: f32[256,8], index: 0, kind: input, shape index: {}]   ;;  %s4763_s1 = inlined_call_operand.vmem [shape: f32[8,256], index: 1, kind: input, shape index: {}]   ;;  %s4764_s2 = inlined_call_operand.vmem [shape: f32[1,256], index: 2, kind: input, shape index: {}]   ;;  %s4765_s3 = inlined_call_operand.hbm [shape: f32[256,256], index: 3, kind: input, shape index: {}]   ;;  %s4766_s4 = inlined_call_operand.vmem [shape: f32[1,256], index: 4, kind: input, shape index: {}]   ;;  %s4767_s5 = inlined_call_operand.hbm [shape: f32[256,256], index: 5, kind: input, shape index: {}]   ;;  %s4768_s6 = inlined_call_operand.vmem [shape: f32[1,256], index: 6, kind: input, shape index: {}]   ;;  %s4769_s7 = inlined_call_operand.vmem [shape: f32[256,128], index: 7, kind: input, shape index: {}]   ;;  %s4770_s8 = inlined_call_operand.hbm [shape: f32[1,128], index: 8, kind: input, shape index: {}]   ;;  %s4771_s9 = inlined_call_operand.hbm [shape: f32[128,128], index: 9, kind: input, shape index: {}]   ;;  %s4772_s10 = inlined_call_operand.vmem [shape: f32[1,128], index: 10, kind: input, shape index: {}]   ;;  %s4773_s11 = inlined_call_operand.hbm [shape: f32[128,128], index: 11, kind: input, shape index: {}]   ;;  %s4774_s12 = inlined_call_operand.vmem [shape: f32[1,128], index: 12, kind: input, shape index: {}]   ;;  %s4775_s13 = inlined_call_operand.hbm [shape: f32[256,128], index: 13, kind: output, shape index: {}]  }
   0x1   :  { %19 = vsyncpa [#allocation6], 0 }
   0x2   :  { %20 = vsyncpa [#allocation9], 0 }
   0x3   :  { %21 = vsyncpa [#allocation4], 0  ;;  %s47_s27 = sshll.u32 %s4767_s5, 4  ;;  %s3257_s28 = smov [#allocation5]   ;;  %s48_s27 = int_to_ptr.hbm [resolvable:$true] %s47_s27 }
   0x4   :  { %s49_s29 = sshll.u32 %s3257_s28, 4  ;;  %s75_s15 = sshll.u32 %s4771_s9, 4  ;;  %s50_s29 = int_to_ptr.vmem [resolvable:$true] %s49_s29  ;;  %s76_s15 = int_to_ptr.hbm [resolvable:$true] %s75_s15 }
   0x5   :  { %s3258_s16 = smov 256   ;;  %s3259_s17 = smov 16  }
   0x6   :  { %55 = dma.hbm_to_vmem [thread:$0]  %s48_s27, 8192, %s50_s29, [#allocation6], %s3258_s16, %s3258_s16, %s3259_s17  }
   0x7   :  { %s3260_s18 = smov [#allocation8]   ;;  %s3261_s20 = smov 128  }
   0x8   :  { %s77_s19 = sshll.u32 %s3260_s18, 4  ;;  %s3262_s21 = smov 8   ;;  %s78_s19 = int_to_ptr.vmem [resolvable:$true] %s77_s19 }
   0x9   :  { %83 = dma.hbm_to_vmem [thread:$0]  %s76_s15, 2048, %s78_s19, [#allocation9], %s3261_s20, %s3261_s20, %s3262_s21  }
   0xa   :  { %s32_s23 = sshll.u32 %s4765_s3, 4  ;;  %s3263_s24 = smov [#allocation2]   ;;  %s33_s23 = int_to_ptr.hbm [resolvable:$true] %s32_s23 }
   0xb   :  { %s34_s9 = sshll.u32 %s3263_s24, 4  ;;  %s65_s27 = sshll.u32 %s4770_s8, 4  ;;  %s35_s9 = int_to_ptr.vmem [resolvable:$true] %s34_s9  ;;  %s66_s27 = int_to_ptr.hbm [resolvable:$true] %s65_s27 }
   0xc   :  { %40 = dma.hbm_to_vmem [thread:$0]  %s33_s23, 8192, %s35_s9, [#allocation3], %s3258_s16, %s3258_s16, %s3259_s17  }
   0xd   :  { %s3264_s28 = smov [#allocation7]   ;;  %s90_s15 = sshll.u32 %s4773_s11, 4  ;;  %s91_s15 = int_to_ptr.hbm [resolvable:$true] %s90_s15 }
   0xe   :  { %s67_s29 = sshll.u32 %s3264_s28, 4  ;;  %s3265_s3 = smov [#allocation10]   ;;  %s68_s29 = int_to_ptr.vmem [resolvable:$true] %s67_s29 }
   0xf   :  { %70 = dma.hbm_to_vmem [thread:$0]  %s66_s27, 16, %s68_s29, [#allocation6]  }
  0x10   :  { %s92_s18 = sshll.u32 %s3265_s3, 4  ;;  %s93_s18 = int_to_ptr.vmem [resolvable:$true] %s92_s18 }
  0x11   :  { %98 = dma.hbm_to_vmem [thread:$0]  %s91_s15, 2048, %s93_s18, [#allocation9], %s3261_s20, %s3261_s20, %s3262_s21  }
  0x12   :  { %3249 = dma.done.wait [#allocation3], 8192  }
  0x13   :  { %3250 = vsyncadd [#allocation3], 4294959104 }
  0x14   :  { %3251 = dma.done.wait [#allocation6], 8208  }
  0x15   :  { %3252 = vsyncadd [#allocation6], 4294959088 }
  0x16   :  { %3253 = dma.done.wait [#allocation9], 4096  }
  0x17   :  { %3254 = vsyncadd [#allocation9], 4294963200  ;;  %vm161_vm0 = vcmask 64512   ;;  %v153_v0 = vld [vmem:[%s4763_s1] sm:$0xff]  ;;  %v154_v1 = vld [vmem:[%s4763_s1 + $0x8] sm:$0xff]  ;;  %s2865_s23 = sshll.u32 %s4775_s13, 4  ;;  %s2866_s23 = int_to_ptr.hbm [resolvable:$true] %s2865_s23 }
  0x18   :  { %v121_v2 = vld [vmem:[%s4762_s0] sm:$0xff]  ;;  %273 = vmatpush.msra.mxu0 %v153_v0  ;;  %386 = vmatpush.msra.mxu1 %v154_v1  ;;  %v610_v4 = vld [vmem:[#allocation2 + $0x1f0] sm:$0xff]  ;;  %v138_v5 = vld [vmem:[%s4762_s0 + $0x88] sm:$0xff] }
  0x19   :  { %v3370_v3 = vld [vmem:[%s4762_s0 + $0x80] sm:$0xff]  ;;  %2880 = vmatmul.msk.f32.vlgmr.msra.gmra.mxu0 %vm161_vm0, %v121_v2  ;;  %2912 = vmatmul.msk.f32.vlgmr.msra.gmra.mxu1 %vm161_vm0, %v121_v2  ;;  %v578_v6 = vld [vmem:[#allocation2 + $0xf0] sm:$0xff]  ;;  %v122_v11 = vld [vmem:[%s4762_s0 + $0x8] sm:$0xff] }
  0x1a   :  { %2945 = vmatpush.msra.mxu3 %v154_v1  ;;  %2944 = vmatpush.msra.mxu2 %v153_v0  ;;  %v608_v7 = vld [vmem:[#allocation2 + $0x1e0] sm:$0xff]  ;;  %v606_v9 = vld [vmem:[#allocation2 + $0x1d0] sm:$0xff]  ;;  %v140_v19 = vld [vmem:[%s4762_s0 + $0x98] sm:$0xff] }
  0x1b   :  { %2928 = vmatmul.msk.f32.vlgmr.msra.gmra.mxu3 %vm161_vm0, %v3370_v3  ;;  %2897 = vmatmul.msk.f32.vlgmr.msra.gmra.mxu2 %vm161_vm0, %v138_v5  ;;  %v576_v8 = vld [vmem:[#allocation2 + $0xe0] sm:$0xff]  ;;  %v574_v10 = vld [vmem:[#allocation2 + $0xd0] sm:$0xff]  ;;  %v124_v23 = vld [vmem:[%s4762_s0 + $0x18] sm:$0xff] }
  0x1c   :  { %731 = vmatpush.msrb.mxu3 %v610_v4  ;;  %618 = vmatpush.msrb.mxu2 %v578_v6  ;;  %v604_v12 = vld [vmem:[#allocation2 + $0x1c0] sm:$0xff]  ;;  %v139_v14 = vld [vmem:[%s4762_s0 + $0x90] sm:$0xff]  ;;  %v142_v28 = vld [vmem:[%s4762_s0 + $0xa8] sm:$0xff] }
  0x1d   :  { %v572_v13 = vld [vmem:[#allocation2 + $0xc0] sm:$0xff]  ;;  %v602_v15 = vld [vmem:[#allocation2 + $0x1b0] sm:$0xff]  ;;  %v126_v31 = vld [vmem:[%s4762_s0 + $0x28] sm:$0xff] }
  0x1e   :  { %732 = vmatpush.msrb.mxu3 %v608_v7  ;;  %619 = vmatpush.msrb.mxu2 %v576_v8  ;;  %v570_v16 = vld [vmem:[#allocation2 + $0xb0] sm:$0xff]  ;;  %v600_v17 = vld [vmem:[#allocation2 + $0x1a0] sm:$0xff]  ;;  %v144_v36 = vld [vmem:[%s4762_s0 + $0xb8] sm:$0xff] }
  0x1f   :  { %v123_v18 = vld [vmem:[%s4762_s0 + $0x10] sm:$0xff]  ;;  %v568_v20 = vld [vmem:[#allocation2 + $0xa0] sm:$0xff]  ;;  %v128_v39 = vld [vmem:[%s4762_s0 + $0x38] sm:$0xff] }
  0x20   :  { %733 = vmatpush.msrb.mxu3 %v606_v9  ;;  %620 = vmatpush.msrb.mxu2 %v574_v10  ;;  %v598_v21 = vld [vmem:[#allocation2 + $0x190] sm:$0xff]  ;;  %v141_v24 = vld [vmem:[%s4762_s0 + $0xa0] sm:$0xff]  ;;  %v146_v44 = vld [vmem:[%s4762_s0 + $0xc8] sm:$0xff] }
  0x21   :  { %2881 = vmatmul.msk.f32.gmra.mxu0 %vm161_vm0, %v122_v11  ;;  %2913 = vmatmul.msk.f32.gmra.mxu1 %vm161_vm0, %v122_v11  ;;  %v566_v22 = vld [vmem:[#allocation2 + $0x90] sm:$0xff]  ;;  %v596_v25 = vld [vmem:[#allocation2 + $0x180] sm:$0xff]  ;;  %v611_v45 = vld [vmem:[#allocation2 + $0x1f8] sm:$0xff] }
  0x22   :  { %734 = vmatpush.msrb.mxu3 %v604_v12  ;;  %621 = vmatpush.msrb.mxu2 %v572_v13  ;;  %v564_v26 = vld [vmem:[#allocation2 + $0x80] sm:$0xff]  ;;  %v594_v29 = vld [vmem:[#allocation2 + $0x170] sm:$0xff]  ;;  %v609_v48 = vld [vmem:[#allocation2 + $0x1e8] sm:$0xff] }
  0x23   :  { %2929 = vmatmul.msk.f32.gmra.mxu3 %vm161_vm0, %v138_v5  ;;  %2898 = vmatmul.msk.f32.gmra.mxu2 %vm161_vm0, %v139_v14  ;;  %v125_v27 = vld [vmem:[%s4762_s0 + $0x20] sm:$0xff]  ;;  %v562_v30 = vld [vmem:[#allocation2 + $0x70] sm:$0xff]  ;;  %v607_v49 = vld [vmem:[#allocation2 + $0x1d8] sm:$0xff] }
  0x24   :  { %735 = vmatpush.msrb.mxu3 %v602_v15  ;;  %622 = vmatpush.msrb.mxu2 %v570_v16  ;;  %v143_v32 = vld [vmem:[%s4762_s0 + $0xb0] sm:$0xff]  ;;  %v592_v33 = vld [vmem:[#allocation2 + $0x160] sm:$0xff]  ;;  %v130_v50 = vld [vmem:[%s4762_s0 + $0x48] sm:$0xff] }
  0x25   :  { %v560_v34 = vld [vmem:[#allocation2 + $0x60] sm:$0xff]  ;;  %v127_v35 = vld [vmem:[%s4762_s0 + $0x30] sm:$0xff]  ;;  %957 = vmatpush.msrb.mxu1 %v611_v45  ;;  %v579_v52 = vld [vmem:[#allocation2 + $0xf8] sm:$0xff] }
  0x26   :  { %736 = vmatpush.msrb.mxu3 %v600_v17  ;;  %623 = vmatpush.msrb.mxu2 %v568_v20  ;;  %v590_v37 = vld [vmem:[#allocation2 + $0x150] sm:$0xff]  ;;  %v145_v40 = vld [vmem:[%s4762_s0 + $0xc0] sm:$0xff]  ;;  %v605_v53 = vld [vmem:[#allocation2 + $0x1c8] sm:$0xff] }
  0x27   :  { %v558_v38 = vld [vmem:[#allocation2 + $0x50] sm:$0xff]  ;;  %v588_v41 = vld [vmem:[#allocation2 + $0x140] sm:$0xff]  ;;  %958 = vmatpush.msrb.mxu1 %v609_v48  ;;  %844 = vmatpush.msrb.mxu0 %v579_v52  ;;  %v577_v54 = vld [vmem:[#allocation2 + $0xe8] sm:$0xff] }
  0x28   :  { %737 = vmatpush.msrb.mxu3 %v598_v21  ;;  %624 = vmatpush.msrb.mxu2 %v566_v22  ;;  %v556_v42 = vld [vmem:[#allocation2 + $0x40] sm:$0xff]  ;;  %v554_v46 = vld [vmem:[#allocation2 + $0x30] sm:$0xff]  ;;  %v603_v55 = vld [vmem:[#allocation2 + $0x1b8] sm:$0xff] }
  0x29   :  { %2882 = vmatmul.msk.f32.gmra.mxu0 %vm161_vm0, %v123_v18  ;;  %2914 = vmatmul.msk.f32.gmra.mxu1 %vm161_vm0, %v123_v18  ;;  %v129_v43 = vld [vmem:[%s4762_s0 + $0x40] sm:$0xff]  ;;  %v586_v47 = vld [vmem:[#allocation2 + $0x130] sm:$0xff]  ;;  %v575_v58 = vld [vmem:[#allocation2 + $0xd8] sm:$0xff] }
  0x2a   :  { %738 = vmatpush.msrb.mxu3 %v596_v25  ;;  %625 = vmatpush.msrb.mxu2 %v564_v26  ;;  %v147_v51 = vld [vmem:[%s4762_s0 + $0xd0] sm:$0xff]  ;;  %v552_v56 = vld [vmem:[#allocation2 + $0x20] sm:$0xff]  ;;  %v601_v59 = vld [vmem:[#allocation2 + $0x1a8] sm:$0xff] }
  0x2b   :  { %2930 = vmatmul.msk.f32.gmra.mxu3 %vm161_vm0, %v139_v14  ;;  %2899 = vmatmul.msk.f32.gmra.mxu2 %vm161_vm0, %v140_v19  ;;  %v584_v57 = vld [vmem:[#allocation2 + $0x120] sm:$0xff]  ;;  %v573_v60 = vld [vmem:[#allocation2 + $0xc8] sm:$0xff]  ;;  %v599_v61 = vld [vmem:[#allocation2 + $0x198] sm:$0xff] }
  0x2c   :  { %739 = vmatpush.msrb.mxu3 %v594_v29  ;;  %626 = vmatpush.msrb.mxu2 %v562_v30  ;;  %v131_v62 = vld [vmem:[%s4762_s0 + $0x50] sm:$0xff]  ;;  %v148_v63 = vld [vmem:[%s4762_s0 + $0xd8] sm:$0xff]  ;;  %v597_v1 = vld [vmem:[#allocation2 + $0x188] sm:$0xff] }
  0x2d   :  { %959 = vmatpush.msrb.mxu1 %v607_v49  ;;  %845 = vmatpush.msrb.mxu0 %v577_v54  ;;  %v571_v0 = vld [vmem:[#allocation2 + $0xb8] sm:$0xff]  ;;  %v550_v2 = vld [vmem:[#allocation2 + $0x10] sm:$0xff]  ;;  %v569_v4 = vld [vmem:[#allocation2 + $0xa8] sm:$0xff] }
  0x2e   :  { %740 = vmatpush.msrb.mxu3 %v592_v33  ;;  %627 = vmatpush.msrb.mxu2 %v560_v34  ;;  %v595_v5 = vld [vmem:[#allocation2 + $0x178] sm:$0xff]  ;;  %v582_v6 = vld [vmem:[#allocation2 + $0x110] sm:$0xff]  ;;  %v593_v8 = vld [vmem:[#allocation2 + $0x168] sm:$0xff] }
  0x2f   :  { %960 = vmatpush.msrb.mxu1 %v605_v53  ;;  %846 = vmatpush.msrb.mxu0 %v575_v58  ;;  %v567_v7 = vld [vmem:[#allocation2 + $0x98] sm:$0xff]  ;;  %v565_v9 = vld [vmem:[#allocation2 + $0x88] sm:$0xff]  ;;  %v149_v12 = vld [vmem:[%s4762_s0 + $0xe0] sm:$0xff] }
  0x30   :  { %741 = vmatpush.msrb.mxu3 %v590_v37  ;;  %628 = vmatpush.msrb.mxu2 %v558_v38  ;;  %v132_v10 = vld [vmem:[%s4762_s0 + $0x58] sm:$0xff]  ;;  %v589_v14 = vld [vmem:[#allocation2 + $0x148] sm:$0xff]  ;;  %v548_v15 = vld [vmem:[#allocation2] sm:$0xff] }
  0x31   :  { %2883 = vmatmul.msk.f32.gmra.mxu0 %vm161_vm0, %v124_v23  ;;  %2915 = vmatmul.msk.f32.gmra.mxu1 %vm161_vm0, %v124_v23  ;;  %v591_v11 = vld [vmem:[#allocation2 + $0x158] sm:$0xff]  ;;  %v561_v16 = vld [vmem:[#allocation2 + $0x68] sm:$0xff]  ;;  %v580_v18 = vld [vmem:[#allocation2 + $0x100] sm:$0xff] }
  0x32   :  { %742 = vmatpush.msrb.mxu3 %v588_v41  ;;  %629 = vmatpush.msrb.mxu2 %v556_v42  ;;  %v563_v13 = vld [vmem:[#allocation2 + $0x78] sm:$0xff]  ;;  %v585_v20 = vld [vmem:[#allocation2 + $0x128] sm:$0xff]  ;;  %v133_v21 = vld [vmem:[%s4762_s0 + $0x60] sm:$0xff] }
  0x33   :  { %2931 = vmatmul.msk.f32.gmra.mxu3 %vm161_vm0, %v140_v19  ;;  %2900 = vmatmul.msk.f32.gmra.mxu2 %vm161_vm0, %v141_v24  ;;  %v587_v17 = vld [vmem:[#allocation2 + $0x138] sm:$0xff]  ;;  %v557_v22 = vld [vmem:[#allocation2 + $0x48] sm:$0xff]  ;;  %v1196_v29 = vld [vmem:[#allocation5 + $0x1f0] sm:$0xff] }
  0x34   :  { %630 = vmatpush.msrb.mxu2 %v554_v46  ;;  %743 = vmatpush.msrb.mxu3 %v586_v47  ;;  %v559_v19 = vld [vmem:[#allocation2 + $0x58] sm:$0xff]  ;;  %v581_v26 = vld [vmem:[#allocation2 + $0x108] sm:$0xff]  ;;  %v135_v34 = vld [vmem:[%s4762_s0 + $0x70] sm:$0xff] }
  0x35   :  { %961 = vmatpush.msrb.mxu1 %v603_v55  ;;  %847 = vmatpush.msrb.mxu0 %v573_v60  ;;  %v583_v23 = vld [vmem:[#allocation2 + $0x118] sm:$0xff]  ;;  %v134_v30 = vld [vmem:[%s4762_s0 + $0x68] sm:$0xff]  ;;  %v1194_v37 = vld [vmem:[#allocation5 + $0x1e0] sm:$0xff] }
  0x36   :  { %631 = vmatpush.msrb.mxu2 %v552_v56  ;;  %744 = vmatpush.msrb.mxu3 %v584_v57  ;;  %v555_v25 = vld [vmem:[#allocation2 + $0x38] sm:$0xff]  ;;  %v549_v33 = vld [vmem:[#allocation2 + $0x8] sm:$0xff]  ;;  %v1160_v48 = vld [vmem:[#allocation5 + $0xd0] sm:$0xff] }
  0x37   :  { %962 = vmatpush.msrb.mxu1 %v601_v59  ;;  %848 = vmatpush.msrb.mxu0 %v571_v0  ;;  %v136_v38 = vld [vmem:[%s4762_s0 + $0x78] sm:$0xff]  ;;  %v1192_v49 = vld [vmem:[#allocation5 + $0x1d0] sm:$0xff] }
  0x38   :  { %632 = vmatpush.msrb.mxu2 %v550_v2  ;;  %745 = vmatpush.msrb.mxu3 %v582_v6  ;;  %v1190_v2 = vld [vmem:[#allocation5 + $0x1c0] sm:$0xff] }
  0x39   :  { %2884 = vmatmul.msk.f32.gmra.mxu0 %vm161_vm0, %v125_v27  ;;  %2916 = vmatmul.msk.f32.gmra.mxu1 %vm161_vm0, %v125_v27  ;;  %v1164_v27 = vld [vmem:[#allocation5 + $0xf0] sm:$0xff] }
  0x3a   :  { %963 = vmatpush.msrb.mxu1 %v599_v61  ;;  %849 = vmatpush.msrb.mxu0 %v569_v4 }
  0x3b   :  { %2932 = vmatmul.msk.f32.gmra.mxu3 %vm161_vm0, %v141_v24  ;;  %2901 = vmatmul.msk.f32.gmra.mxu2 %vm161_vm0, %v142_v28  ;;  %v150_v24 = vld [vmem:[%s4762_s0 + $0xe8] sm:$0xff] }
  0x3c   :  { %964 = vmatpush.msrb.mxu1 %v597_v1  ;;  %850 = vmatpush.msrb.mxu0 %v567_v7  ;;  %v1158_v1 = vld [vmem:[#allocation5 + $0xc0] sm:$0xff] }
  0x3d   :  { %633 = vmatpush.msrb.mxu2 %v548_v15  ;;  %746 = vmatpush.msrb.mxu3 %v580_v18 }
  0x3e   :  { %965 = vmatpush.msrb.mxu1 %v595_v5  ;;  %851 = vmatpush.msrb.mxu0 %v565_v9 }
  0x3f   :  { %1204 = vmatpush.msra.mxu2 %v1164_v27  ;;  %1317 = vmatpush.msra.mxu3 %v1196_v29 }
  0x40   :  { %966 = vmatpush.msrb.mxu1 %v593_v8  ;;  %852 = vmatpush.msrb.mxu0 %v563_v13 }
  0x41   :  { %2885 = vmatmul.msk.f32.gmra.mxu0 %vm161_vm0, %v126_v31  ;;  %2917 = vmatmul.msk.f32.gmra.mxu1 %vm161_vm0, %v126_v31  ;;  %v551_v31 = vld [vmem:[#allocation2 + $0x18] sm:$0xff] }
  0x42   :  { %967 = vmatpush.msrb.mxu1 %v591_v11  ;;  %853 = vmatpush.msrb.mxu0 %v561_v16 }
  0x43   :  { %2933 = vmatmul.msk.f32.gmra.mxu3 %vm161_vm0, %v142_v28  ;;  %2902 = vmatmul.msk.f32.gmra.mxu2 %vm161_vm0, %v143_v32  ;;  %v553_v28 = vld [vmem:[#allocation2 + $0x28] sm:$0xff] }
  0x44   :  { %968 = vmatpush.msrb.mxu1 %v589_v14  ;;  %854 = vmatpush.msrb.mxu0 %v559_v19 }
  0x45   :  { %1318 = vmatpush.msra.mxu3 %v1194_v37 }
  0x46   :  { %969 = vmatpush.msrb.mxu1 %v587_v17  ;;  %855 = vmatpush.msrb.mxu0 %v557_v22 }
  0x47   :  { %1319 = vmatpush.msra.mxu3 %v1192_v49 }
  0x48   :  { %970 = vmatpush.msrb.mxu1 %v585_v20  ;;  %856 = vmatpush.msrb.mxu0 %v555_v25  ;;  %v1156_v20 = vld [vmem:[#allocation5 + $0xb0] sm:$0xff] }
  0x49   :  { %2886 = vmatmul.msk.f32.gmra.mxu0 %vm161_vm0, %v127_v35  ;;  %2918 = vmatmul.msk.f32.gmra.mxu1 %vm161_vm0, %v127_v35  ;;  %v152_v35 = vld [vmem:[%s4762_s0 + $0xf8] sm:$0xff] }
  0x4a   :  { %971 = vmatpush.msrb.mxu1 %v583_v23  ;;  %857 = vmatpush.msrb.mxu0 %v553_v28 }
  0x4b   :  { %2934 = vmatmul.msk.f32.gmra.mxu3 %vm161_vm0, %v143_v32  ;;  %2903 = vmatmul.msk.f32.gmra.mxu2 %vm161_vm0, %v144_v36  ;;  %v151_v32 = vld [vmem:[%s4762_s0 + $0xf0] sm:$0xff] }
  0x4c   :  { %972 = vmatpush.msrb.mxu1 %v581_v26  ;;  %858 = vmatpush.msrb.mxu0 %v551_v31 }
  0x4d   :  { %1320 = vmatpush.msra.mxu3 %v1190_v2 }
  0x4e   :  { %859 = vmatpush.msrb.mxu0 %v549_v33 }
  0x51   :  { %2887 = vmatmul.msk.f32.gmra.mxu0 %vm161_vm0, %v128_v39  ;;  %2919 = vmatmul.msk.f32.gmra.mxu1 %vm161_vm0, %v128_v39  ;;  %v155_v39 = vld [vmem:[%s4764_s2] sm:$0x3] }
  0x52   :  { %v3531_v41 = vperm.slane %v155_v39, 1 }
  0x53   :  { %2935 = vmatmul.msk.f32.gmra.mxu3 %vm161_vm0, %v144_v36  ;;  %2904 = vmatmul.msk.f32.gmra.mxu2 %vm161_vm0, %v145_v40  ;;  %v1162_v36 = vld [vmem:[#allocation5 + $0xe0] sm:$0xff] }
  0x54   :  { %1205 = vmatpush.msra.mxu2 %v1162_v36 }
  0x56   :  { %1206 = vmatpush.msra.mxu2 %v1160_v48 }
  0x58   :  { %1207 = vmatpush.msra.mxu2 %v1158_v1 }
  0x59   :  { %2888 = vmatmul.msk.f32.gmra.mxu0 %vm161_vm0, %v129_v43  ;;  %2920 = vmatmul.msk.f32.gmra.mxu1 %vm161_vm0, %v129_v43 }
  0x5a   :  { %1208 = vmatpush.msra.mxu2 %v1156_v20  ;;  %v1150_v20 = vld [vmem:[#allocation5 + $0x80] sm:$0xff] }
  0x5b   :  { %2936 = vmatmul.msk.f32.gmra.mxu3 %vm161_vm0, %v145_v40  ;;  %2905 = vmatmul.msk.f32.gmra.mxu2 %vm161_vm0, %v146_v44  ;;  %v3529_v40 = vperm.slane %v155_v39, 0  ;;  %v1186_v39 = vld [vmem:[#allocation5 + $0x1a0] sm:$0xff] }
  0x61   :  { %2889 = vmatmul.msk.f32.gmra.mxu0 %vm161_vm0, %v130_v50  ;;  %2921 = vmatmul.msk.f32.gmra.mxu1 %vm161_vm0, %v130_v50 }
  0x63   :  { %2937 = vmatmul.msk.f32.gmra.mxu3 %vm161_vm0, %v146_v44  ;;  %2906 = vmatmul.msk.f32.gmra.mxu2 %vm161_vm0, %v147_v51 }
  0x69   :  { %2890 = vmatmul.msk.f32.gmra.mxu0 %vm161_vm0, %v131_v62  ;;  %2922 = vmatmul.msk.f32.gmra.mxu1 %vm161_vm0, %v131_v62 }
  0x6b   :  { %2938 = vmatmul.msk.f32.gmra.mxu3 %vm161_vm0, %v147_v51  ;;  %2907 = vmatmul.msk.f32.gmra.mxu2 %vm161_vm0, %v148_v63 }
  0x71   :  { %2891 = vmatmul.msk.f32.gmra.mxu0 %vm161_vm0, %v132_v10  ;;  %2923 = vmatmul.msk.f32.gmra.mxu1 %vm161_vm0, %v132_v10 }
  0x73   :  { %2939 = vmatmul.msk.f32.gmra.mxu3 %vm161_vm0, %v148_v63  ;;  %2908 = vmatmul.msk.f32.gmra.mxu2 %vm161_vm0, %v149_v12 }
  0x79   :  { %2892 = vmatmul.msk.f32.gmra.mxu0 %vm161_vm0, %v133_v21  ;;  %2924 = vmatmul.msk.f32.gmra.mxu1 %vm161_vm0, %v133_v21  ;;  %v1188_v21 = vld [vmem:[#allocation5 + $0x1b0] sm:$0xff] }
  0x7a   :  { %1321 = vmatpush.msra.mxu3 %v1188_v21  ;;  %v1182_v21 = vld [vmem:[#allocation5 + $0x180] sm:$0xff] }
  0x7b   :  { %2940 = vmatmul.msk.f32.gmra.mxu3 %vm161_vm0, %v149_v12  ;;  %2909 = vmatmul.msk.f32.gmra.mxu2 %vm161_vm0, %v150_v24 }
  0x7c   :  { %1322 = vmatpush.msra.mxu3 %v1186_v39 }
  0x81   :  { %2893 = vmatmul.msk.f32.gmra.mxu0 %vm161_vm0, %v134_v30  ;;  %2925 = vmatmul.msk.f32.gmra.mxu1 %vm161_vm0, %v134_v30 }
  0x83   :  { %2941 = vmatmul.msk.f32.gmra.mxu3 %vm161_vm0, %v150_v24  ;;  %2910 = vmatmul.msk.f32.gmra.mxu2 %vm161_vm0, %v151_v32 }
  0x89   :  { %2894 = vmatmul.msk.f32.gmra.mxu0 %vm161_vm0, %v135_v34  ;;  %2926 = vmatmul.msk.f32.gmra.mxu1 %vm161_vm0, %v135_v34 }
  0x8b   :  { %2942 = vmatmul.msk.f32.gmra.mxu3 %vm161_vm0, %v151_v32  ;;  %2911 = vmatmul.msk.f32.gmra.mxu2 %vm161_vm0, %v152_v35 }
  0x91   :  { %2895 = vmatmul.msk.f32.gmra.mxu0 %vm161_vm0, %v136_v38  ;;  %2927 = vmatmul.msk.f32.gmra.mxu1 %vm161_vm0, %v136_v38  ;;  %v1154_v38 = vld [vmem:[#allocation5 + $0xa0] sm:$0xff] }
  0x92   :  { %1209 = vmatpush.msra.mxu2 %v1154_v38 }
  0x93   :  { %2943 = vmatmul.msk.f32.gmra.mxu3 %vm161_vm0, %v152_v35 }
  0x96   :  { %v275_v42 = vpop.f32.mrf.mxu0  ;;  %v388_v43 = vpop.f32.mrf.mxu1 }
  0x97   :  { %v276_v44 = vadd.f32 %v275_v42, %v3529_v40  ;;  %v389_v45 = vadd.f32 %v388_v43, %v3531_v41 }
  0x99   :  { %v484_v46 = vmax.f32 %v276_v44, 0.0  ;;  %v485_v47 = vmax.f32 %v389_v45, 0.0  ;;  %2896 = vmatmul.msk.f32.gmra.mxu0 %vm161_vm0, %v3370_v3 }
  0x9b   :  { %634 = vmatmul.f32.vlgmr.msrb.gmra.mxu2 %v484_v46  ;;  %747 = vmatmul.f32.vlgmr.msrb.gmra.mxu3 %v485_v47 }
  0x9c   :  { %973 = vmatmul.f32.vlgmr.msrb.gmra.mxu1 %v485_v47 }
  0x9e   :  { %v278_v50 = vpop.f32.mrf.mxu0  ;;  %v391_v51 = vpop.f32.mrf.mxu1 }
  0x9f   :  { %v279_v52 = vadd.f32 %v278_v50, %v3529_v40  ;;  %v392_v53 = vadd.f32 %v391_v51, %v3531_v41  ;;  %v3539_v54 = vpop.f32.mrf.mxu3  ;;  %v3541_v55 = vpop.f32.mrf.mxu2 }
  0xa1   :  { %860 = vmatmul.f32.vlgmr.msrb.gmra.mxu0 %v484_v46  ;;  %v486_v56 = vmax.f32 %v279_v52, 0.0  ;;  %v487_v3 = vmax.f32 %v392_v53, 0.0 }
  0xa3   :  { %637 = vmatmul.f32.gmra.mxu2 %v486_v56  ;;  %750 = vmatmul.f32.gmra.mxu3 %v487_v3 }
  0xa4   :  { %976 = vmatmul.f32.gmra.mxu1 %v487_v3 }
  0xa6   :  { %v281_v57 = vpop.f32.mrf.mxu0  ;;  %v394_v58 = vpop.f32.mrf.mxu1 }
  0xa7   :  { %v282_v59 = vadd.f32 %v281_v57, %v3529_v40  ;;  %v395_v60 = vadd.f32 %v394_v58, %v3531_v41  ;;  %v3545_v61 = vpop.f32.mrf.mxu3  ;;  %v3547_v62 = vpop.f32.mrf.mxu2 }
  0xa9   :  { %863 = vmatmul.f32.gmra.mxu0 %v486_v56  ;;  %v488_v63 = vmax.f32 %v282_v59, 0.0  ;;  %v489_v0 = vmax.f32 %v395_v60, 0.0  ;;  %v1152_v59 = vld [vmem:[#allocation5 + $0x90] sm:$0xff] }
  0xaa   :  { %v1184_v60 = vld [vmem:[#allocation5 + $0x190] sm:$0xff]  ;;  %1210 = vmatpush.msra.mxu2 %v1152_v59 }
  0xab   :  { %640 = vmatmul.f32.gmra.mxu2 %v488_v63  ;;  %753 = vmatmul.f32.gmra.mxu3 %v489_v0 }
  0xac   :  { %979 = vmatmul.f32.gmra.mxu1 %v489_v0  ;;  %1323 = vmatpush.msra.mxu3 %v1184_v60 }
  0xad   :  { %1211 = vmatpush.msra.mxu2 %v1150_v20 }
  0xae   :  { %v284_v4 = vpop.f32.mrf.mxu0  ;;  %v397_v5 = vpop.f32.mrf.mxu1  ;;  %1324 = vmatpush.msra.mxu3 %v1182_v21 }
  0xaf   :  { %v285_v6 = vadd.f32 %v284_v4, %v3529_v40  ;;  %v398_v7 = vadd.f32 %v397_v5, %v3531_v41  ;;  %v3551_v8 = vpop.f32.mrf.mxu3  ;;  %v3553_v9 = vpop.f32.mrf.mxu2 }
  0xb1   :  { %866 = vmatmul.f32.gmra.mxu0 %v488_v63  ;;  %v490_v10 = vmax.f32 %v285_v6, 0.0  ;;  %v491_v11 = vmax.f32 %v398_v7, 0.0 }
  0xb3   :  { %643 = vmatmul.f32.gmra.mxu2 %v490_v10  ;;  %756 = vmatmul.f32.gmra.mxu3 %v491_v11 }
  0xb4   :  { %982 = vmatmul.f32.gmra.mxu1 %v491_v11 }
  0xb6   :  { %v287_v12 = vpop.f32.mrf.mxu0  ;;  %v400_v13 = vpop.f32.mrf.mxu1 }
  0xb7   :  { %v288_v14 = vadd.f32 %v287_v12, %v3529_v40  ;;  %v401_v15 = vadd.f32 %v400_v13, %v3531_v41  ;;  %v3557_v16 = vpop.f32.mrf.mxu3  ;;  %v3559_v17 = vpop.f32.mrf.mxu2 }
  0xb9   :  { %869 = vmatmul.f32.gmra.mxu0 %v490_v10  ;;  %v492_v18 = vmax.f32 %v288_v14, 0.0  ;;  %v493_v19 = vmax.f32 %v401_v15, 0.0 }
  0xbb   :  { %646 = vmatmul.f32.gmra.mxu2 %v492_v18  ;;  %759 = vmatmul.f32.gmra.mxu3 %v493_v19 }
  0xbc   :  { %985 = vmatmul.f32.gmra.mxu1 %v493_v19 }
  0xbe   :  { %v290_v22 = vpop.f32.mrf.mxu0  ;;  %v403_v23 = vpop.f32.mrf.mxu1 }
  0xbf   :  { %v291_v24 = vadd.f32 %v290_v22, %v3529_v40  ;;  %v404_v25 = vadd.f32 %v403_v23, %v3531_v41  ;;  %v3563_v26 = vpop.f32.mrf.mxu3  ;;  %v3565_v27 = vpop.f32.mrf.mxu2 }
  0xc1   :  { %872 = vmatmul.f32.gmra.mxu0 %v492_v18  ;;  %v494_v28 = vmax.f32 %v291_v24, 0.0  ;;  %v495_v29 = vmax.f32 %v404_v25, 0.0 }
  0xc3   :  { %649 = vmatmul.f32.gmra.mxu2 %v494_v28  ;;  %762 = vmatmul.f32.gmra.mxu3 %v495_v29 }
  0xc4   :  { %988 = vmatmul.f32.gmra.mxu1 %v495_v29 }
  0xc6   :  { %v293_v30 = vpop.f32.mrf.mxu0  ;;  %v406_v31 = vpop.f32.mrf.mxu1 }
  0xc7   :  { %v294_v32 = vadd.f32 %v293_v30, %v3529_v40  ;;  %v407_v33 = vadd.f32 %v406_v31, %v3531_v41  ;;  %v3569_v34 = vpop.f32.mrf.mxu3  ;;  %v3571_v35 = vpop.f32.mrf.mxu2 }
  0xc9   :  { %875 = vmatmul.f32.gmra.mxu0 %v494_v28  ;;  %v496_v36 = vmax.f32 %v294_v32, 0.0  ;;  %v497_v37 = vmax.f32 %v407_v33, 0.0 }
  0xcb   :  { %652 = vmatmul.f32.gmra.mxu2 %v496_v36  ;;  %765 = vmatmul.f32.gmra.mxu3 %v497_v37 }
  0xcc   :  { %991 = vmatmul.f32.gmra.mxu1 %v497_v37 }
  0xce   :  { %v296_v42 = vpop.f32.mrf.mxu0  ;;  %v409_v43 = vpop.f32.mrf.mxu1 }
  0xcf   :  { %v297_v44 = vadd.f32 %v296_v42, %v3529_v40  ;;  %v410_v45 = vadd.f32 %v409_v43, %v3531_v41  ;;  %v3575_v46 = vpop.f32.mrf.mxu3  ;;  %v3577_v47 = vpop.f32.mrf.mxu2 }
  0xd1   :  { %878 = vmatmul.f32.gmra.mxu0 %v496_v36  ;;  %v498_v48 = vmax.f32 %v297_v44, 0.0  ;;  %v499_v49 = vmax.f32 %v410_v45, 0.0  ;;  %v1165_v44 = vld [vmem:[#allocation5 + $0xf8] sm:$0xff]  ;;  %v1148_v45 = vld [vmem:[#allocation5 + $0x70] sm:$0xff] }
  0xd2   :  { %1430 = vmatpush.msra.mxu0 %v1165_v44  ;;  %1212 = vmatpush.msra.mxu2 %v1148_v45 }
  0xd3   :  { %655 = vmatmul.f32.gmra.mxu2 %v498_v48  ;;  %768 = vmatmul.f32.gmra.mxu3 %v499_v49 }
  0xd4   :  { %994 = vmatmul.f32.gmra.mxu1 %v499_v49  ;;  %v1180_v49 = vld [vmem:[#allocation5 + $0x170] sm:$0xff] }
  0xd5   :  { %1325 = vmatpush.msra.mxu3 %v1180_v49  ;;  %v1144_v49 = vld [vmem:[#allocation5 + $0x50] sm:$0xff] }
  0xd6   :  { %v299_v50 = vpop.f32.mrf.mxu0  ;;  %v412_v51 = vpop.f32.mrf.mxu1 }
  0xd7   :  { %v300_v52 = vadd.f32 %v299_v50, %v3529_v40  ;;  %v413_v53 = vadd.f32 %v412_v51, %v3531_v41  ;;  %v3581_v56 = vpop.f32.mrf.mxu3  ;;  %v3583_v3 = vpop.f32.mrf.mxu2 }
  0xd9   :  { %v501_v57 = vmax.f32 %v413_v53, 0.0  ;;  %881 = vmatmul.f32.gmra.mxu0 %v498_v48  ;;  %v500_v58 = vmax.f32 %v300_v52, 0.0  ;;  %v1197_v48 = vld [vmem:[#allocation5 + $0x1f8] sm:$0xff] }
  0xda   :  { %1543 = vmatpush.msra.mxu1 %v1197_v48 }
  0xdb   :  { %658 = vmatmul.f32.gmra.mxu2 %v500_v58  ;;  %771 = vmatmul.f32.gmra.mxu3 %v501_v57 }
  0xdc   :  { %997 = vmatmul.f32.gmra.mxu1 %v501_v57 }
  0xde   :  { %v302_v63 = vpop.f32.mrf.mxu0  ;;  %v415_v0 = vpop.f32.mrf.mxu1 }
  0xdf   :  { %v303_v1 = vadd.f32 %v302_v63, %v3529_v40  ;;  %v416_v2 = vadd.f32 %v415_v0, %v3531_v41  ;;  %v3587_v4 = vpop.f32.mrf.mxu3  ;;  %v3589_v5 = vpop.f32.mrf.mxu2 }
  0xe1   :  { %v502_v6 = vmax.f32 %v303_v1, 0.0  ;;  %v503_v7 = vmax.f32 %v416_v2, 0.0  ;;  %884 = vmatmul.f32.gmra.mxu0 %v500_v58 }
  0xe3   :  { %661 = vmatmul.f32.gmra.mxu2 %v502_v6  ;;  %774 = vmatmul.f32.gmra.mxu3 %v503_v7 }
  0xe4   :  { %1000 = vmatmul.f32.gmra.mxu1 %v503_v7 }
  0xe6   :  { %v305_v10 = vpop.f32.mrf.mxu0  ;;  %v418_v11 = vpop.f32.mrf.mxu1 }
  0xe7   :  { %v306_v12 = vadd.f32 %v305_v10, %v3529_v40  ;;  %v419_v13 = vadd.f32 %v418_v11, %v3531_v41  ;;  %v3593_v14 = vpop.f32.mrf.mxu3  ;;  %v3595_v15 = vpop.f32.mrf.mxu2 }
  0xe9   :  { %v504_v18 = vmax.f32 %v306_v12, 0.0  ;;  %v505_v19 = vmax.f32 %v419_v13, 0.0  ;;  %887 = vmatmul.f32.gmra.mxu0 %v502_v6  ;;  %v1163_v12 = vld [vmem:[#allocation5 + $0xe8] sm:$0xff]  ;;  %v1146_v13 = vld [vmem:[#allocation5 + $0x60] sm:$0xff] }
  0xea   :  { %1431 = vmatpush.msra.mxu0 %v1163_v12  ;;  %1213 = vmatpush.msra.mxu2 %v1146_v13 }
  0xeb   :  { %664 = vmatmul.f32.gmra.mxu2 %v504_v18  ;;  %777 = vmatmul.f32.gmra.mxu3 %v505_v19 }
  0xec   :  { %1003 = vmatmul.f32.gmra.mxu1 %v505_v19  ;;  %v1178_v19 = vld [vmem:[#allocation5 + $0x160] sm:$0xff]  ;;  %1214 = vmatpush.msra.mxu2 %v1144_v49 }
  0xed   :  { %1326 = vmatpush.msra.mxu3 %v1178_v19 }
  0xee   :  { %v308_v22 = vpop.f32.mrf.mxu0  ;;  %v421_v23 = vpop.f32.mrf.mxu1 }
  0xef   :  { %v309_v24 = vadd.f32 %v308_v22, %v3529_v40  ;;  %v422_v25 = vadd.f32 %v421_v23, %v3531_v41  ;;  %v3599_v28 = vpop.f32.mrf.mxu3  ;;  %v3601_v29 = vpop.f32.mrf.mxu2 }
  0xf1   :  { %v506_v30 = vmax.f32 %v309_v24, 0.0  ;;  %v507_v31 = vmax.f32 %v422_v25, 0.0  ;;  %890 = vmatmul.f32.gmra.mxu0 %v504_v18  ;;  %v1195_v18 = vld [vmem:[#allocation5 + $0x1e8] sm:$0xff] }
  0xf2   :  { %1544 = vmatpush.msra.mxu1 %v1195_v18 }
  0xf3   :  { %667 = vmatmul.f32.gmra.mxu2 %v506_v30  ;;  %780 = vmatmul.f32.gmra.mxu3 %v507_v31 }
  0xf4   :  { %1006 = vmatmul.f32.gmra.mxu1 %v507_v31 }
  0xf6   :  { %v311_v32 = vpop.f32.mrf.mxu0  ;;  %v424_v33 = vpop.f32.mrf.mxu1 }
  0xf7   :  { %v312_v36 = vadd.f32 %v311_v32, %v3529_v40  ;;  %v425_v37 = vadd.f32 %v424_v33, %v3531_v41  ;;  %v3605_v38 = vpop.f32.mrf.mxu3  ;;  %v3607_v39 = vpop.f32.mrf.mxu2  ;;  %v437_v32 = vadd.f32 %v3539_v54, %v3531_v41  ;;  %v1161_v54 = vld [vmem:[#allocation5 + $0xd8] sm:$0xff] }
  0xf8   :  { %1432 = vmatpush.msra.mxu0 %v1161_v54 }
  0xf9   :  { %v508_v42 = vmax.f32 %v312_v36, 0.0  ;;  %v509_v43 = vmax.f32 %v425_v37, 0.0  ;;  %893 = vmatmul.f32.gmra.mxu0 %v506_v30 }
  0xfb   :  { %670 = vmatmul.f32.gmra.mxu2 %v508_v42  ;;  %783 = vmatmul.f32.gmra.mxu3 %v509_v43 }
  0xfc   :  { %1009 = vmatmul.f32.gmra.mxu1 %v509_v43  ;;  %v517_v43 = vmax.f32 %v437_v32, 0.0  ;;  %v333_v32 = vadd.f32 %v3553_v9, %v3529_v40  ;;  %v336_v9 = vadd.f32 %v3559_v17, %v3529_v40  ;;  %v1140_v17 = vld [vmem:[#allocation5 + $0x30] sm:$0xff] }
  0xfe   :  { %v314_v50 = vpop.f32.mrf.mxu0  ;;  %v427_v51 = vpop.f32.mrf.mxu1  ;;  %v522_v49 = vmax.f32 %v333_v32, 0.0 }
  0xff   :  { %v315_v52 = vadd.f32 %v314_v50, %v3529_v40  ;;  %v428_v53 = vadd.f32 %v427_v51, %v3531_v41  ;;  %v3611_v57 = vpop.f32.mrf.mxu3  ;;  %v3613_v58 = vpop.f32.mrf.mxu2  ;;  %v1193_v50 = vld [vmem:[#allocation5 + $0x1d8] sm:$0xff]  ;;  %v1176_v51 = vld [vmem:[#allocation5 + $0x150] sm:$0xff] }
 0x100   :  { %1545 = vmatpush.msra.mxu1 %v1193_v50  ;;  %1327 = vmatpush.msra.mxu3 %v1176_v51 }
 0x101   :  { %v510_v59 = vmax.f32 %v315_v52, 0.0  ;;  %v511_v60 = vmax.f32 %v428_v53, 0.0  ;;  %896 = vmatmul.f32.gmra.mxu0 %v508_v42  ;;  %v3635_v42 = vld [vmem:[%s4766_s4] sm:$0x3]  ;;  %v327_v52 = vadd.f32 %v3541_v55, %v3529_v40  ;;  %v440_v53 = vadd.f32 %v3545_v61, %v3531_v41 }
 0x102   :  { %v3640_v48 = vperm.slane %v3635_v42, 0  ;;  %v330_v55 = vadd.f32 %v3547_v62, %v3529_v40  ;;  %v443_v61 = vadd.f32 %v3551_v8, %v3531_v41  ;;  %v1142_v62 = vld [vmem:[#allocation5 + $0x40] sm:$0xff]  ;;  %v1191_v8 = vld [vmem:[#allocation5 + $0x1c8] sm:$0xff] }
 0x103   :  { %673 = vmatmul.f32.gmra.mxu2 %v510_v59  ;;  %786 = vmatmul.f32.gmra.mxu3 %v511_v60 }
 0x104   :  { %1012 = vmatmul.f32.gmra.mxu1 %v511_v60  ;;  %1215 = vmatpush.msra.mxu2 %v1142_v62 }
 0x105   :  { %1546 = vmatpush.msra.mxu1 %v1191_v8 }
 0x106   :  { %v317_v63 = vpop.f32.mrf.mxu0  ;;  %v430_v0 = vpop.f32.mrf.mxu1  ;;  %1216 = vmatpush.msra.mxu2 %v1140_v17 }
 0x107   :  { %v318_v1 = vadd.f32 %v317_v63, %v3529_v40  ;;  %v431_v2 = vadd.f32 %v430_v0, %v3531_v41  ;;  %v3617_v6 = vpop.f32.mrf.mxu3  ;;  %v3619_v11 = vpop.f32.mrf.mxu2 }
 0x109   :  { %v512_v7 = vmax.f32 %v318_v1, 0.0  ;;  %v513_v10 = vmax.f32 %v431_v2, 0.0  ;;  %899 = vmatmul.f32.gmra.mxu0 %v510_v59  ;;  %v518_v1 = vmax.f32 %v327_v52, 0.0  ;;  %v519_v2 = vmax.f32 %v440_v53, 0.0 }
 0x10b   :  { %676 = vmatmul.f32.gmra.mxu2 %v512_v7  ;;  %789 = vmatmul.f32.gmra.mxu3 %v513_v10 }
 0x10c   :  { %1015 = vmatmul.f32.gmra.mxu1 %v513_v10 }
 0x10e   :  { %v320_v20 = vpop.f32.mrf.mxu0  ;;  %v433_v21 = vpop.f32.mrf.mxu1 }
 0x10f   :  { %v321_v22 = vadd.f32 %v320_v20, %v3529_v40  ;;  %v434_v23 = vadd.f32 %v433_v21, %v3531_v41  ;;  %v3623_v24 = vpop.f32.mrf.mxu3  ;;  %v3625_v31 = vpop.f32.mrf.mxu2  ;;  %v520_v20 = vmax.f32 %v330_v55, 0.0  ;;  %v521_v21 = vmax.f32 %v443_v61, 0.0 }
 0x111   :  { %v514_v25 = vmax.f32 %v321_v22, 0.0  ;;  %v515_v30 = vmax.f32 %v434_v23, 0.0  ;;  %902 = vmatmul.f32.gmra.mxu0 %v512_v7 }
 0x113   :  { %679 = vmatmul.f32.gmra.mxu2 %v514_v25  ;;  %792 = vmatmul.f32.gmra.mxu3 %v515_v30 }
 0x114   :  { %1018 = vmatmul.f32.gmra.mxu1 %v515_v30  ;;  %v1174_v30 = vld [vmem:[#allocation5 + $0x140] sm:$0xff] }
 0x115   :  { %1328 = vmatpush.msra.mxu3 %v1174_v30 }
 0x116   :  { %v323_v33 = vpop.f32.mrf.mxu0 }
 0x117   :  { %v324_v36 = vadd.f32 %v323_v33, %v3529_v40  ;;  %v3630_v37 = vpop.f32.mrf.mxu3  ;;  %v446_v33 = vadd.f32 %v3557_v16, %v3531_v41  ;;  %v449_v16 = vadd.f32 %v3563_v26, %v3531_v41  ;;  %v1189_v26 = vld [vmem:[#allocation5 + $0x1b8] sm:$0xff] }
 0x118   :  { %1547 = vmatpush.msra.mxu1 %v1189_v26 }
 0x119   :  { %v516_v44 = vmax.f32 %v324_v36, 0.0  ;;  %v3637_v45 = vpop.f32.mrf.mxu1  ;;  %905 = vmatmul.f32.gmra.mxu0 %v514_v25  ;;  %v1159_v25 = vld [vmem:[#allocation5 + $0xc8] sm:$0xff]  ;;  %v523_v50 = vmax.f32 %v446_v33, 0.0 }
 0x11a   :  { %1433 = vmatpush.msra.mxu0 %v1159_v25 }
 0x11b   :  { %682 = vmatmul.f32.gmra.mxu2 %v516_v44  ;;  %795 = vmatmul.f32.gmra.mxu3 %v517_v43 }
 0x11c   :  { %1021 = vmatmul.f32.gmra.mxu1 %v517_v43 }
 0x11e   :  { %v635_v59 = vpop.f32.mrf.mxu2  ;;  %v3646_v60 = vpop.f32.mrf.mxu0 }
 0x11f   :  { %v636_v63 = vadd.f32 %v635_v59, %v3640_v48  ;;  %v748_v0 = vpop.f32.mrf.mxu3 }
 0x121   :  { %v3649_v7 = vadd.f32 %v748_v0, %v636_v63  ;;  %v3651_v10 = vpop.f32.mrf.mxu1  ;;  %908 = vmatmul.f32.gmra.mxu0 %v516_v44 }
 0x123   :  { %685 = vmatmul.f32.gmra.mxu2 %v518_v1  ;;  %798 = vmatmul.f32.gmra.mxu3 %v519_v2 }
 0x124   :  { %1024 = vmatmul.f32.gmra.mxu1 %v519_v2  ;;  %v525_v2 = vmax.f32 %v449_v16, 0.0 }
 0x126   :  { %v638_v12 = vpop.f32.mrf.mxu2  ;;  %v3657_v13 = vpop.f32.mrf.mxu0 }
 0x127   :  { %v639_v18 = vadd.f32 %v638_v12, %v3640_v48  ;;  %v751_v19 = vpop.f32.mrf.mxu3  ;;  %v1157_v12 = vld [vmem:[#allocation5 + $0xb8] sm:$0xff] }
 0x128   :  { %1434 = vmatpush.msra.mxu0 %v1157_v12  ;;  %v458_v12 = vadd.f32 %v3581_v56, %v3531_v41  ;;  %v348_v56 = vadd.f32 %v3583_v3, %v3529_v40  ;;  %v1136_v3 = vld [vmem:[#allocation5 + $0x10] sm:$0xff] }
 0x129   :  { %v3660_v22 = vadd.f32 %v751_v19, %v639_v18  ;;  %v3662_v23 = vpop.f32.mrf.mxu1  ;;  %911 = vmatmul.f32.gmra.mxu0 %v518_v1  ;;  %v524_v1 = vmax.f32 %v336_v9, 0.0  ;;  %v1172_v18 = vld [vmem:[#allocation5 + $0x130] sm:$0xff]  ;;  %v339_v19 = vadd.f32 %v3565_v27, %v3529_v40  ;;  %v342_v27 = vadd.f32 %v3571_v35, %v3529_v40  ;;  %v1138_v35 = vld [vmem:[#allocation5 + $0x20] sm:$0xff] }
 0x12a   :  { %1329 = vmatpush.msra.mxu3 %v1172_v18  ;;  %1217 = vmatpush.msra.mxu2 %v1138_v35  ;;  %v464_v35 = vadd.f32 %v3593_v14, %v3531_v41  ;;  %v467_v14 = vadd.f32 %v3599_v28, %v3531_v41  ;;  %v1134_v28 = vld [vmem:[#allocation5] sm:$0xff] }
 0x12b   :  { %688 = vmatmul.f32.gmra.mxu2 %v520_v20  ;;  %801 = vmatmul.f32.gmra.mxu3 %v521_v21  ;;  %v526_v30 = vmax.f32 %v339_v19, 0.0  ;;  %v528_v9 = vmax.f32 %v342_v27, 0.0 }
 0x12c   :  { %1027 = vmatmul.f32.gmra.mxu1 %v521_v21  ;;  %1218 = vmatpush.msra.mxu2 %v1136_v3  ;;  %v1181_v3 = vld [vmem:[#allocation5 + $0x178] sm:$0xff] }
 0x12e   :  { %v641_v36 = vpop.f32.mrf.mxu2  ;;  %v3668_v43 = vpop.f32.mrf.mxu0  ;;  %1219 = vmatpush.msra.mxu2 %v1134_v28  ;;  %v1145_v28 = vld [vmem:[#allocation5 + $0x58] sm:$0xff] }
 0x12f   :  { %v642_v44 = vadd.f32 %v641_v36, %v3640_v48  ;;  %v754_v54 = vpop.f32.mrf.mxu3 }
 0x131   :  { %v3671_v51 = vadd.f32 %v754_v54, %v642_v44  ;;  %v3673_v52 = vpop.f32.mrf.mxu1  ;;  %914 = vmatmul.f32.gmra.mxu0 %v520_v20  ;;  %v452_v20 = vadd.f32 %v3569_v34, %v3531_v41  ;;  %v455_v34 = vadd.f32 %v3575_v46, %v3531_v41  ;;  %v1187_v46 = vld [vmem:[#allocation5 + $0x1a8] sm:$0xff] }
 0x132   :  { %1548 = vmatpush.msra.mxu1 %v1187_v46 }
 0x133   :  { %691 = vmatmul.f32.gmra.mxu2 %v522_v49  ;;  %804 = vmatmul.f32.gmra.mxu3 %v523_v50  ;;  %v527_v32 = vmax.f32 %v452_v20, 0.0  ;;  %v529_v16 = vmax.f32 %v455_v34, 0.0 }
 0x134   :  { %1030 = vmatmul.f32.gmra.mxu1 %v523_v50 }
 0x136   :  { %v644_v53 = vpop.f32.mrf.mxu2  ;;  %v3679_v59 = vpop.f32.mrf.mxu0 }
 0x137   :  { %v645_v63 = vadd.f32 %v644_v53, %v3640_v48  ;;  %v757_v0 = vpop.f32.mrf.mxu3 }
 0x139   :  { %v3682_v55 = vadd.f32 %v757_v0, %v645_v63  ;;  %v3684_v61 = vpop.f32.mrf.mxu1  ;;  %917 = vmatmul.f32.gmra.mxu0 %v522_v49  ;;  %v1155_v0 = vld [vmem:[#allocation5 + $0xa8] sm:$0xff] }
 0x13a   :  { %1435 = vmatpush.msra.mxu0 %v1155_v0  ;;  %v1168_v0 = vld [vmem:[#allocation5 + $0x110] sm:$0xff] }
 0x13b   :  { %694 = vmatmul.f32.gmra.mxu2 %v524_v1  ;;  %807 = vmatmul.f32.gmra.mxu3 %v525_v2 }
 0x13c   :  { %1033 = vmatmul.f32.gmra.mxu1 %v525_v2  ;;  %v345_v2 = vadd.f32 %v3577_v47, %v3529_v40 }
 0x13e   :  { %v647_v21 = vpop.f32.mrf.mxu2  ;;  %v3690_v25 = vpop.f32.mrf.mxu0  ;;  %v530_v20 = vmax.f32 %v345_v2, 0.0 }
 0x13f   :  { %v648_v62 = vadd.f32 %v647_v21, %v3640_v48  ;;  %v760_v8 = vpop.f32.mrf.mxu3  ;;  %v531_v21 = vmax.f32 %v458_v12, 0.0 }
 0x141   :  { %v3693_v33 = vadd.f32 %v760_v8, %v648_v62  ;;  %v3695_v36 = vpop.f32.mrf.mxu1  ;;  %920 = vmatmul.f32.gmra.mxu0 %v524_v1  ;;  %v1170_v1 = vld [vmem:[#allocation5 + $0x120] sm:$0xff]  ;;  %v461_v8 = vadd.f32 %v3587_v4, %v3531_v41  ;;  %v351_v4 = vadd.f32 %v3589_v5, %v3529_v40  ;;  %v354_v5 = vadd.f32 %v3595_v15, %v3529_v40  ;;  %v1151_v15 = vld [vmem:[#allocation5 + $0x88] sm:$0xff] }
 0x142   :  { %1330 = vmatpush.msra.mxu3 %v1170_v1 }
 0x143   :  { %697 = vmatmul.f32.gmra.mxu2 %v526_v30  ;;  %810 = vmatmul.f32.gmra.mxu3 %v527_v32 }
 0x144   :  { %1036 = vmatmul.f32.gmra.mxu1 %v527_v32  ;;  %1331 = vmatpush.msra.mxu3 %v1168_v0  ;;  %v357_v0 = vadd.f32 %v3601_v29, %v3529_v40  ;;  %v1177_v29 = vld [vmem:[#allocation5 + $0x158] sm:$0xff] }
 0x146   :  { %v650_v44 = vpop.f32.mrf.mxu2  ;;  %v3701_v54 = vpop.f32.mrf.mxu0 }
 0x147   :  { %v651_v49 = vadd.f32 %v650_v44, %v3640_v48  ;;  %v763_v50 = vpop.f32.mrf.mxu3  ;;  %v532_v44 = vmax.f32 %v348_v56, 0.0 }
 0x149   :  { %v3704_v53 = vadd.f32 %v763_v50, %v651_v49  ;;  %923 = vmatmul.f32.gmra.mxu0 %v526_v30  ;;  %v3706_v63 = vpop.f32.mrf.mxu1  ;;  %v533_v49 = vmax.f32 %v461_v8, 0.0 }
 0x14b   :  { %700 = vmatmul.f32.gmra.mxu2 %v528_v9  ;;  %813 = vmatmul.f32.gmra.mxu3 %v529_v16 }
 0x14c   :  { %1039 = vmatmul.f32.gmra.mxu1 %v529_v16  ;;  %v1185_v16 = vld [vmem:[#allocation5 + $0x198] sm:$0xff] }
 0x14d   :  { %1549 = vmatpush.msra.mxu1 %v1185_v16  ;;  %v1166_v16 = vld [vmem:[#allocation5 + $0x100] sm:$0xff] }
 0x14e   :  { %v653_v17 = vpop.f32.mrf.mxu2  ;;  %v3712_v26 = vpop.f32.mrf.mxu0  ;;  %1332 = vmatpush.msra.mxu3 %v1166_v16 }
 0x14f   :  { %v654_v18 = vadd.f32 %v653_v17, %v3640_v48  ;;  %v766_v19 = vpop.f32.mrf.mxu3 }
 0x151   :  { %v3715_v62 = vadd.f32 %v766_v19, %v654_v18  ;;  %926 = vmatmul.f32.gmra.mxu0 %v528_v9  ;;  %v3717_v47 = vpop.f32.mrf.mxu1  ;;  %v1153_v9 = vld [vmem:[#allocation5 + $0x98] sm:$0xff]  ;;  %v534_v18 = vmax.f32 %v351_v4, 0.0  ;;  %v535_v19 = vmax.f32 %v464_v35, 0.0  ;;  %v470_v4 = vadd.f32 %v3605_v38, %v3531_v41 }
 0x152   :  { %1436 = vmatpush.msra.mxu0 %v1153_v9  ;;  %v1183_v9 = vld [vmem:[#allocation5 + $0x188] sm:$0xff] }
 0x153   :  { %703 = vmatmul.f32.gmra.mxu2 %v530_v20  ;;  %816 = vmatmul.f32.gmra.mxu3 %v531_v21 }
 0x154   :  { %1042 = vmatmul.f32.gmra.mxu1 %v531_v21  ;;  %1437 = vmatpush.msra.mxu0 %v1151_v15  ;;  %v1173_v15 = vld [vmem:[#allocation5 + $0x138] sm:$0xff] }
 0x155   :  { %1550 = vmatpush.msra.mxu1 %v1183_v9  ;;  %v473_v9 = vadd.f32 %v3611_v57, %v3531_v41  ;;  %v1141_v57 = vld [vmem:[#allocation5 + $0x38] sm:$0xff] }
 0x156   :  { %v656_v30 = vpop.f32.mrf.mxu2  ;;  %v3723_v32 = vpop.f32.mrf.mxu0 }
 0x157   :  { %v657_v27 = vadd.f32 %v656_v30, %v3640_v48  ;;  %v769_v34 = vpop.f32.mrf.mxu3  ;;  %1551 = vmatpush.msra.mxu1 %v1181_v3 }
 0x159   :  { %v3726_v50 = vadd.f32 %v769_v34, %v657_v27  ;;  %929 = vmatmul.f32.gmra.mxu0 %v530_v20  ;;  %v3732_v46 = vpop.f32.mrf.mxu1  ;;  %v536_v27 = vmax.f32 %v354_v5, 0.0  ;;  %v537_v34 = vmax.f32 %v467_v14, 0.0 }
 0x15b   :  { %706 = vmatmul.f32.gmra.mxu2 %v532_v44  ;;  %819 = vmatmul.f32.gmra.mxu3 %v533_v49 }
 0x15c   :  { %1045 = vmatmul.f32.gmra.mxu1 %v533_v49 }
 0x15e   :  { %v659_v1 = vpop.f32.mrf.mxu2  ;;  %v3735_v17 = vpop.f32.mrf.mxu0 }
 0x15f   :  { %v660_v2 = vadd.f32 %v659_v1, %v3640_v48  ;;  %v772_v12 = vpop.f32.mrf.mxu3  ;;  %v1179_v1 = vld [vmem:[#allocation5 + $0x168] sm:$0xff] }
 0x160   :  { %1552 = vmatpush.msra.mxu1 %v1179_v1 }
 0x161   :  { %v3737_v20 = vadd.f32 %v772_v12, %v660_v2  ;;  %932 = vmatmul.f32.gmra.mxu0 %v532_v44  ;;  %v3744_v30 = vpop.f32.mrf.mxu1 }
 0x162   :  { %1553 = vmatpush.msra.mxu1 %v1177_v29  ;;  %v1139_v29 = vld [vmem:[#allocation5 + $0x28] sm:$0xff] }
 0x163   :  { %709 = vmatmul.f32.gmra.mxu2 %v534_v18  ;;  %822 = vmatmul.f32.gmra.mxu3 %v535_v19 }
 0x164   :  { %1048 = vmatmul.f32.gmra.mxu1 %v535_v19  ;;  %v539_v19 = vmax.f32 %v470_v4, 0.0 }
 0x166   :  { %v662_v21 = vpop.f32.mrf.mxu2  ;;  %v3748_v44 = vpop.f32.mrf.mxu0 }
 0x167   :  { %v663_v56 = vadd.f32 %v662_v21, %v3640_v48  ;;  %v775_v8 = vpop.f32.mrf.mxu3  ;;  %v1149_v21 = vld [vmem:[#allocation5 + $0x78] sm:$0xff] }
 0x168   :  { %1438 = vmatpush.msra.mxu0 %v1149_v21  ;;  %v363_v21 = vadd.f32 %v3613_v58, %v3529_v40 }
 0x169   :  { %v3746_v49 = vadd.f32 %v775_v8, %v663_v56  ;;  %935 = vmatmul.f32.gmra.mxu0 %v534_v18  ;;  %v538_v18 = vmax.f32 %v357_v0, 0.0  ;;  %v3757_v14 = vpop.f32.mrf.mxu1  ;;  %v1175_v56 = vld [vmem:[#allocation5 + $0x148] sm:$0xff] }
 0x16a   :  { %v1147_v8 = vld [vmem:[#allocation5 + $0x68] sm:$0xff]  ;;  %1554 = vmatpush.msra.mxu1 %v1175_v56  ;;  %v476_v56 = vadd.f32 %v3617_v6, %v3531_v41  ;;  %v366_v6 = vadd.f32 %v3619_v11, %v3529_v40  ;;  %v1734_v11 = vld [vmem:[%s4769_s7 + $0x70] sm:$0xff] }
 0x16b   :  { %712 = vmatmul.f32.gmra.mxu2 %v536_v27  ;;  %825 = vmatmul.f32.gmra.mxu3 %v537_v34  ;;  %v1143_v0 = vld [vmem:[#allocation5 + $0x48] sm:$0xff] }
 0x16c   :  { %1051 = vmatmul.f32.gmra.mxu1 %v537_v34  ;;  %v360_v34 = vadd.f32 %v3607_v39, %v3529_v40  ;;  %1439 = vmatpush.msra.mxu0 %v1147_v8  ;;  %v1171_v39 = vld [vmem:[#allocation5 + $0x128] sm:$0xff]  ;;  %v543_v58 = vmax.f32 %v476_v56, 0.0  ;;  %v369_v56 = vadd.f32 %v3625_v31, %v3529_v40 }
 0x16d   :  { %1555 = vmatpush.msra.mxu1 %v1173_v15 }
 0x16e   :  { %v665_v35 = vpop.f32.mrf.mxu2  ;;  %v3759_v38 = vpop.f32.mrf.mxu0  ;;  %1440 = vmatpush.msra.mxu0 %v1145_v28  ;;  %v540_v4 = vmax.f32 %v360_v34, 0.0 }
 0x16f   :  { %v666_v2 = vadd.f32 %v665_v35, %v3640_v48  ;;  %v778_v12 = vpop.f32.mrf.mxu3  ;;  %v541_v35 = vmax.f32 %v473_v9, 0.0  ;;  %1556 = vmatpush.msra.mxu1 %v1171_v39  ;;  %v1167_v9 = vld [vmem:[#allocation5 + $0x108] sm:$0xff] }
 0x170   :  { %1441 = vmatpush.msra.mxu0 %v1143_v0 }
 0x171   :  { %v3755_v5 = vadd.f32 %v778_v12, %v666_v2  ;;  %938 = vmatmul.f32.gmra.mxu0 %v536_v27  ;;  %v1169_v2 = vld [vmem:[#allocation5 + $0x118] sm:$0xff]  ;;  %v3768_v12 = vpop.f32.mrf.mxu1 }
 0x172   :  { %1442 = vmatpush.msra.mxu0 %v1141_v57  ;;  %1557 = vmatpush.msra.mxu1 %v1169_v2 }
 0x173   :  { %715 = vmatmul.f32.gmra.mxu2 %v538_v18  ;;  %828 = vmatmul.f32.gmra.mxu3 %v539_v19 }
 0x174   :  { %1054 = vmatmul.f32.gmra.mxu1 %v539_v19  ;;  %v1735_v19 = vld [vmem:[%s4769_s7 + $0x78] sm:$0xff]  ;;  %1443 = vmatpush.msra.mxu0 %v1139_v29 }
 0x175   :  { %1756 = vmatpush.msrb.mxu2 %v1735_v19  ;;  %1558 = vmatpush.msra.mxu1 %v1167_v9  ;;  %v3807_v9 = vperm.slane %v3635_v42, 1 }
 0x176   :  { %v668_v27 = vpop.f32.mrf.mxu2  ;;  %v3780_v8 = vpop.f32.mrf.mxu0 }
 0x177   :  { %v669_v3 = vadd.f32 %v668_v27, %v3640_v48  ;;  %v781_v16 = vpop.f32.mrf.mxu3  ;;  %v1137_v27 = vld [vmem:[#allocation5 + $0x18] sm:$0xff]  ;;  %1757 = vmatpush.msrb.mxu2 %v1734_v11 }
 0x178   :  { %1444 = vmatpush.msra.mxu0 %v1137_v27 }
 0x179   :  { %v3766_v1 = vadd.f32 %v781_v16, %v669_v3  ;;  %941 = vmatmul.f32.gmra.mxu0 %v538_v18  ;;  %v1751_v18 = vld [vmem:[%s4769_s7 + $0xf8] sm:$0xff]  ;;  %v1135_v3 = vld [vmem:[#allocation5 + $0x8] sm:$0xff]  ;;  %v542_v16 = vmax.f32 %v363_v21, 0.0  ;;  %v3789_v39 = vpop.f32.mrf.mxu1 }
 0x17a   :  { %1869 = vmatpush.msrb.mxu3 %v1751_v18  ;;  %1445 = vmatpush.msra.mxu0 %v1135_v3 }
 0x17b   :  { %718 = vmatmul.f32.gmra.mxu2 %v540_v4  ;;  %831 = vmatmul.f32.gmra.mxu3 %v541_v35 }
 0x17c   :  { %1057 = vmatmul.f32.gmra.mxu1 %v541_v35  ;;  %v479_v35 = vadd.f32 %v3623_v24, %v3531_v41  ;;  %v1750_v24 = vld [vmem:[%s4769_s7 + $0xf0] sm:$0xff] }
 0x17d   :  { %1870 = vmatpush.msrb.mxu3 %v1750_v24 }
 0x17e   :  { %v671_v34 = vpop.f32.mrf.mxu2  ;;  %v3792_v29 = vpop.f32.mrf.mxu0  ;;  %v545_v18 = vmax.f32 %v479_v35, 0.0 }
 0x17f   :  { %v672_v15 = vadd.f32 %v671_v34, %v3640_v48  ;;  %v784_v28 = vpop.f32.mrf.mxu3  ;;  %v482_v34 = vadd.f32 %v3630_v37, %v3531_v41 }
 0x181   :  { %v3783_v0 = vadd.f32 %v784_v28, %v672_v15  ;;  %944 = vmatmul.f32.gmra.mxu0 %v540_v4  ;;  %v544_v4 = vmax.f32 %v366_v6, 0.0  ;;  %v3810_v3 = vpop.f32.mrf.mxu1  ;;  %v862_v6 = vadd.f32 %v3646_v60, %v3807_v9  ;;  %v865_v60 = vadd.f32 %v3657_v13, %v3807_v9 }
 0x183   :  { %721 = vmatmul.f32.gmra.mxu2 %v542_v16  ;;  %834 = vmatmul.f32.gmra.mxu3 %v543_v58  ;;  %v975_v31 = vadd.f32 %v3637_v45, %v862_v6  ;;  %v1733_v45 = vld [vmem:[%s4769_s7 + $0x68] sm:$0xff]  ;;  %v978_v13 = vadd.f32 %v3651_v10, %v865_v60 }
 0x184   :  { %1060 = vmatmul.f32.gmra.mxu1 %v543_v58  ;;  %v547_v58 = vmax.f32 %v482_v34, 0.0  ;;  %1758 = vmatpush.msrb.mxu2 %v1733_v45  ;;  %v1072_v34 = vmax.f32 %v3660_v22, 0.0 }
 0x186   :  { %v674_v57 = vpop.f32.mrf.mxu2  ;;  %v3816_v41 = vpop.f32.mrf.mxu0 }
 0x187   :  { %v675_v2 = vadd.f32 %v674_v57, %v3640_v48  ;;  %v787_v19 = vpop.f32.mrf.mxu3  ;;  %v1070_v57 = vmax.f32 %v3649_v7, 0.0  ;;  %v1749_v7 = vld [vmem:[%s4769_s7 + $0xe8] sm:$0xff] }
 0x188   :  { %1871 = vmatpush.msrb.mxu3 %v1749_v7 }
 0x189   :  { %v3794_v21 = vadd.f32 %v787_v19, %v675_v2  ;;  %947 = vmatmul.f32.gmra.mxu0 %v542_v16  ;;  %v546_v16 = vmax.f32 %v369_v56, 0.0  ;;  %v1071_v2 = vmax.f32 %v975_v31, 0.0 }
 0x18b   :  { %724 = vmatmul.f32.gmra.mxu2 %v544_v4  ;;  %837 = vmatmul.f32.gmra.mxu3 %v545_v18 }
 0x18c   :  { %1063 = vmatmul.f32.gmra.mxu1 %v545_v18 }
 0x18e   :  { %v677_v27 = vpop.f32.mrf.mxu2  ;;  %v3827_v18 = vpop.f32.mrf.mxu0 }
 0x18f   :  { %v678_v15 = vadd.f32 %v677_v27, %v3640_v48  ;;  %v790_v28 = vpop.f32.mrf.mxu3  ;;  %v868_v27 = vadd.f32 %v3668_v43, %v3807_v9  ;;  %v871_v43 = vadd.f32 %v3679_v59, %v3807_v9 }
 0x191   :  { %v3814_v40 = vadd.f32 %v790_v28, %v678_v15  ;;  %950 = vmatmul.f32.gmra.mxu0 %v544_v4  ;;  %v3825_v4 = vpop.f32.mrf.mxu1  ;;  %v1073_v28 = vmax.f32 %v978_v13, 0.0  ;;  %v981_v10 = vadd.f32 %v3662_v23, %v868_v27  ;;  %v1732_v23 = vld [vmem:[%s4769_s7 + $0x60] sm:$0xff]  ;;  %v1076_v13 = vmax.f32 %v3682_v55, 0.0 }
 0x192   :  { %1759 = vmatpush.msrb.mxu2 %v1732_v23  ;;  %v1078_v55 = vmax.f32 %v3693_v33, 0.0  ;;  %v1747_v33 = vld [vmem:[%s4769_s7 + $0xd8] sm:$0xff]  ;;  %v1080_v23 = vmax.f32 %v3704_v53, 0.0 }
 0x193   :  { %727 = vmatmul.f32.gmra.mxu2 %v546_v16  ;;  %840 = vmatmul.f32.gmra.mxu3 %v547_v58 }
 0x194   :  { %1066 = vmatmul.f32.gmra.mxu1 %v547_v58 }
 0x196   :  { %v680_v37 = vpop.f32.mrf.mxu2  ;;  %v3845_v58 = vpop.f32.mrf.mxu0 }
 0x197   :  { %v681_v42 = vadd.f32 %v680_v37, %v3640_v48  ;;  %v793_v35 = vpop.f32.mrf.mxu3  ;;  %v1074_v37 = vmax.f32 %v3671_v51, 0.0  ;;  %v984_v51 = vadd.f32 %v3673_v52, %v871_v43 }
 0x199   :  { %v3823_v19 = vadd.f32 %v793_v35, %v681_v42  ;;  %953 = vmatmul.f32.gmra.mxu0 %v546_v16  ;;  %v3842_v16 = vpop.f32.mrf.mxu1  ;;  %v1075_v35 = vmax.f32 %v981_v10, 0.0 }
 0x19b   :  { %1220 = vmatmul.f32.vlgmr.msra.gmra.mxu2 %v1070_v57  ;;  %1333 = vmatmul.f32.vlgmr.msra.gmra.mxu3 %v1071_v2 }
 0x19c   :  { %1559 = vmatmul.f32.vlgmr.msra.gmra.mxu1 %v1071_v2 }
 0x19e   :  { %v683_v11 = vpop.f32.mrf.mxu2  ;;  %v3863_v7 = vpop.f32.mrf.mxu0 }
 0x19f   :  { %v684_v24 = vadd.f32 %v683_v11, %v3640_v48  ;;  %v796_v56 = vpop.f32.mrf.mxu3  ;;  %v874_v11 = vadd.f32 %v3690_v25, %v3807_v9  ;;  %v877_v25 = vadd.f32 %v3701_v54, %v3807_v9 }
 0x1a1   :  { %v3840_v15 = vadd.f32 %v796_v56, %v684_v24  ;;  %1446 = vmatmul.f32.vlgmr.msra.gmra.mxu0 %v1070_v57  ;;  %v1748_v57 = vld [vmem:[%s4769_s7 + $0xe0] sm:$0xff]  ;;  %v3860_v59 = vpop.f32.mrf.mxu1  ;;  %v1077_v56 = vmax.f32 %v984_v51, 0.0  ;;  %v987_v52 = vadd.f32 %v3684_v61, %v874_v11  ;;  %v1731_v61 = vld [vmem:[%s4769_s7 + $0x58] sm:$0xff] }
 0x1a2   :  { %1872 = vmatpush.msrb.mxu3 %v1748_v57  ;;  %1760 = vmatpush.msrb.mxu2 %v1731_v61  ;;  %v880_v57 = vadd.f32 %v3712_v26, %v3807_v9  ;;  %v883_v26 = vadd.f32 %v3723_v32, %v3807_v9  ;;  %v1084_v61 = vmax.f32 %v3726_v50, 0.0  ;;  %v1086_v50 = vmax.f32 %v3737_v20, 0.0 }
 0x1a3   :  { %1223 = vmatmul.f32.gmra.mxu2 %v1072_v34  ;;  %1336 = vmatmul.f32.gmra.mxu3 %v1073_v28 }
 0x1a4   :  { %1562 = vmatmul.f32.gmra.mxu1 %v1073_v28  ;;  %1873 = vmatpush.msrb.mxu3 %v1747_v33  ;;  %v886_v33 = vadd.f32 %v3735_v17, %v3807_v9  ;;  %v889_v17 = vadd.f32 %v3748_v44, %v3807_v9 }
 0x1a6   :  { %v686_v6 = vpop.f32.mrf.mxu2  ;;  %v1002_v20 = vadd.f32 %v3744_v30, %v889_v17  ;;  %v1092_v17 = vmax.f32 %v3766_v1, 0.0 }
 0x1a7   :  { %v687_v31 = vadd.f32 %v686_v6, %v3640_v48  ;;  %v799_v22 = vpop.f32.mrf.mxu3 }
 0x1a9   :  { %v3851_v42 = vadd.f32 %v799_v22, %v687_v31  ;;  %1449 = vmatmul.f32.gmra.mxu0 %v1072_v34  ;;  %v3872_v10 = vpop.f32.mrf.mxu1  ;;  %v1079_v31 = vmax.f32 %v987_v52, 0.0  ;;  %v3879_v22 = vpop.f32.mrf.mxu0 }
 0x1ab   :  { %1226 = vmatmul.f32.gmra.mxu2 %v1074_v37  ;;  %1339 = vmatmul.f32.gmra.mxu3 %v1075_v35 }
 0x1ac   :  { %1565 = vmatmul.f32.gmra.mxu1 %v1075_v35 }
 0x1ae   :  { %v689_v2 = vpop.f32.mrf.mxu2 }
 0x1af   :  { %v690_v60 = vadd.f32 %v689_v2, %v3640_v48  ;;  %v802_v45 = vpop.f32.mrf.mxu3 }
 0x1b1   :  { %v3868_v24 = vadd.f32 %v802_v45, %v690_v60  ;;  %1452 = vmatmul.f32.gmra.mxu0 %v1074_v37  ;;  %v990_v37 = vadd.f32 %v3695_v36, %v877_v25  ;;  %v3894_v60 = vpop.f32.mrf.mxu1  ;;  %v3896_v36 = vpop.f32.mrf.mxu0  ;;  %v993_v45 = vadd.f32 %v3706_v63, %v880_v57  ;;  %v1730_v63 = vld [vmem:[%s4769_s7 + $0x50] sm:$0xff] }
 0x1b2   :  { %1761 = vmatpush.msrb.mxu2 %v1730_v63  ;;  %v892_v63 = vadd.f32 %v3759_v38, %v3807_v9  ;;  %v895_v38 = vadd.f32 %v3780_v8, %v3807_v9 }
 0x1b3   :  { %1229 = vmatmul.f32.gmra.mxu2 %v1076_v13  ;;  %1342 = vmatmul.f32.gmra.mxu3 %v1077_v56  ;;  %v1081_v2 = vmax.f32 %v990_v37, 0.0 }
 0x1b4   :  { %1568 = vmatmul.f32.gmra.mxu1 %v1077_v56  ;;  %v1082_v56 = vmax.f32 %v3715_v62, 0.0  ;;  %v1746_v62 = vld [vmem:[%s4769_s7 + $0xd0] sm:$0xff]  ;;  %v1005_v30 = vadd.f32 %v3757_v14, %v892_v63  ;;  %v1728_v14 = vld [vmem:[%s4769_s7 + $0x40] sm:$0xff]  ;;  %v1008_v8 = vadd.f32 %v3768_v12, %v895_v38  ;;  %v1096_v38 = vmax.f32 %v3794_v21, 0.0 }
 0x1b5   :  { %1874 = vmatpush.msrb.mxu3 %v1746_v62  ;;  %v1098_v21 = vmax.f32 %v3814_v40, 0.0  ;;  %v1742_v40 = vld [vmem:[%s4769_s7 + $0xb0] sm:$0xff] }
 0x1b6   :  { %v692_v34 = vpop.f32.mrf.mxu2 }
 0x1b7   :  { %v693_v27 = vadd.f32 %v692_v34, %v3640_v48  ;;  %v805_v28 = vpop.f32.mrf.mxu3  ;;  %v1083_v34 = vmax.f32 %v993_v45, 0.0 }
 0x1b9   :  { %v3877_v6 = vadd.f32 %v805_v28, %v693_v27  ;;  %1455 = vmatmul.f32.gmra.mxu0 %v1076_v13  ;;  %v3905_v27 = vpop.f32.mrf.mxu1  ;;  %v996_v28 = vadd.f32 %v3717_v47, %v883_v26  ;;  %v3914_v32 = vpop.f32.mrf.mxu0  ;;  %v999_v47 = vadd.f32 %v3732_v46, %v886_v33  ;;  %v1729_v46 = vld [vmem:[%s4769_s7 + $0x48] sm:$0xff] }
 0x1ba   :  { %1762 = vmatpush.msrb.mxu2 %v1729_v46 }
 0x1bb   :  { %1232 = vmatmul.f32.gmra.mxu2 %v1078_v55  ;;  %1345 = vmatmul.f32.gmra.mxu3 %v1079_v31 }
 0x1bc   :  { %1571 = vmatmul.f32.gmra.mxu1 %v1079_v31  ;;  %1763 = vmatpush.msrb.mxu2 %v1728_v14 }
 0x1be   :  { %v695_v54 = vpop.f32.mrf.mxu2 }
 0x1bf   :  { %v696_v43 = vadd.f32 %v695_v54, %v3640_v48  ;;  %v808_v35 = vpop.f32.mrf.mxu3  ;;  %v1085_v54 = vmax.f32 %v996_v28, 0.0  ;;  %v1089_v28 = vmax.f32 %v1002_v20, 0.0 }
 0x1c1   :  { %v3892_v51 = vadd.f32 %v808_v35, %v696_v43  ;;  %1458 = vmatmul.f32.gmra.mxu0 %v1078_v55  ;;  %v3923_v43 = vpop.f32.mrf.mxu1 }
 0x1c3   :  { %1235 = vmatmul.f32.gmra.mxu2 %v1080_v23  ;;  %1348 = vmatmul.f32.gmra.mxu3 %v1081_v2 }
 0x1c4   :  { %1574 = vmatmul.f32.gmra.mxu1 %v1081_v2  ;;  %v3926_v2 = vpop.f32.mrf.mxu0 }
 0x1c6   :  { %v698_v13 = vpop.f32.mrf.mxu2 }
 0x1c7   :  { %v699_v11 = vadd.f32 %v698_v13, %v3640_v48  ;;  %v811_v53 = vpop.f32.mrf.mxu3  ;;  %v1087_v13 = vmax.f32 %v999_v47, 0.0 }
 0x1c9   :  { %v3903_v52 = vadd.f32 %v811_v53, %v699_v11  ;;  %1461 = vmatmul.f32.gmra.mxu0 %v1080_v23  ;;  %v1745_v11 = vld [vmem:[%s4769_s7 + $0xc8] sm:$0xff]  ;;  %v3941_v26 = vpop.f32.mrf.mxu1 }
 0x1ca   :  { %1875 = vmatpush.msrb.mxu3 %v1745_v11  ;;  %v1093_v11 = vmax.f32 %v1008_v8, 0.0 }
 0x1cb   :  { %1238 = vmatmul.f32.gmra.mxu2 %v1082_v56  ;;  %1351 = vmatmul.f32.gmra.mxu3 %v1083_v34 }
 0x1cc   :  { %1577 = vmatmul.f32.gmra.mxu1 %v1083_v34  ;;  %v1088_v34 = vmax.f32 %v3746_v49, 0.0  ;;  %v1090_v49 = vmax.f32 %v3755_v5, 0.0  ;;  %v1744_v5 = vld [vmem:[%s4769_s7 + $0xc0] sm:$0xff] }
 0x1cd   :  { %1876 = vmatpush.msrb.mxu3 %v1744_v5 }
 0x1ce   :  { %v701_v55 = vpop.f32.mrf.mxu2 }
 0x1cf   :  { %v702_v25 = vadd.f32 %v701_v55, %v3640_v48  ;;  %v814_v31 = vpop.f32.mrf.mxu3  ;;  %v3948_v55 = vpop.f32.mrf.mxu0 }
 0x1d1   :  { %v3920_v37 = vadd.f32 %v814_v31, %v702_v25  ;;  %1464 = vmatmul.f32.gmra.mxu0 %v1082_v56  ;;  %v3957_v47 = vpop.f32.mrf.mxu1 }
 0x1d3   :  { %1241 = vmatmul.f32.gmra.mxu2 %v1084_v61  ;;  %1354 = vmatmul.f32.gmra.mxu3 %v1085_v54 }
 0x1d4   :  { %1580 = vmatmul.f32.gmra.mxu1 %v1085_v54  ;;  %v1091_v54 = vmax.f32 %v1005_v30, 0.0  ;;  %v1743_v30 = vld [vmem:[%s4769_s7 + $0xb8] sm:$0xff] }
 0x1d5   :  { %1877 = vmatpush.msrb.mxu3 %v1743_v30 }
 0x1d6   :  { %v704_v35 = vpop.f32.mrf.mxu2 }
 0x1d7   :  { %v705_v23 = vadd.f32 %v704_v35, %v3640_v48  ;;  %v817_v57 = vpop.f32.mrf.mxu3  ;;  %v3959_v35 = vpop.f32.mrf.mxu0  ;;  %1878 = vmatpush.msrb.mxu3 %v1742_v40 }
 0x1d9   :  { %v3931_v45 = vadd.f32 %v817_v57, %v705_v23  ;;  %1467 = vmatmul.f32.gmra.mxu0 %v1084_v61  ;;  %v3974_v20 = vpop.f32.mrf.mxu1 }
 0x1db   :  { %1244 = vmatmul.f32.gmra.mxu2 %v1086_v50  ;;  %1357 = vmatmul.f32.gmra.mxu3 %v1087_v13 }
 0x1dc   :  { %1583 = vmatmul.f32.gmra.mxu1 %v1087_v13  ;;  %v898_v13 = vadd.f32 %v3792_v29, %v3807_v9  ;;  %v901_v29 = vadd.f32 %v3816_v41, %v3807_v9 }
 0x1de   :  { %v707_v44 = vpop.f32.mrf.mxu2  ;;  %v1011_v12 = vadd.f32 %v3789_v39, %v898_v13  ;;  %v1727_v39 = vld [vmem:[%s4769_s7 + $0x38] sm:$0xff] }
 0x1df   :  { %v708_v53 = vadd.f32 %v707_v44, %v3640_v48  ;;  %v820_v56 = vpop.f32.mrf.mxu3  ;;  %v3977_v44 = vpop.f32.mrf.mxu0  ;;  %1764 = vmatpush.msrb.mxu2 %v1727_v39 }
 0x1e1   :  { %v3946_v62 = vadd.f32 %v820_v56, %v708_v53  ;;  %1470 = vmatmul.f32.gmra.mxu0 %v1086_v50  ;;  %v3992_v41 = vpop.f32.mrf.mxu1 }
 0x1e3   :  { %1247 = vmatmul.f32.gmra.mxu2 %v1088_v34  ;;  %1360 = vmatmul.f32.gmra.mxu3 %v1089_v28 }
 0x1e4   :  { %1586 = vmatmul.f32.gmra.mxu1 %v1089_v28  ;;  %v1095_v28 = vmax.f32 %v1011_v12, 0.0  ;;  %v4016_v12 = vld [vmem:[#allocation8 + $0x78] sm:$0xff] }
 0x1e5   :  { %2034 = vmatpush.msrb.mxu0 %v4016_v12 }
 0x1e6   :  { %v710_v25 = vpop.f32.mrf.mxu2 }
 0x1e7   :  { %v711_v31 = vadd.f32 %v710_v25, %v3640_v48  ;;  %v823_v61 = vpop.f32.mrf.mxu3 }
 0x1e9   :  { %v3955_v33 = vadd.f32 %v823_v61, %v711_v31  ;;  %1473 = vmatmul.f32.gmra.mxu0 %v1088_v34  ;;  %v1094_v34 = vmax.f32 %v3783_v0, 0.0  ;;  %v1014_v0 = vadd.f32 %v3810_v3, %v901_v29  ;;  %v910_v29 = vadd.f32 %v3863_v7, %v3807_v9  ;;  %v4038_v7 = vld [vmem:[%s4768_s6] sm:$0x3] }
 0x1eb   :  { %1250 = vmatmul.f32.gmra.mxu2 %v1090_v49  ;;  %1363 = vmatmul.f32.gmra.mxu3 %v1091_v54  ;;  %v1097_v5 = vmax.f32 %v1014_v0, 0.0  ;;  %v1023_v0 = vadd.f32 %v3860_v59, %v910_v29  ;;  %v4046_v59 = vperm.slane %v4038_v7, 0 }
 0x1ec   :  { %1589 = vmatmul.f32.gmra.mxu1 %v1091_v54  ;;  %v904_v54 = vadd.f32 %v3827_v18, %v3807_v9  ;;  %v907_v18 = vadd.f32 %v3845_v58, %v3807_v9 }
 0x1ee   :  { %v713_v23 = vpop.f32.mrf.mxu2  ;;  %v1017_v3 = vadd.f32 %v3825_v4, %v904_v54  ;;  %v1726_v4 = vld [vmem:[%s4769_s7 + $0x30] sm:$0xff]  ;;  %v1020_v58 = vadd.f32 %v3842_v16, %v907_v18 }
 0x1ef   :  { %v714_v57 = vadd.f32 %v713_v23, %v3640_v48  ;;  %v826_v50 = vpop.f32.mrf.mxu3  ;;  %1765 = vmatpush.msrb.mxu2 %v1726_v4  ;;  %v916_v4 = vadd.f32 %v3896_v36, %v3807_v9  ;;  %v919_v36 = vadd.f32 %v3914_v32, %v3807_v9 }
 0x1f0   :  { %v1099_v13 = vmax.f32 %v1017_v3, 0.0  ;;  %v1101_v39 = vmax.f32 %v1020_v58, 0.0  ;;  %v1725_v3 = vld [vmem:[%s4769_s7 + $0x28] sm:$0xff] }
 0x1f1   :  { %v3972_v46 = vadd.f32 %v826_v50, %v714_v57  ;;  %1476 = vmatmul.f32.gmra.mxu0 %v1090_v49  ;;  %v3995_v49 = vpop.f32.mrf.mxu0  ;;  %v4004_v50 = vpop.f32.mrf.mxu1  ;;  %1766 = vmatpush.msrb.mxu2 %v1725_v3  ;;  %v922_v3 = vadd.f32 %v3926_v2, %v3807_v9  ;;  %v925_v2 = vadd.f32 %v3948_v55, %v3807_v9 }
 0x1f3   :  { %1253 = vmatmul.f32.gmra.mxu2 %v1092_v17  ;;  %1366 = vmatmul.f32.gmra.mxu3 %v1093_v11  ;;  %v1038_v55 = vadd.f32 %v3941_v26, %v925_v2 }
 0x1f4   :  { %1592 = vmatmul.f32.gmra.mxu1 %v1093_v11 }
 0x1f6   :  { %v716_v53 = vpop.f32.mrf.mxu2 }
 0x1f7   :  { %v717_v56 = vadd.f32 %v716_v53, %v3640_v48  ;;  %v829_v1 = vpop.f32.mrf.mxu3 }
 0x1f9   :  { %v3983_v63 = vadd.f32 %v829_v1, %v717_v56  ;;  %1479 = vmatmul.f32.gmra.mxu0 %v1092_v17  ;;  %v4011_v11 = vpop.f32.mrf.mxu0  ;;  %v4029_v30 = vpop.f32.mrf.mxu1 }
 0x1fb   :  { %1256 = vmatmul.f32.gmra.mxu2 %v1094_v34  ;;  %1369 = vmatmul.f32.gmra.mxu3 %v1095_v28 }
 0x1fc   :  { %1595 = vmatmul.f32.gmra.mxu1 %v1095_v28 }
 0x1fe   :  { %v719_v25 = vpop.f32.mrf.mxu2 }
 0x1ff   :  { %v720_v31 = vadd.f32 %v719_v25, %v3640_v48  ;;  %v832_v61 = vpop.f32.mrf.mxu3 }
 0x201   :  { %v4000_v14 = vadd.f32 %v832_v61, %v720_v31  ;;  %1482 = vmatmul.f32.gmra.mxu0 %v1094_v34  ;;  %v1100_v34 = vmax.f32 %v3823_v19, 0.0  ;;  %v4031_v16 = vpop.f32.mrf.mxu0  ;;  %v1102_v61 = vmax.f32 %v3840_v15, 0.0  ;;  %v4053_v15 = vld [vmem:[#allocation8 + $0x70] sm:$0xff] }
 0x202   :  { %2035 = vmatpush.msrb.mxu0 %v4053_v15 }
 0x203   :  { %1259 = vmatmul.f32.gmra.mxu2 %v1096_v38  ;;  %1372 = vmatmul.f32.gmra.mxu3 %v1097_v5 }
 0x204   :  { %1598 = vmatmul.f32.gmra.mxu1 %v1097_v5  ;;  %v1103_v5 = vmax.f32 %v1023_v0, 0.0 }
 0x206   :  { %v722_v8 = vpop.f32.mrf.mxu2 }
 0x207   :  { %v723_v23 = vadd.f32 %v722_v8, %v3640_v48  ;;  %v835_v57 = vpop.f32.mrf.mxu3 }
 0x209   :  { %v4009_v17 = vadd.f32 %v835_v57, %v723_v23  ;;  %1485 = vmatmul.f32.gmra.mxu0 %v1096_v38  ;;  %v913_v38 = vadd.f32 %v3879_v22, %v3807_v9  ;;  %v1741_v22 = vld [vmem:[%s4769_s7 + $0xa8] sm:$0xff]  ;;  %v4060_v23 = vpop.f32.mrf.mxu0 }
 0x20a   :  { %1879 = vmatpush.msrb.mxu3 %v1741_v22 }
 0x20b   :  { %1262 = vmatmul.f32.gmra.mxu2 %v1098_v21  ;;  %1375 = vmatmul.f32.gmra.mxu3 %v1099_v13  ;;  %v1026_v8 = vadd.f32 %v3872_v10, %v913_v38  ;;  %v1029_v10 = vadd.f32 %v3894_v60, %v916_v4  ;;  %v1724_v60 = vld [vmem:[%s4769_s7 + $0x20] sm:$0xff] }
 0x20c   :  { %1601 = vmatmul.f32.gmra.mxu1 %v1099_v13  ;;  %v1104_v13 = vmax.f32 %v3851_v42, 0.0  ;;  %v1106_v42 = vmax.f32 %v3868_v24, 0.0  ;;  %v1740_v24 = vld [vmem:[%s4769_s7 + $0xa0] sm:$0xff]  ;;  %1767 = vmatpush.msrb.mxu2 %v1724_v60  ;;  %v928_v60 = vadd.f32 %v3959_v35, %v3807_v9  ;;  %v931_v35 = vadd.f32 %v3977_v44, %v3807_v9 }
 0x20d   :  { %v1105_v58 = vmax.f32 %v1026_v8, 0.0  ;;  %v1107_v0 = vmax.f32 %v1029_v10, 0.0  ;;  %1880 = vmatpush.msrb.mxu3 %v1740_v24 }
 0x20e   :  { %v725_v53 = vpop.f32.mrf.mxu2 }
 0x20f   :  { %v726_v56 = vadd.f32 %v725_v53, %v3640_v48  ;;  %v838_v1 = vpop.f32.mrf.mxu3 }
 0x211   :  { %v4027_v28 = vadd.f32 %v838_v1, %v726_v56  ;;  %1488 = vmatmul.f32.gmra.mxu0 %v1098_v21  ;;  %v4072_v29 = vpop.f32.mrf.mxu0 }
 0x213   :  { %1265 = vmatmul.f32.gmra.mxu2 %v1100_v34  ;;  %1378 = vmatmul.f32.gmra.mxu3 %v1101_v39 }
 0x214   :  { %1604 = vmatmul.f32.gmra.mxu1 %v1101_v39 }
 0x216   :  { %v728_v25 = vpop.f32.mrf.mxu2 }
 0x217   :  { %v729_v31 = vadd.f32 %v728_v25, %v3640_v48  ;;  %v841_v19 = vpop.f32.mrf.mxu3  ;;  %v4048_v48 = vpop.f32.mrf.mxu1  ;;  %v4082_v25 = vld [vmem:[#allocation8 + $0x68] sm:$0xff] }
 0x218   :  { %2036 = vmatpush.msrb.mxu0 %v4082_v25 }
 0x219   :  { %v4043_v54 = vadd.f32 %v841_v19, %v729_v31  ;;  %1491 = vmatmul.f32.gmra.mxu0 %v1100_v34  ;;  %v1032_v31 = vadd.f32 %v3905_v27, %v919_v36  ;;  %v4097_v27 = vpop.f32.mrf.mxu0 }
 0x21b   :  { %1268 = vmatmul.f32.gmra.mxu2 %v1102_v61  ;;  %1381 = vmatmul.f32.gmra.mxu3 %v1103_v5  ;;  %v1109_v8 = vmax.f32 %v1032_v31, 0.0  ;;  %v1113_v31 = vmax.f32 %v1038_v55, 0.0 }
 0x21c   :  { %1607 = vmatmul.f32.gmra.mxu1 %v1103_v5  ;;  %v1108_v5 = vmax.f32 %v3877_v6, 0.0  ;;  %v1110_v6 = vmax.f32 %v3892_v51, 0.0  ;;  %v1739_v51 = vld [vmem:[%s4769_s7 + $0x98] sm:$0xff] }
 0x21d   :  { %1881 = vmatpush.msrb.mxu3 %v1739_v51  ;;  %v934_v51 = vadd.f32 %v3995_v49, %v3807_v9  ;;  %v937_v49 = vadd.f32 %v4011_v11, %v3807_v9 }
 0x21e   :  { %v1221_v57 = vpop.f32.mrf.mxu2 }
 0x21f   :  { %v1222_v21 = vadd.f32 %v1221_v57, %v4046_v59  ;;  %v1334_v18 = vpop.f32.mrf.mxu3  ;;  %v4069_v53 = vpop.f32.mrf.mxu1  ;;  %v1035_v57 = vadd.f32 %v3923_v43, %v922_v3  ;;  %v1723_v43 = vld [vmem:[%s4769_s7 + $0x18] sm:$0xff]  ;;  %v1114_v3 = vmax.f32 %v3920_v37, 0.0  ;;  %v1738_v37 = vld [vmem:[%s4769_s7 + $0x90] sm:$0xff]  ;;  %v1050_v11 = vadd.f32 %v4004_v50, %v937_v49 }
 0x220   :  { %1768 = vmatpush.msrb.mxu2 %v1723_v43  ;;  %1882 = vmatpush.msrb.mxu3 %v1738_v37  ;;  %v1116_v43 = vmax.f32 %v3931_v45, 0.0  ;;  %v1118_v45 = vmax.f32 %v3946_v62, 0.0  ;;  %v1737_v62 = vld [vmem:[%s4769_s7 + $0x88] sm:$0xff] }
 0x221   :  { %v4066_v40 = vadd.f32 %v1334_v18, %v1222_v21  ;;  %1494 = vmatmul.f32.gmra.mxu0 %v1102_v61 }
 0x222   :  { %1883 = vmatpush.msrb.mxu3 %v1737_v62  ;;  %v946_v62 = vadd.f32 %v4072_v29, %v3807_v9 }
 0x223   :  { %1271 = vmatmul.f32.gmra.mxu2 %v1104_v13  ;;  %1384 = vmatmul.f32.gmra.mxu3 %v1105_v58 }
 0x224   :  { %1610 = vmatmul.f32.gmra.mxu1 %v1105_v58  ;;  %v1111_v58 = vmax.f32 %v1035_v57, 0.0 }
 0x226   :  { %v1224_v56 = vpop.f32.mrf.mxu2 }
 0x227   :  { %v1225_v1 = vadd.f32 %v1224_v56, %v4046_v59  ;;  %v1337_v34 = vpop.f32.mrf.mxu3  ;;  %v4090_v38 = vpop.f32.mrf.mxu1 }
 0x228   :  { %v4108_v56 = vpop.f32.mrf.mxu0 }
 0x229   :  { %v4077_v39 = vadd.f32 %v1337_v34, %v1225_v1  ;;  %1497 = vmatmul.f32.gmra.mxu0 %v1104_v13  ;;  %v4113_v1 = vld [vmem:[#allocation8 + $0x60] sm:$0xff] }
 0x22a   :  { %2037 = vmatpush.msrb.mxu0 %v4113_v1 }
 0x22b   :  { %1274 = vmatmul.f32.gmra.mxu2 %v1106_v42  ;;  %1387 = vmatmul.f32.gmra.mxu3 %v1107_v0 }
 0x22c   :  { %1613 = vmatmul.f32.gmra.mxu1 %v1107_v0  ;;  %v1112_v0 = vmax.f32 %v3903_v52, 0.0 }
 0x22e   :  { %v1227_v32 = vpop.f32.mrf.mxu2 }
 0x22f   :  { %v1228_v19 = vadd.f32 %v1227_v32, %v4046_v59  ;;  %v1340_v61 = vpop.f32.mrf.mxu3  ;;  %v4106_v10 = vpop.f32.mrf.mxu1  ;;  %v1041_v32 = vadd.f32 %v3957_v47, %v928_v60  ;;  %v1722_v47 = vld [vmem:[%s4769_s7 + $0x10] sm:$0xff] }
 0x230   :  { %1769 = vmatpush.msrb.mxu2 %v1722_v47  ;;  %v940_v47 = vadd.f32 %v4031_v16, %v3807_v9  ;;  %v943_v16 = vadd.f32 %v4060_v23, %v3807_v9 }
 0x231   :  { %v4095_v22 = vadd.f32 %v1340_v61, %v1228_v19  ;;  %1500 = vmatmul.f32.gmra.mxu0 %v1106_v42  ;;  %v4129_v19 = vpop.f32.mrf.mxu0  ;;  %v1115_v57 = vmax.f32 %v1041_v32, 0.0 }
 0x232   :  { %v1056_v23 = vadd.f32 %v4048_v48, %v943_v16 }
 0x233   :  { %1277 = vmatmul.f32.gmra.mxu2 %v1108_v5  ;;  %1390 = vmatmul.f32.gmra.mxu3 %v1109_v8 }
 0x234   :  { %1616 = vmatmul.f32.gmra.mxu1 %v1109_v8  ;;  %v1125_v48 = vmax.f32 %v1056_v23, 0.0  ;;  %v2021_v23 = vld [vmem:[#allocation8 + $0x38] sm:$0xff] }
 0x236   :  { %v1230_v21 = vpop.f32.mrf.mxu2 }
 0x237   :  { %v1231_v18 = vadd.f32 %v1230_v21, %v4046_v59  ;;  %v1343_v13 = vpop.f32.mrf.mxu3  ;;  %v4126_v26 = vpop.f32.mrf.mxu1  ;;  %v4140_v21 = vld [vmem:[#allocation8 + $0x58] sm:$0xff] }
 0x238   :  { %2038 = vmatpush.msrb.mxu0 %v4140_v21 }
 0x239   :  { %v4104_v4 = vadd.f32 %v1343_v13, %v1231_v18  ;;  %1503 = vmatmul.f32.gmra.mxu0 %v1108_v5  ;;  %v1044_v18 = vadd.f32 %v3974_v20, %v931_v35 }
 0x23b   :  { %1280 = vmatmul.f32.gmra.mxu2 %v1110_v6  ;;  %1393 = vmatmul.f32.gmra.mxu3 %v1111_v58  ;;  %v1117_v20 = vmax.f32 %v1044_v18, 0.0  ;;  %v1121_v18 = vmax.f32 %v1050_v11, 0.0 }
 0x23c   :  { %1619 = vmatmul.f32.gmra.mxu1 %v1111_v58  ;;  %v4150_v58 = vpop.f32.mrf.mxu0 }
 0x23e   :  { %v1233_v34 = vpop.f32.mrf.mxu2 }
 0x23f   :  { %v1234_v42 = vadd.f32 %v1233_v34, %v4046_v59  ;;  %v1346_v36 = vpop.f32.mrf.mxu3  ;;  %v4147_v44 = vpop.f32.mrf.mxu1  ;;  %v1047_v34 = vadd.f32 %v3992_v41, %v934_v51  ;;  %v1721_v41 = vld [vmem:[%s4769_s7 + $0x8] sm:$0xff]  ;;  %v1122_v51 = vmax.f32 %v3972_v46, 0.0  ;;  %v1736_v46 = vld [vmem:[%s4769_s7 + $0x80] sm:$0xff] }
 0x240   :  { %1770 = vmatpush.msrb.mxu2 %v1721_v41  ;;  %1884 = vmatpush.msrb.mxu3 %v1736_v46  ;;  %v1124_v41 = vmax.f32 %v3983_v63, 0.0 }
 0x241   :  { %v4124_v24 = vadd.f32 %v1346_v36, %v1234_v42  ;;  %1506 = vmatmul.f32.gmra.mxu0 %v1110_v6  ;;  %v1119_v32 = vmax.f32 %v1047_v34, 0.0 }
 0x243   :  { %1283 = vmatmul.f32.gmra.mxu2 %v1112_v0  ;;  %1396 = vmatmul.f32.gmra.mxu3 %v1113_v31 }
 0x244   :  { %1622 = vmatmul.f32.gmra.mxu1 %v1113_v31 }
 0x246   :  { %v1236_v61 = vpop.f32.mrf.mxu2 }
 0x247   :  { %v1237_v5 = vadd.f32 %v1236_v61, %v4046_v59  ;;  %v1349_v52 = vpop.f32.mrf.mxu3  ;;  %v4159_v60 = vpop.f32.mrf.mxu1 }
 0x248   :  { %v4166_v61 = vpop.f32.mrf.mxu0 }
 0x249   :  { %v4135_v8 = vadd.f32 %v1349_v52, %v1237_v5  ;;  %1509 = vmatmul.f32.gmra.mxu0 %v1112_v0  ;;  %v2024_v5 = vld [vmem:[#allocation8 + $0x50] sm:$0xff] }
 0x24a   :  { %2039 = vmatpush.msrb.mxu0 %v2024_v5 }
 0x24b   :  { %1286 = vmatmul.f32.gmra.mxu2 %v1114_v3  ;;  %1399 = vmatmul.f32.gmra.mxu3 %v1115_v57 }
 0x24c   :  { %1625 = vmatmul.f32.gmra.mxu1 %v1115_v57  ;;  %v1120_v57 = vmax.f32 %v3955_v33, 0.0 }
 0x24e   :  { %v1239_v13 = vpop.f32.mrf.mxu2 }
 0x24f   :  { %v1240_v6 = vadd.f32 %v1239_v13, %v4046_v59  ;;  %v1352_v2 = vpop.f32.mrf.mxu3  ;;  %v4181_v13 = vpop.f32.mrf.mxu1 }
 0x250   :  { %v4183_v50 = vpop.f32.mrf.mxu0 }
 0x251   :  { %v4155_v55 = vadd.f32 %v1352_v2, %v1240_v6  ;;  %1512 = vmatmul.f32.gmra.mxu0 %v1114_v3  ;;  %v1053_v6 = vadd.f32 %v4029_v30, %v940_v47  ;;  %v1720_v30 = vld [vmem:[%s4769_s7] sm:$0xff] }
 0x252   :  { %1771 = vmatpush.msrb.mxu2 %v1720_v30 }
 0x253   :  { %1289 = vmatmul.f32.gmra.mxu2 %v1116_v43  ;;  %1402 = vmatmul.f32.gmra.mxu3 %v1117_v20  ;;  %v1123_v34 = vmax.f32 %v1053_v6, 0.0  ;;  %v952_v6 = vadd.f32 %v4108_v56, %v3807_v9  ;;  %v955_v56 = vadd.f32 %v4129_v19, %v3807_v9 }
 0x254   :  { %1628 = vmatmul.f32.gmra.mxu1 %v1117_v20  ;;  %2946 = vmatpush.msra.mxu2 %v4016_v12  ;;  %v1059_v12 = vadd.f32 %v4069_v53, %v946_v62 }
 0x256   :  { %v1242_v42 = vpop.f32.mrf.mxu2  ;;  %2947 = vmatpush.msra.mxu2 %v4053_v15  ;;  %v1127_v53 = vmax.f32 %v1059_v12, 0.0 }
 0x257   :  { %v1243_v36 = vadd.f32 %v1242_v42, %v4046_v59  ;;  %v1355_v0 = vpop.f32.mrf.mxu3  ;;  %v4192_v42 = vpop.f32.mrf.mxu1 }
 0x258   :  { %2948 = vmatpush.msra.mxu2 %v4082_v25  ;;  %v1126_v25 = vmax.f32 %v4000_v14, 0.0 }
 0x259   :  { %v4164_v31 = vadd.f32 %v1355_v0, %v1243_v36  ;;  %1515 = vmatmul.f32.gmra.mxu0 %v1116_v43  ;;  %v2023_v36 = vld [vmem:[#allocation8 + $0x48] sm:$0xff]  ;;  %v4201_v0 = vpop.f32.mrf.mxu0 }
 0x25a   :  { %2040 = vmatpush.msrb.mxu0 %v2023_v36  ;;  %2949 = vmatpush.msra.mxu2 %v4113_v1  ;;  %v2022_v1 = vld [vmem:[#allocation8 + $0x40] sm:$0xff] }
 0x25b   :  { %1292 = vmatmul.f32.gmra.mxu2 %v1118_v45  ;;  %1405 = vmatmul.f32.gmra.mxu3 %v1119_v32 }
 0x25c   :  { %1631 = vmatmul.f32.gmra.mxu1 %v1119_v32  ;;  %2950 = vmatpush.msra.mxu2 %v4140_v21 }
 0x25d   :  { %2041 = vmatpush.msrb.mxu0 %v2022_v1 }
 0x25e   :  { %v1245_v52 = vpop.f32.mrf.mxu2  ;;  %2951 = vmatpush.msra.mxu2 %v2024_v5 }
 0x25f   :  { %v1246_v3 = vadd.f32 %v1245_v52, %v4046_v59  ;;  %v1358_v35 = vpop.f32.mrf.mxu3  ;;  %v4214_v52 = vpop.f32.mrf.mxu1  ;;  %2042 = vmatpush.msrb.mxu0 %v2021_v23 }
 0x260   :  { %2952 = vmatpush.msra.mxu2 %v2023_v36 }
 0x261   :  { %v4179_v37 = vadd.f32 %v1358_v35, %v1246_v3  ;;  %1518 = vmatmul.f32.gmra.mxu0 %v1118_v45  ;;  %v4218_v3 = vpop.f32.mrf.mxu0  ;;  %v949_v35 = vadd.f32 %v4097_v27, %v3807_v9  ;;  %v1128_v27 = vmax.f32 %v4009_v17, 0.0  ;;  %v1130_v17 = vmax.f32 %v4027_v28, 0.0 }
 0x262   :  { %2953 = vmatpush.msra.mxu2 %v2022_v1  ;;  %v4249_v28 = vperm.slane %v4038_v7, 1  ;;  %v2020_v1 = vld [vmem:[#allocation8 + $0x30] sm:$0xff] }
 0x263   :  { %1295 = vmatmul.f32.gmra.mxu2 %v1120_v57  ;;  %1408 = vmatmul.f32.gmra.mxu3 %v1121_v18  ;;  %v1062_v21 = vadd.f32 %v4090_v38, %v949_v35  ;;  %v1065_v38 = vadd.f32 %v4106_v10, %v952_v6 }
 0x264   :  { %1634 = vmatmul.f32.gmra.mxu1 %v1121_v18  ;;  %2954 = vmatpush.msra.mxu2 %v2021_v23  ;;  %v1448_v62 = vadd.f32 %v4150_v58, %v4249_v28  ;;  %v1451_v35 = vadd.f32 %v4166_v61, %v4249_v28  ;;  %v1658_v61 = vmax.f32 %v4077_v39, 0.0  ;;  %v1457_v39 = vadd.f32 %v4201_v0, %v4249_v28  ;;  %v2019_v23 = vld [vmem:[#allocation8 + $0x28] sm:$0xff] }
 0x265   :  { %v1131_v36 = vmax.f32 %v1065_v38, 0.0  ;;  %2043 = vmatpush.msrb.mxu0 %v2020_v1  ;;  %v1662_v0 = vmax.f32 %v4104_v4, 0.0 }
 0x266   :  { %v1248_v2 = vpop.f32.mrf.mxu2  ;;  %v1561_v7 = vadd.f32 %v4147_v44, %v1448_v62  ;;  %v1564_v44 = vadd.f32 %v4159_v60, %v1451_v35  ;;  %2955 = vmatpush.msra.mxu2 %v2020_v1  ;;  %v2018_v35 = vld [vmem:[#allocation8 + $0x20] sm:$0xff] }
 0x267   :  { %v1249_v43 = vadd.f32 %v1248_v2, %v4046_v59  ;;  %v1361_v33 = vpop.f32.mrf.mxu3  ;;  %v4227_v18 = vpop.f32.mrf.mxu1  ;;  %2044 = vmatpush.msrb.mxu0 %v2019_v23  ;;  %v2191_v1 = vld [vmem:[#allocation10 + $0x60] sm:$0xff] }
 0x268   :  { %v1657_v58 = vmax.f32 %v1561_v7, 0.0  ;;  %2956 = vmatpush.msra.mxu2 %v2019_v23 }
 0x269   :  { %v4190_v20 = vadd.f32 %v1361_v33, %v1249_v43  ;;  %1521 = vmatmul.f32.gmra.mxu0 %v1120_v57  ;;  %v1129_v43 = vmax.f32 %v1062_v21, 0.0  ;;  %v4234_v33 = vpop.f32.mrf.mxu0  ;;  %v2193_v21 = vld [vmem:[#allocation10 + $0x70] sm:$0xff] }
 0x26a   :  { %v1463_v4 = vadd.f32 %v4234_v33, %v4249_v28  ;;  %2045 = vmatpush.msrb.mxu0 %v2018_v35  ;;  %2957 = vmatpush.msra.mxu2 %v2018_v35 }
 0x26b   :  { %1298 = vmatmul.f32.gmra.mxu2 %v1122_v51  ;;  %1411 = vmatmul.f32.gmra.mxu3 %v1123_v34 }
 0x26c   :  { %1637 = vmatmul.f32.gmra.mxu1 %v1123_v34 }
 0x26e   :  { %v1251_v45 = vpop.f32.mrf.mxu2 }
 0x26f   :  { %v1252_v49 = vadd.f32 %v1251_v45, %v4046_v59  ;;  %v1364_v32 = vpop.f32.mrf.mxu3  ;;  %v4243_v46 = vpop.f32.mrf.mxu1  ;;  %v2194_v45 = vld [vmem:[#allocation10 + $0x78] sm:$0xff] }
 0x270   :  { %2199 = vmatpush.msrb.mxu1 %v2194_v45  ;;  %v1570_v45 = vadd.f32 %v4192_v42, %v1457_v39  ;;  %v2017_v39 = vld [vmem:[#allocation8 + $0x18] sm:$0xff] }
 0x271   :  { %v4209_v11 = vadd.f32 %v1364_v32, %v1252_v49  ;;  %1524 = vmatmul.f32.gmra.mxu0 %v1122_v51  ;;  %v4245_v10 = vpop.f32.mrf.mxu0  ;;  %v1068_v49 = vadd.f32 %v4126_v26, %v955_v56  ;;  %2958 = vmatpush.msra.mxu2 %v2017_v39 }
 0x272   :  { %2200 = vmatpush.msrb.mxu1 %v2193_v21  ;;  %v1663_v62 = vmax.f32 %v1570_v45, 0.0  ;;  %2046 = vmatpush.msrb.mxu0 %v2017_v39 }
 0x273   :  { %1301 = vmatmul.f32.gmra.mxu2 %v1124_v41  ;;  %1414 = vmatmul.f32.gmra.mxu3 %v1125_v48  ;;  %v1133_v12 = vmax.f32 %v1068_v49, 0.0 }
 0x274   :  { %1640 = vmatmul.f32.gmra.mxu1 %v1125_v48 }
 0x276   :  { %v1254_v15 = vpop.f32.mrf.mxu2 }
 0x277   :  { %v1255_v63 = vadd.f32 %v1254_v15, %v4046_v59  ;;  %v1367_v29 = vpop.f32.mrf.mxu3  ;;  %v4257_v26 = vpop.f32.mrf.mxu1 }
 0x279   :  { %v4223_v57 = vadd.f32 %v1367_v29, %v1255_v63  ;;  %1527 = vmatmul.f32.gmra.mxu0 %v1124_v41  ;;  %v1132_v41 = vmax.f32 %v4043_v54, 0.0  ;;  %v4260_v15 = vpop.f32.mrf.mxu0 }
 0x27b   :  { %1304 = vmatmul.f32.gmra.mxu2 %v1126_v25  ;;  %1417 = vmatmul.f32.gmra.mxu3 %v1127_v53 }
 0x27c   :  { %1643 = vmatmul.f32.gmra.mxu1 %v1127_v53 }
 0x27e   :  { %v1257_v47 = vpop.f32.mrf.mxu2 }
 0x27f   :  { %v1258_v5 = vadd.f32 %v1257_v47, %v4046_v59  ;;  %v1370_v14 = vpop.f32.mrf.mxu3  ;;  %v4278_v60 = vpop.f32.mrf.mxu1 }
 0x281   :  { %v4232_v2 = vadd.f32 %v1370_v14, %v1258_v5  ;;  %1530 = vmatmul.f32.gmra.mxu0 %v1126_v25  ;;  %v1656_v25 = vmax.f32 %v4066_v40, 0.0  ;;  %v4270_v14 = vpop.f32.mrf.mxu0 }
 0x283   :  { %1307 = vmatmul.f32.gmra.mxu2 %v1128_v27  ;;  %1420 = vmatmul.f32.gmra.mxu3 %v1129_v43 }
 0x284   :  { %1646 = vmatmul.f32.gmra.mxu1 %v1129_v43  ;;  %v1659_v43 = vmax.f32 %v1564_v44, 0.0 }
 0x286   :  { %v1260_v51 = vpop.f32.mrf.mxu2 }
 0x287   :  { %v1261_v16 = vadd.f32 %v1260_v51, %v4046_v59  ;;  %v1373_v34 = vpop.f32.mrf.mxu3 }
 0x289   :  { %v4241_v30 = vadd.f32 %v1373_v34, %v1261_v16  ;;  %1533 = vmatmul.f32.gmra.mxu0 %v1128_v27  ;;  %v1454_v27 = vadd.f32 %v4183_v50, %v4249_v28 }
 0x28b   :  { %1310 = vmatmul.f32.gmra.mxu2 %v1130_v17  ;;  %1423 = vmatmul.f32.gmra.mxu3 %v1131_v36  ;;  %v1567_v38 = vadd.f32 %v4181_v13, %v1454_v27  ;;  %v2192_v13 = vld [vmem:[#allocation10 + $0x68] sm:$0xff] }
 0x28c   :  { %1649 = vmatmul.f32.gmra.mxu1 %v1131_v36  ;;  %v4286_v36 = vpop.f32.mrf.mxu0 }
 0x28d   :  { %v1661_v50 = vmax.f32 %v1567_v38, 0.0  ;;  %2201 = vmatpush.msrb.mxu1 %v2192_v13 }
 0x28e   :  { %v1263_v9 = vpop.f32.mrf.mxu2 }
 0x28f   :  { %v1264_v19 = vadd.f32 %v1263_v9, %v4046_v59  ;;  %v1376_v32 = vpop.f32.mrf.mxu3  ;;  %2202 = vmatpush.msrb.mxu1 %v2191_v1 }
 0x291   :  { %v4255_v48 = vadd.f32 %v1376_v32, %v1264_v19  ;;  %1536 = vmatmul.f32.gmra.mxu0 %v1130_v17  ;;  %v1660_v17 = vmax.f32 %v4095_v22, 0.0  ;;  %v4290_v19 = vpop.f32.mrf.mxu1  ;;  %v1460_v32 = vadd.f32 %v4218_v3, %v4249_v28 }
 0x293   :  { %1313 = vmatmul.f32.gmra.mxu2 %v1132_v41  ;;  %1426 = vmatmul.f32.gmra.mxu3 %v1133_v12  ;;  %v1573_v42 = vadd.f32 %v4214_v52, %v1460_v32  ;;  %v1576_v52 = vadd.f32 %v4227_v18, %v1463_v4  ;;  %v2189_v4 = vld [vmem:[#allocation10 + $0x50] sm:$0xff] }
 0x294   :  { %1652 = vmatmul.f32.gmra.mxu1 %v1133_v12  ;;  %v4297_v12 = vpop.f32.mrf.mxu0 }
 0x295   :  { %v1665_v3 = vmax.f32 %v1573_v42, 0.0 }
 0x296   :  { %v1266_v63 = vpop.f32.mrf.mxu2 }
 0x297   :  { %v1267_v29 = vadd.f32 %v1266_v63, %v4046_v59  ;;  %v1379_v54 = vpop.f32.mrf.mxu3 }
 0x299   :  { %v4266_v53 = vadd.f32 %v1379_v54, %v1267_v29  ;;  %1539 = vmatmul.f32.gmra.mxu0 %v1132_v41  ;;  %v1664_v54 = vmax.f32 %v4124_v24, 0.0 }
 0x29b   :  { %1772 = vmatmul.f32.vlgmr.msrb.gmra.mxu2 %v1656_v25  ;;  %1885 = vmatmul.f32.vlgmr.msrb.gmra.mxu3 %v1657_v58  ;;  %v4306_v58 = vpop.f32.mrf.mxu1 }
 0x29c   :  { %v4309_v21 = vpop.f32.mrf.mxu0 }
 0x29e   :  { %v1269_v47 = vpop.f32.mrf.mxu2 }
 0x29f   :  { %v1270_v5 = vadd.f32 %v1269_v47, %v4046_v59  ;;  %v1382_v40 = vpop.f32.mrf.mxu3  ;;  %v1666_v47 = vmax.f32 %v4135_v8, 0.0  ;;  %v1668_v8 = vmax.f32 %v4155_v55, 0.0 }
 0x2a1   :  { %v4275_v6 = vadd.f32 %v1382_v40, %v1270_v5  ;;  %v1466_v5 = vadd.f32 %v4245_v10, %v4249_v28  ;;  %v1469_v10 = vadd.f32 %v4260_v15, %v4249_v28  ;;  %v1670_v15 = vmax.f32 %v4164_v31, 0.0 }
 0x2a2   :  { %v1672_v31 = vmax.f32 %v4179_v37, 0.0 }
 0x2a3   :  { %1775 = vmatmul.f32.gmra.mxu2 %v1658_v61  ;;  %1888 = vmatmul.f32.gmra.mxu3 %v1659_v43  ;;  %v1667_v61 = vmax.f32 %v1576_v52, 0.0  ;;  %v4317_v27 = vpop.f32.mrf.mxu1  ;;  %v1579_v18 = vadd.f32 %v4243_v46, %v1466_v5  ;;  %v1582_v46 = vadd.f32 %v4257_v26, %v1469_v10  ;;  %v1478_v52 = vadd.f32 %v4297_v12, %v4249_v28 }
 0x2a6   :  { %v1272_v51 = vpop.f32.mrf.mxu2 }
 0x2a7   :  { %v1273_v16 = vadd.f32 %v1272_v51, %v4046_v59  ;;  %v1385_v34 = vpop.f32.mrf.mxu3 }
 0x2a9   :  { %v4284_v56 = vadd.f32 %v1385_v34, %v1273_v16  ;;  %v4321_v16 = vpop.f32.mrf.mxu0 }
 0x2ab   :  { %1778 = vmatmul.f32.gmra.mxu2 %v1660_v17  ;;  %1891 = vmatmul.f32.gmra.mxu3 %v1661_v50  ;;  %v1669_v17 = vmax.f32 %v1579_v18, 0.0  ;;  %v2190_v50 = vld [vmem:[#allocation10 + $0x58] sm:$0xff]  ;;  %v4329_v23 = vpop.f32.mrf.mxu1 }
 0x2ac   :  { %2203 = vmatpush.msrb.mxu1 %v2190_v50 }
 0x2ae   :  { %v1275_v49 = vpop.f32.mrf.mxu2  ;;  %2204 = vmatpush.msrb.mxu1 %v2189_v4 }
 0x2af   :  { %v1276_v22 = vadd.f32 %v1275_v49, %v4046_v59  ;;  %v1388_v9 = vpop.f32.mrf.mxu3  ;;  %v1472_v49 = vadd.f32 %v4270_v14, %v4249_v28  ;;  %v1475_v14 = vadd.f32 %v4286_v36, %v4249_v28  ;;  %v1674_v36 = vmax.f32 %v4190_v20, 0.0 }
 0x2b0   :  { %v1481_v20 = vadd.f32 %v4309_v21, %v4249_v28  ;;  %v1678_v21 = vmax.f32 %v4223_v57, 0.0 }
 0x2b1   :  { %v4295_v41 = vadd.f32 %v1388_v9, %v1276_v22  ;;  %v1671_v9 = vmax.f32 %v1582_v46, 0.0  ;;  %v1585_v26 = vadd.f32 %v4278_v60, %v1472_v49  ;;  %v1588_v60 = vadd.f32 %v4290_v19, %v1475_v14 }
 0x2b2   :  { %v1484_v46 = vadd.f32 %v4321_v16, %v4249_v28 }
 0x2b3   :  { %1781 = vmatmul.f32.gmra.mxu2 %v1662_v0  ;;  %1894 = vmatmul.f32.gmra.mxu3 %v1663_v62  ;;  %v4337_v0 = vpop.f32.mrf.mxu0 }
 0x2b4   :  { %v1487_v57 = vadd.f32 %v4337_v0, %v4249_v28  ;;  %v1682_v0 = vmax.f32 %v4241_v30, 0.0 }
 0x2b6   :  { %v1278_v7 = vpop.f32.mrf.mxu2 }
 0x2b7   :  { %v1279_v63 = vadd.f32 %v1278_v7, %v4046_v59  ;;  %v1391_v29 = vpop.f32.mrf.mxu3  ;;  %v4341_v7 = vpop.f32.mrf.mxu1 }
 0x2b9   :  { %v4304_v25 = vadd.f32 %v1391_v29, %v1279_v63  ;;  %v1673_v29 = vmax.f32 %v1585_v26, 0.0  ;;  %v1680_v26 = vmax.f32 %v4232_v2, 0.0 }
 0x2bb   :  { %1784 = vmatmul.f32.gmra.mxu2 %v1664_v54  ;;  %1897 = vmatmul.f32.gmra.mxu3 %v1665_v3  ;;  %v2016_v54 = vld [vmem:[#allocation8 + $0x10] sm:$0xff]  ;;  %v4348_v3 = vpop.f32.mrf.mxu0 }
 0x2bc   :  { %2047 = vmatpush.msrb.mxu0 %v2016_v54  ;;  %2959 = vmatpush.msra.mxu2 %v2016_v54  ;;  %v1490_v4 = vadd.f32 %v4348_v3, %v4249_v28 }
 0x2be   :  { %v1281_v24 = vpop.f32.mrf.mxu2 }
 0x2bf   :  { %v1282_v44 = vadd.f32 %v1281_v24, %v4046_v59  ;;  %v1394_v33 = vpop.f32.mrf.mxu3 }
 0x2c1   :  { %v4315_v40 = vadd.f32 %v1394_v33, %v1282_v44  ;;  %v1675_v44 = vmax.f32 %v1588_v60, 0.0  ;;  %v1602_v33 = vpop.f32.mrf.mxu1 }
 0x2c3   :  { %1787 = vmatmul.f32.gmra.mxu2 %v1666_v47  ;;  %1900 = vmatmul.f32.gmra.mxu3 %v1667_v61  ;;  %v1591_v47 = vadd.f32 %v4306_v58, %v1478_v52  ;;  %v1492_v5 = vpop.f32.mrf.mxu0  ;;  %v1594_v58 = vadd.f32 %v4317_v27, %v1481_v20 }
 0x2c5   :  { %v1677_v12 = vmax.f32 %v1591_v47, 0.0  ;;  %v1493_v47 = vadd.f32 %v1492_v5, %v4249_v28 }
 0x2c6   :  { %v1284_v43 = vpop.f32.mrf.mxu2 }
 0x2c7   :  { %v1285_v38 = vadd.f32 %v1284_v43, %v4046_v59  ;;  %v1397_v51 = vpop.f32.mrf.mxu3  ;;  %v1676_v43 = vmax.f32 %v4209_v11, 0.0 }
 0x2c9   :  { %v4326_v34 = vadd.f32 %v1397_v51, %v1285_v38  ;;  %v2015_v51 = vld [vmem:[#allocation8 + $0x8] sm:$0xff]  ;;  %v1605_v10 = vpop.f32.mrf.mxu1 }
 0x2ca   :  { %2048 = vmatpush.msrb.mxu0 %v2015_v51  ;;  %2960 = vmatpush.msra.mxu2 %v2015_v51  ;;  %v1606_v3 = vadd.f32 %v1605_v10, %v1493_v47  ;;  %v1686_v51 = vmax.f32 %v4266_v53, 0.0 }
 0x2cb   :  { %1790 = vmatmul.f32.gmra.mxu2 %v1668_v8  ;;  %1903 = vmatmul.f32.gmra.mxu3 %v1669_v17  ;;  %v2188_v8 = vld [vmem:[#allocation10 + $0x48] sm:$0xff]  ;;  %v1495_v50 = vpop.f32.mrf.mxu0 }
 0x2cc   :  { %2205 = vmatpush.msrb.mxu1 %v2188_v8  ;;  %v1687_v5 = vmax.f32 %v1606_v3, 0.0 }
 0x2ce   :  { %v1287_v13 = vpop.f32.mrf.mxu2 }
 0x2cf   :  { %v1288_v55 = vadd.f32 %v1287_v13, %v4046_v59  ;;  %v1400_v45 = vpop.f32.mrf.mxu3 }
 0x2d1   :  { %v4335_v22 = vadd.f32 %v1400_v45, %v1288_v55  ;;  %v1679_v55 = vmax.f32 %v1594_v58, 0.0  ;;  %v1597_v45 = vadd.f32 %v4329_v23, %v1484_v46  ;;  %v1600_v23 = vadd.f32 %v4341_v7, %v1487_v57 }
 0x2d2   :  { %v1688_v46 = vmax.f32 %v4275_v6, 0.0  ;;  %v1690_v57 = vmax.f32 %v4284_v56, 0.0 }
 0x2d3   :  { %1793 = vmatmul.f32.gmra.mxu2 %v1670_v15  ;;  %1906 = vmatmul.f32.gmra.mxu3 %v1671_v9  ;;  %v1608_v15 = vpop.f32.mrf.mxu1  ;;  %v1681_v16 = vmax.f32 %v1597_v45, 0.0 }
 0x2d6   :  { %v1290_v32 = vpop.f32.mrf.mxu2 }
 0x2d7   :  { %v1291_v62 = vadd.f32 %v1290_v32, %v4046_v59  ;;  %v1403_v42 = vpop.f32.mrf.mxu3 }
 0x2d9   :  { %v4346_v63 = vadd.f32 %v1403_v42, %v1291_v62  ;;  %v1498_v62 = vpop.f32.mrf.mxu0  ;;  %v2014_v42 = vld [vmem:[#allocation8] sm:$0xff] }
 0x2da   :  { %2049 = vmatpush.msrb.mxu0 %v2014_v42  ;;  %2961 = vmatpush.msra.mxu2 %v2014_v42 }
 0x2db   :  { %1796 = vmatmul.f32.gmra.mxu2 %v1672_v31  ;;  %1909 = vmatmul.f32.gmra.mxu3 %v1673_v29  ;;  %v2187_v31 = vld [vmem:[#allocation10 + $0x40] sm:$0xff]  ;;  %v1611_v54 = vpop.f32.mrf.mxu1 }
 0x2dc   :  { %2206 = vmatpush.msrb.mxu1 %v2187_v31 }
 0x2de   :  { %v1293_v35 = vpop.f32.mrf.mxu2 }
 0x2df   :  { %v1294_v37 = vadd.f32 %v1293_v35, %v4046_v59  ;;  %v1406_v1 = vpop.f32.mrf.mxu3  ;;  %v1683_v35 = vmax.f32 %v1600_v23, 0.0 }
 0x2e1   :  { %v4355_v24 = vadd.f32 %v1406_v1, %v1294_v37  ;;  %v1501_v37 = vpop.f32.mrf.mxu0  ;;  %v1603_v1 = vadd.f32 %v1602_v33, %v1490_v4 }
 0x2e2   :  { %v1502_v6 = vadd.f32 %v1501_v37, %v4249_v28 }
 0x2e3   :  { %1799 = vmatmul.f32.gmra.mxu2 %v1674_v36  ;;  %1912 = vmatmul.f32.gmra.mxu3 %v1675_v44  ;;  %v1684_v44 = vmax.f32 %v4255_v48, 0.0  ;;  %v1685_v30 = vmax.f32 %v1603_v1, 0.0  ;;  %v1496_v48 = vadd.f32 %v1495_v50, %v4249_v28  ;;  %v4400_v50 = vld [vmem:[#allocation7] ss:$0 sm:$0xff] }
 0x2e6   :  { %v1296_v19 = vpop.f32.mrf.mxu2 }
 0x2e7   :  { %v1297_v61 = vadd.f32 %v1296_v19, %v4046_v59  ;;  %v1409_v18 = vpop.f32.mrf.mxu3 }
 0x2e9   :  { %v4362_v38 = vadd.f32 %v1409_v18, %v1297_v61  ;;  %v1614_v61 = vpop.f32.mrf.mxu1  ;;  %v2186_v18 = vld [vmem:[#allocation10 + $0x38] sm:$0xff] }
 0x2ea   :  { %2207 = vmatpush.msrb.mxu1 %v2186_v18  ;;  %v1615_v23 = vadd.f32 %v1614_v61, %v1502_v6 }
 0x2eb   :  { %1802 = vmatmul.f32.gmra.mxu2 %v1676_v43  ;;  %1915 = vmatmul.f32.gmra.mxu3 %v1677_v12  ;;  %v1504_v43 = vpop.f32.mrf.mxu0 }
 0x2ec   :  { %v1505_v4 = vadd.f32 %v1504_v43, %v4249_v28 }
 0x2ee   :  { %v1299_v17 = vpop.f32.mrf.mxu2 }
 0x2ef   :  { %v1300_v39 = vadd.f32 %v1299_v17, %v4046_v59  ;;  %v1412_v11 = vpop.f32.mrf.mxu3  ;;  %v1609_v17 = vadd.f32 %v1608_v15, %v1496_v48 }
 0x2f1   :  { %v4369_v13 = vadd.f32 %v1412_v11, %v1300_v39  ;;  %v1617_v58 = vpop.f32.mrf.mxu1  ;;  %v1689_v53 = vmax.f32 %v1609_v17, 0.0 }
 0x2f3   :  { %1805 = vmatmul.f32.gmra.mxu2 %v1678_v21  ;;  %1918 = vmatmul.f32.gmra.mxu3 %v1679_v55  ;;  %v1507_v21 = vpop.f32.mrf.mxu0  ;;  %v1499_v55 = vadd.f32 %v1498_v62, %v4249_v28 }
 0x2f6   :  { %v1302_v27 = vpop.f32.mrf.mxu2 }
 0x2f7   :  { %v1303_v49 = vadd.f32 %v1302_v27, %v4046_v59  ;;  %v1415_v9 = vpop.f32.mrf.mxu3  ;;  %v1612_v27 = vadd.f32 %v1611_v54, %v1499_v55 }
 0x2f9   :  { %v4376_v32 = vadd.f32 %v1415_v9, %v1303_v49  ;;  %v2185_v49 = vld [vmem:[#allocation10 + $0x30] sm:$0xff]  ;;  %v1620_v9 = vpop.f32.mrf.mxu1  ;;  %v1691_v62 = vmax.f32 %v1612_v27, 0.0 }
 0x2fa   :  { %2208 = vmatpush.msrb.mxu1 %v2185_v49  ;;  %v1698_v49 = vmax.f32 %v4326_v34, 0.0 }
 0x2fb   :  { %1808 = vmatmul.f32.gmra.mxu2 %v1680_v26  ;;  %1921 = vmatmul.f32.gmra.mxu3 %v1681_v16  ;;  %v1510_v42 = vpop.f32.mrf.mxu0 }
 0x2fe   :  { %v1305_v14 = vpop.f32.mrf.mxu2 }
 0x2ff   :  { %v1306_v29 = vadd.f32 %v1305_v14, %v4046_v59  ;;  %v1418_v2 = vpop.f32.mrf.mxu3 }
 0x301   :  { %v4383_v60 = vadd.f32 %v1418_v2, %v1306_v29  ;;  %v1623_v54 = vpop.f32.mrf.mxu1 }
 0x303   :  { %1811 = vmatmul.f32.gmra.mxu2 %v1682_v0  ;;  %1924 = vmatmul.f32.gmra.mxu3 %v1683_v35  ;;  %v1692_v0 = vmax.f32 %v4295_v41, 0.0  ;;  %v1693_v35 = vmax.f32 %v1615_v23, 0.0  ;;  %v1513_v1 = vpop.f32.mrf.mxu0  ;;  %v1508_v41 = vadd.f32 %v1507_v21, %v4249_v28  ;;  %v2183_v21 = vld [vmem:[#allocation10 + $0x20] sm:$0xff] }
 0x306   :  { %v1308_v36 = vpop.f32.mrf.mxu2 }
 0x307   :  { %v1309_v7 = vadd.f32 %v1308_v36, %v4046_v59  ;;  %v1421_v52 = vpop.f32.mrf.mxu3  ;;  %v1618_v36 = vadd.f32 %v1617_v58, %v1505_v4  ;;  %v1511_v58 = vadd.f32 %v1510_v42, %v4249_v28  ;;  %v1700_v42 = vmax.f32 %v4335_v22, 0.0 }
 0x309   :  { %v4388_v19 = vadd.f32 %v1421_v52, %v1309_v7  ;;  %v2184_v7 = vld [vmem:[#allocation10 + $0x28] sm:$0xff]  ;;  %v1695_v3 = vmax.f32 %v1618_v36, 0.0  ;;  %v1626_v18 = vpop.f32.mrf.mxu1 }
 0x30a   :  { %2209 = vmatpush.msrb.mxu1 %v2184_v7 }
 0x30b   :  { %1814 = vmatmul.f32.gmra.mxu2 %v1684_v44  ;;  %1927 = vmatmul.f32.gmra.mxu3 %v1685_v30  ;;  %v1694_v30 = vmax.f32 %v4304_v25, 0.0 }
 0x30c   :  { %2210 = vmatpush.msrb.mxu1 %v2183_v21 }
 0x30e   :  { %v1311_v20 = vpop.f32.mrf.mxu2 }
 0x30f   :  { %v1312_v33 = vadd.f32 %v1311_v20, %v4046_v59  ;;  %v1424_v12 = vpop.f32.mrf.mxu3  ;;  %v1621_v20 = vadd.f32 %v1620_v9, %v1508_v41 }
 0x311   :  { %v4393_v8 = vadd.f32 %v1424_v12, %v1312_v33  ;;  %v1516_v33 = vpop.f32.mrf.mxu0  ;;  %v1697_v17 = vmax.f32 %v1621_v20, 0.0 }
 0x313   :  { %1817 = vmatmul.f32.gmra.mxu2 %v1686_v51  ;;  %1930 = vmatmul.f32.gmra.mxu3 %v1687_v5  ;;  %v1696_v5 = vmax.f32 %v4315_v40, 0.0  ;;  %v1514_v40 = vadd.f32 %v1513_v1, %v4249_v28 }
 0x316   :  { %v1314_v39 = vpop.f32.mrf.mxu2 }
 0x317   :  { %v1315_v10 = vadd.f32 %v1314_v39, %v4046_v59  ;;  %v1427_v11 = vpop.f32.mrf.mxu3 }
 0x319   :  { %v4398_v45 = vadd.f32 %v1427_v11, %v1315_v10  ;;  %v1629_v10 = vpop.f32.mrf.mxu1  ;;  %v1624_v11 = vadd.f32 %v1623_v54, %v1511_v58  ;;  %v1519_v27 = vpop.f32.mrf.mxu0  ;;  %v2182_v54 = vld [vmem:[#allocation10 + $0x18] sm:$0xff] }
 0x31a   :  { %2211 = vmatpush.msrb.mxu1 %v2182_v54  ;;  %v1520_v22 = vadd.f32 %v1519_v27, %v4249_v28 }
 0x31b   :  { %1820 = vmatmul.f32.gmra.mxu2 %v1688_v46  ;;  %1933 = vmatmul.f32.gmra.mxu3 %v1689_v53 }
 0x31e   :  { %v1773_v15 = vpop.f32.mrf.mxu2 }
 0x31f   :  { %v1774_v59 = vadd.f32 %v4400_v50, %v1773_v15  ;;  %v1886_v26 = vpop.f32.mrf.mxu3  ;;  %v1699_v15 = vmax.f32 %v1624_v11, 0.0 }
 0x321   :  { %v1887_v16 = vadd.f32 %v1886_v26, %v1774_v59  ;;  %v1627_v26 = vadd.f32 %v1626_v18, %v1514_v40 }
 0x323   :  { %v1982_v31 = vmax.f32 %v1887_v16, 0.0  ;;  %1823 = vmatmul.f32.gmra.mxu2 %v1690_v57  ;;  %1936 = vmatmul.f32.gmra.mxu3 %v1691_v62  ;;  %v1632_v57 = vpop.f32.mrf.mxu1  ;;  %v1701_v34 = vmax.f32 %v1627_v26, 0.0  ;;  %v2180_v26 = vld [vmem:[#allocation10 + $0x8] sm:$0xff] }
 0x325   :  { %2050 = vmatmul.f32.vlgmr.msrb.gmra.mxu0 %v1982_v31  ;;  %v1517_v31 = vadd.f32 %v1516_v33, %v4249_v28 }
 0x326   :  { %v1776_v14 = vpop.f32.mrf.mxu2 }
 0x327   :  { %v1777_v29 = vadd.f32 %v4400_v50, %v1776_v14  ;;  %v1889_v2 = vpop.f32.mrf.mxu3  ;;  %v1522_v14 = vpop.f32.mrf.mxu0 }
 0x329   :  { %v1890_v56 = vadd.f32 %v1889_v2, %v1777_v29  ;;  %v1630_v2 = vadd.f32 %v1629_v10, %v1517_v31 }
 0x32b   :  { %v1983_v37 = vmax.f32 %v1890_v56, 0.0  ;;  %1826 = vmatmul.f32.gmra.mxu2 %v1692_v0  ;;  %1939 = vmatmul.f32.gmra.mxu3 %v1693_v35  ;;  %v1635_v35 = vpop.f32.mrf.mxu1  ;;  %v1703_v36 = vmax.f32 %v1630_v2, 0.0 }
 0x32d   :  { %2053 = vmatmul.f32.gmra.mxu0 %v1983_v37  ;;  %v1702_v37 = vmax.f32 %v4346_v63, 0.0 }
 0x32e   :  { %v1779_v52 = vpop.f32.mrf.mxu2 }
 0x32f   :  { %v1780_v44 = vadd.f32 %v4400_v50, %v1779_v52  ;;  %v1892_v47 = vpop.f32.mrf.mxu3  ;;  %v1525_v52 = vpop.f32.mrf.mxu0 }
 0x331   :  { %v1893_v61 = vadd.f32 %v1892_v47, %v1780_v44  ;;  %v1633_v44 = vadd.f32 %v1632_v57, %v1520_v22 }
 0x333   :  { %v1984_v43 = vmax.f32 %v1893_v61, 0.0  ;;  %1829 = vmatmul.f32.gmra.mxu2 %v1694_v30  ;;  %1942 = vmatmul.f32.gmra.mxu3 %v1695_v3  ;;  %v1704_v61 = vmax.f32 %v4355_v24, 0.0  ;;  %v1523_v3 = vadd.f32 %v1522_v14, %v4249_v28  ;;  %v1705_v63 = vmax.f32 %v1633_v44, 0.0 }
 0x334   :  { %v1526_v24 = vadd.f32 %v1525_v52, %v4249_v28 }
 0x335   :  { %2056 = vmatmul.f32.gmra.mxu0 %v1984_v43  ;;  %v1638_v43 = vpop.f32.mrf.mxu1  ;;  %v1636_v33 = vadd.f32 %v1635_v35, %v1523_v3 }
 0x336   :  { %v1782_v12 = vpop.f32.mrf.mxu2  ;;  %v1639_v21 = vadd.f32 %v1638_v43, %v1526_v24 }
 0x337   :  { %v1783_v51 = vadd.f32 %v4400_v50, %v1782_v12  ;;  %v1895_v48 = vpop.f32.mrf.mxu3  ;;  %v2181_v12 = vld [vmem:[#allocation10 + $0x10] sm:$0xff] }
 0x338   :  { %2212 = vmatpush.msrb.mxu1 %v2181_v12 }
 0x339   :  { %v1896_v25 = vadd.f32 %v1895_v48, %v1783_v51  ;;  %v1528_v51 = vpop.f32.mrf.mxu0 }
 0x33a   :  { %v1529_v40 = vadd.f32 %v1528_v51, %v4249_v28  ;;  %2213 = vmatpush.msrb.mxu1 %v2180_v26  ;;  %v1716_v51 = vmax.f32 %v4393_v8, 0.0 }
 0x33b   :  { %v1985_v39 = vmax.f32 %v1896_v25, 0.0  ;;  %1832 = vmatmul.f32.gmra.mxu2 %v1696_v5  ;;  %1945 = vmatmul.f32.gmra.mxu3 %v1697_v17  ;;  %v1706_v25 = vmax.f32 %v4362_v38, 0.0 }
 0x33d   :  { %2059 = vmatmul.f32.gmra.mxu0 %v1985_v39  ;;  %v1707_v39 = vmax.f32 %v1636_v33, 0.0  ;;  %v1641_v11 = vpop.f32.mrf.mxu1 }
 0x33e   :  { %v1785_v46 = vpop.f32.mrf.mxu2 }
 0x33f   :  { %v1786_v55 = vadd.f32 %v4400_v50, %v1785_v46  ;;  %v1898_v53 = vpop.f32.mrf.mxu3 }
 0x341   :  { %v1899_v9 = vadd.f32 %v1898_v53, %v1786_v55  ;;  %v1531_v27 = vpop.f32.mrf.mxu0 }
 0x343   :  { %v1986_v59 = vmax.f32 %v1899_v9, 0.0  ;;  %1835 = vmatmul.f32.gmra.mxu2 %v1698_v49  ;;  %1948 = vmatmul.f32.gmra.mxu3 %v1699_v15  ;;  %v1708_v49 = vmax.f32 %v4369_v13, 0.0  ;;  %v1709_v9 = vmax.f32 %v1639_v21, 0.0  ;;  %v1532_v13 = vadd.f32 %v1531_v27, %v4249_v28 }
 0x345   :  { %2062 = vmatmul.f32.gmra.mxu0 %v1986_v59  ;;  %v1642_v59 = vadd.f32 %v1641_v11, %v1529_v40  ;;  %v1644_v57 = vpop.f32.mrf.mxu1  ;;  %v1718_v11 = vmax.f32 %v4398_v45, 0.0  ;;  %v4451_v45 = vld [vmem:[%s4772_s10] ss:$0 sm:$0xff] }
 0x346   :  { %v1788_v6 = vpop.f32.mrf.mxu2 }
 0x347   :  { %v1789_v16 = vadd.f32 %v4400_v50, %v1788_v6  ;;  %v1901_v62 = vpop.f32.mrf.mxu3 }
 0x349   :  { %v1902_v23 = vadd.f32 %v1901_v62, %v1789_v16 }
 0x34b   :  { %v1987_v29 = vmax.f32 %v1902_v23, 0.0  ;;  %1838 = vmatmul.f32.gmra.mxu2 %v1700_v42  ;;  %1951 = vmatmul.f32.gmra.mxu3 %v1701_v34  ;;  %v1710_v42 = vmax.f32 %v4376_v32, 0.0  ;;  %v1711_v23 = vmax.f32 %v1642_v59, 0.0  ;;  %v1534_v34 = vpop.f32.mrf.mxu0 }
 0x34c   :  { %v1535_v35 = vadd.f32 %v1534_v34, %v4249_v28 }
 0x34d   :  { %2065 = vmatmul.f32.gmra.mxu0 %v1987_v29  ;;  %v1645_v29 = vadd.f32 %v1644_v57, %v1532_v13 }
 0x34e   :  { %v1791_v0 = vpop.f32.mrf.mxu2 }
 0x34f   :  { %v1792_v4 = vadd.f32 %v4400_v50, %v1791_v0  ;;  %v1904_v56 = vpop.f32.mrf.mxu3 }
 0x351   :  { %v1905_v1 = vadd.f32 %v1904_v56, %v1792_v4  ;;  %v1647_v4 = vpop.f32.mrf.mxu1  ;;  %v1712_v56 = vmax.f32 %v4383_v60, 0.0 }
 0x353   :  { %v1988_v7 = vmax.f32 %v1905_v1, 0.0  ;;  %1841 = vmatmul.f32.gmra.mxu2 %v1702_v37  ;;  %1954 = vmatmul.f32.gmra.mxu3 %v1703_v36  ;;  %v1713_v37 = vmax.f32 %v1645_v29, 0.0  ;;  %v1537_v1 = vpop.f32.mrf.mxu0  ;;  %v1648_v36 = vadd.f32 %v1647_v4, %v1535_v35 }
 0x354   :  { %v1538_v60 = vadd.f32 %v1537_v1, %v4249_v28 }
 0x355   :  { %2068 = vmatmul.f32.gmra.mxu0 %v1988_v7  ;;  %v2179_v7 = vld [vmem:[#allocation10] sm:$0xff] }
 0x356   :  { %v1794_v47 = vpop.f32.mrf.mxu2  ;;  %2214 = vmatpush.msrb.mxu1 %v2179_v7 }
 0x357   :  { %v1795_v30 = vadd.f32 %v4400_v50, %v1794_v47  ;;  %v1907_v41 = vpop.f32.mrf.mxu3 }
 0x359   :  { %v1908_v18 = vadd.f32 %v1907_v41, %v1795_v30  ;;  %v1714_v30 = vmax.f32 %v4388_v19, 0.0  ;;  %v1650_v3 = vpop.f32.mrf.mxu1 }
 0x35b   :  { %v1989_v20 = vmax.f32 %v1908_v18, 0.0  ;;  %1844 = vmatmul.f32.gmra.mxu2 %v1704_v61  ;;  %1957 = vmatmul.f32.gmra.mxu3 %v1705_v63  ;;  %v1715_v61 = vmax.f32 %v1648_v36, 0.0  ;;  %v1651_v63 = vadd.f32 %v1650_v3, %v1538_v60  ;;  %v1540_v43 = vpop.f32.mrf.mxu0 }
 0x35d   :  { %2071 = vmatmul.f32.gmra.mxu0 %v1989_v20 }
 0x35e   :  { %v1797_v48 = vpop.f32.mrf.mxu2 }
 0x35f   :  { %v1798_v5 = vadd.f32 %v4400_v50, %v1797_v48  ;;  %v1910_v58 = vpop.f32.mrf.mxu3  ;;  %v1541_v48 = vadd.f32 %v1540_v43, %v4249_v28 }
 0x361   :  { %v1911_v17 = vadd.f32 %v1910_v58, %v1798_v5  ;;  %v1717_v5 = vmax.f32 %v1651_v63, 0.0 }
 0x363   :  { %v1990_v10 = vmax.f32 %v1911_v17, 0.0  ;;  %1847 = vmatmul.f32.gmra.mxu2 %v1706_v25  ;;  %1960 = vmatmul.f32.gmra.mxu3 %v1707_v39  ;;  %v1653_v25 = vpop.f32.mrf.mxu1 }
 0x364   :  { %v1654_v24 = vadd.f32 %v1653_v25, %v1541_v48 }
 0x365   :  { %2074 = vmatmul.f32.gmra.mxu0 %v1990_v10 }
 0x366   :  { %v1800_v46 = vpop.f32.mrf.mxu2 }
 0x367   :  { %v1801_v55 = vadd.f32 %v4400_v50, %v1800_v46  ;;  %v1913_v53 = vpop.f32.mrf.mxu3  ;;  %v1719_v46 = vmax.f32 %v1654_v24, 0.0 }
 0x369   :  { %v1914_v38 = vadd.f32 %v1913_v53, %v1801_v55 }
 0x36b   :  { %v1991_v15 = vmax.f32 %v1914_v38, 0.0  ;;  %1850 = vmatmul.f32.gmra.mxu2 %v1708_v49  ;;  %1963 = vmatmul.f32.gmra.mxu3 %v1709_v9 }
 0x36d   :  { %2077 = vmatmul.f32.gmra.mxu0 %v1991_v15 }
 0x36e   :  { %v1803_v6 = vpop.f32.mrf.mxu2 }
 0x36f   :  { %v1804_v16 = vadd.f32 %v4400_v50, %v1803_v6  ;;  %v1916_v62 = vpop.f32.mrf.mxu3 }
 0x371   :  { %v1917_v31 = vadd.f32 %v1916_v62, %v1804_v16 }
 0x373   :  { %v1992_v14 = vmax.f32 %v1917_v31, 0.0  ;;  %1853 = vmatmul.f32.gmra.mxu2 %v1710_v42  ;;  %1966 = vmatmul.f32.gmra.mxu3 %v1711_v23 }
 0x375   :  { %2080 = vmatmul.f32.gmra.mxu0 %v1992_v14 }
 0x376   :  { %v1806_v2 = vpop.f32.mrf.mxu2 }
 0x377   :  { %v1807_v54 = vadd.f32 %v4400_v50, %v1806_v2  ;;  %v1919_v0 = vpop.f32.mrf.mxu3 }
 0x379   :  { %v1920_v32 = vadd.f32 %v1919_v0, %v1807_v54 }
 0x37b   :  { %v1993_v22 = vmax.f32 %v1920_v32, 0.0  ;;  %1856 = vmatmul.f32.gmra.mxu2 %v1712_v56  ;;  %1969 = vmatmul.f32.gmra.mxu3 %v1713_v37 }
 0x37d   :  { %2083 = vmatmul.f32.gmra.mxu0 %v1993_v22 }
 0x37e   :  { %v1809_v52 = vpop.f32.mrf.mxu2 }
 0x37f   :  { %v1810_v44 = vadd.f32 %v4400_v50, %v1809_v52  ;;  %v1922_v47 = vpop.f32.mrf.mxu3 }
 0x381   :  { %v1923_v41 = vadd.f32 %v1922_v47, %v1810_v44 }
 0x383   :  { %v1994_v18 = vmax.f32 %v1923_v41, 0.0  ;;  %1859 = vmatmul.f32.gmra.mxu2 %v1714_v30  ;;  %1972 = vmatmul.f32.gmra.mxu3 %v1715_v61 }
 0x385   :  { %2086 = vmatmul.f32.gmra.mxu0 %v1994_v18 }
 0x386   :  { %v1812_v20 = vpop.f32.mrf.mxu2 }
 0x387   :  { %v1813_v33 = vadd.f32 %v4400_v50, %v1812_v20  ;;  %v1925_v12 = vpop.f32.mrf.mxu3 }
 0x389   :  { %v1926_v19 = vadd.f32 %v1925_v12, %v1813_v33 }
 0x38b   :  { %v1995_v58 = vmax.f32 %v1926_v19, 0.0  ;;  %1862 = vmatmul.f32.gmra.mxu2 %v1716_v51  ;;  %1975 = vmatmul.f32.gmra.mxu3 %v1717_v5 }
 0x38d   :  { %2089 = vmatmul.f32.gmra.mxu0 %v1995_v58 }
 0x38e   :  { %v1815_v17 = vpop.f32.mrf.mxu2 }
 0x38f   :  { %v1816_v39 = vadd.f32 %v4400_v50, %v1815_v17  ;;  %v1928_v10 = vpop.f32.mrf.mxu3 }
 0x391   :  { %v1929_v21 = vadd.f32 %v1928_v10, %v1816_v39 }
 0x393   :  { %v1996_v55 = vmax.f32 %v1929_v21, 0.0  ;;  %1865 = vmatmul.f32.gmra.mxu2 %v1718_v11  ;;  %1978 = vmatmul.f32.gmra.mxu3 %v1719_v46 }
 0x395   :  { %2092 = vmatmul.f32.gmra.mxu0 %v1996_v55 }
 0x396   :  { %v1818_v28 = vpop.f32.mrf.mxu2 }
 0x397   :  { %v1819_v8 = vadd.f32 %v4400_v50, %v1818_v28  ;;  %v1931_v53 = vpop.f32.mrf.mxu3 }
 0x399   :  { %v1932_v27 = vadd.f32 %v1931_v53, %v1819_v8 }
 0x39b   :  { %v1997_v49 = vmax.f32 %v1932_v27, 0.0 }
 0x39d   :  { %2095 = vmatmul.f32.gmra.mxu0 %v1997_v49 }
 0x39e   :  { %v1821_v40 = vpop.f32.mrf.mxu2 }
 0x39f   :  { %v1822_v38 = vadd.f32 %v4400_v50, %v1821_v40  ;;  %v1934_v9 = vpop.f32.mrf.mxu3 }
 0x3a1   :  { %v1935_v15 = vadd.f32 %v1934_v9, %v1822_v38 }
 0x3a2   :  { %v2051_v59 = vpop.f32.mrf.mxu0 }
 0x3a3   :  { %v1998_v26 = vmax.f32 %v1935_v15, 0.0  ;;  %v2052_v57 = vadd.f32 %v4451_v45, %v2051_v59 }
 0x3a5   :  { %v2147_v6 = vmax.f32 %v2052_v57, 0.0  ;;  %2098 = vmatmul.f32.gmra.mxu0 %v1998_v26 }
 0x3a6   :  { %v1824_v16 = vpop.f32.mrf.mxu2 }
 0x3a7   :  { %v1825_v62 = vadd.f32 %v4400_v50, %v1824_v16  ;;  %v1937_v42 = vpop.f32.mrf.mxu3  ;;  %2215 = vmatmul.f32.vlgmr.msrb.gmra.mxu1 %v2147_v6 }
 0x3a9   :  { %v1938_v13 = vadd.f32 %v1937_v42, %v1825_v62 }
 0x3aa   :  { %v2054_v31 = vpop.f32.mrf.mxu0 }
 0x3ab   :  { %v1999_v23 = vmax.f32 %v1938_v13, 0.0  ;;  %v2055_v34 = vadd.f32 %v4451_v45, %v2054_v31 }
 0x3ad   :  { %v2148_v14 = vmax.f32 %v2055_v34, 0.0  ;;  %2101 = vmatmul.f32.gmra.mxu0 %v1999_v23 }
 0x3ae   :  { %v1827_v29 = vpop.f32.mrf.mxu2 }
 0x3af   :  { %v1828_v2 = vadd.f32 %v4400_v50, %v1827_v29  ;;  %v1940_v54 = vpop.f32.mrf.mxu3  ;;  %2218 = vmatmul.f32.gmra.mxu1 %v2148_v14 }
 0x3b1   :  { %v1941_v0 = vadd.f32 %v1940_v54, %v1828_v2 }
 0x3b2   :  { %v2057_v4 = vpop.f32.mrf.mxu0 }
 0x3b3   :  { %v2000_v56 = vmax.f32 %v1941_v0, 0.0  ;;  %v2058_v35 = vadd.f32 %v4451_v45, %v2057_v4 }
 0x3b5   :  { %v2149_v32 = vmax.f32 %v2058_v35, 0.0  ;;  %2104 = vmatmul.f32.gmra.mxu0 %v2000_v56 }
 0x3b6   :  { %v1830_v37 = vpop.f32.mrf.mxu2 }
 0x3b7   :  { %v1831_v22 = vadd.f32 %v4400_v50, %v1830_v37  ;;  %v1943_v1 = vpop.f32.mrf.mxu3  ;;  %2221 = vmatmul.f32.gmra.mxu1 %v2149_v32 }
 0x3b9   :  { %v1944_v36 = vadd.f32 %v1943_v1, %v1831_v22 }
 0x3ba   :  { %v2060_v7 = vpop.f32.mrf.mxu0 }
 0x3bb   :  { %v2001_v52 = vmax.f32 %v1944_v36, 0.0  ;;  %v2061_v44 = vadd.f32 %v4451_v45, %v2060_v7 }
 0x3bd   :  { %v2150_v47 = vmax.f32 %v2061_v44, 0.0  ;;  %2107 = vmatmul.f32.gmra.mxu0 %v2001_v52 }
 0x3be   :  { %v1833_v30 = vpop.f32.mrf.mxu2 }
 0x3bf   :  { %v1834_v60 = vadd.f32 %v4400_v50, %v1833_v30  ;;  %v1946_v41 = vpop.f32.mrf.mxu3  ;;  %2224 = vmatmul.f32.gmra.mxu1 %v2150_v47 }
 0x3c1   :  { %v1947_v61 = vadd.f32 %v1946_v41, %v1834_v60 }
 0x3c2   :  { %v2063_v3 = vpop.f32.mrf.mxu0 }
 0x3c3   :  { %v2002_v18 = vmax.f32 %v1947_v61, 0.0  ;;  %v2064_v63 = vadd.f32 %v4451_v45, %v2063_v3 }
 0x3c5   :  { %v2151_v43 = vmax.f32 %v2064_v63, 0.0  ;;  %2110 = vmatmul.f32.gmra.mxu0 %v2002_v18 }
 0x3c6   :  { %v1836_v20 = vpop.f32.mrf.mxu2 }
 0x3c7   :  { %v1837_v33 = vadd.f32 %v4400_v50, %v1836_v20  ;;  %v1949_v12 = vpop.f32.mrf.mxu3  ;;  %2227 = vmatmul.f32.gmra.mxu1 %v2151_v43 }
 0x3c9   :  { %v1950_v51 = vadd.f32 %v1949_v12, %v1837_v33 }
 0x3ca   :  { %v2066_v48 = vpop.f32.mrf.mxu0 }
 0x3cb   :  { %v2003_v19 = vmax.f32 %v1950_v51, 0.0  ;;  %v2067_v5 = vadd.f32 %v4451_v45, %v2066_v48 }
 0x3cd   :  { %v2152_v58 = vmax.f32 %v2067_v5, 0.0  ;;  %2113 = vmatmul.f32.gmra.mxu0 %v2003_v19 }
 0x3ce   :  { %v1839_v25 = vpop.f32.mrf.mxu2 }
 0x3cf   :  { %v1840_v24 = vadd.f32 %v4400_v50, %v1839_v25  ;;  %v1952_v17 = vpop.f32.mrf.mxu3  ;;  %2230 = vmatmul.f32.gmra.mxu1 %v2152_v58 }
 0x3d1   :  { %v1953_v39 = vadd.f32 %v1952_v17, %v1840_v24 }
 0x3d2   :  { %v2069_v10 = vpop.f32.mrf.mxu0 }
 0x3d3   :  { %v2004_v11 = vmax.f32 %v1953_v39, 0.0  ;;  %v2070_v21 = vadd.f32 %v4451_v45, %v2069_v10 }
 0x3d5   :  { %v2153_v46 = vmax.f32 %v2070_v21, 0.0  ;;  %2116 = vmatmul.f32.gmra.mxu0 %v2004_v11 }
 0x3d6   :  { %v1842_v55 = vpop.f32.mrf.mxu2 }
 0x3d7   :  { %v1843_v28 = vadd.f32 %v4400_v50, %v1842_v55  ;;  %v1955_v8 = vpop.f32.mrf.mxu3  ;;  %2233 = vmatmul.f32.gmra.mxu1 %v2153_v46 }
 0x3d9   :  { %v1956_v53 = vadd.f32 %v1955_v8, %v1843_v28 }
 0x3da   :  { %v2072_v27 = vpop.f32.mrf.mxu0 }
 0x3db   :  { %v2005_v49 = vmax.f32 %v1956_v53, 0.0  ;;  %v2073_v40 = vadd.f32 %v4451_v45, %v2072_v27 }
 0x3dd   :  { %v2154_v38 = vmax.f32 %v2073_v40, 0.0  ;;  %2119 = vmatmul.f32.gmra.mxu0 %v2005_v49 }
 0x3de   :  { %v1845_v9 = vpop.f32.mrf.mxu2 }
 0x3df   :  { %v1846_v15 = vadd.f32 %v4400_v50, %v1845_v9  ;;  %v1958_v59 = vpop.f32.mrf.mxu3  ;;  %2236 = vmatmul.f32.gmra.mxu1 %v2154_v38 }
 0x3e1   :  { %v1959_v26 = vadd.f32 %v1958_v59, %v1846_v15  ;;  %v4487_v59 = vld [vmem:[%s4774_s12] ss:$0 sm:$0xff] }
 0x3e2   :  { %v2075_v57 = vpop.f32.mrf.mxu0 }
 0x3e3   :  { %v2006_v6 = vmax.f32 %v1959_v26, 0.0  ;;  %v2076_v16 = vadd.f32 %v4451_v45, %v2075_v57 }
 0x3e5   :  { %v2155_v62 = vmax.f32 %v2076_v16, 0.0  ;;  %2122 = vmatmul.f32.gmra.mxu0 %v2006_v6 }
 0x3e6   :  { %v1848_v42 = vpop.f32.mrf.mxu2 }
 0x3e7   :  { %v1849_v13 = vadd.f32 %v4400_v50, %v1848_v42  ;;  %v1961_v31 = vpop.f32.mrf.mxu3  ;;  %2239 = vmatmul.f32.gmra.mxu1 %v2155_v62 }
 0x3e9   :  { %v1962_v23 = vadd.f32 %v1961_v31, %v1849_v13 }
 0x3ea   :  { %v2078_v34 = vpop.f32.mrf.mxu0 }
 0x3eb   :  { %v2007_v14 = vmax.f32 %v1962_v23, 0.0  ;;  %v2079_v29 = vadd.f32 %v4451_v45, %v2078_v34 }
 0x3ed   :  { %v2156_v2 = vmax.f32 %v2079_v29, 0.0  ;;  %2125 = vmatmul.f32.gmra.mxu0 %v2007_v14 }
 0x3ee   :  { %v1851_v54 = vpop.f32.mrf.mxu2 }
 0x3ef   :  { %v1852_v0 = vadd.f32 %v4400_v50, %v1851_v54  ;;  %v1964_v4 = vpop.f32.mrf.mxu3  ;;  %2242 = vmatmul.f32.gmra.mxu1 %v2156_v2 }
 0x3f1   :  { %v1965_v56 = vadd.f32 %v1964_v4, %v1852_v0 }
 0x3f2   :  { %v2081_v35 = vpop.f32.mrf.mxu0 }
 0x3f3   :  { %v2008_v32 = vmax.f32 %v1965_v56, 0.0  ;;  %v2082_v37 = vadd.f32 %v4451_v45, %v2081_v35 }
 0x3f5   :  { %v2157_v22 = vmax.f32 %v2082_v37, 0.0  ;;  %2128 = vmatmul.f32.gmra.mxu0 %v2008_v32 }
 0x3f6   :  { %v1854_v1 = vpop.f32.mrf.mxu2 }
 0x3f7   :  { %v1855_v36 = vadd.f32 %v4400_v50, %v1854_v1  ;;  %v1967_v7 = vpop.f32.mrf.mxu3  ;;  %2245 = vmatmul.f32.gmra.mxu1 %v2157_v22 }
 0x3f9   :  { %v1968_v52 = vadd.f32 %v1967_v7, %v1855_v36  ;;  %v2312_v7 = vlaneseq }
 0x3fa   :  { %v2084_v44 = vpop.f32.mrf.mxu0 }
 0x3fb   :  { %v2009_v47 = vmax.f32 %v1968_v52, 0.0  ;;  %v2085_v30 = vadd.f32 %v4451_v45, %v2084_v44 }
 0x3fd   :  { %v2158_v60 = vmax.f32 %v2085_v30, 0.0  ;;  %2131 = vmatmul.f32.gmra.mxu0 %v2009_v47 }
 0x3fe   :  { %v1857_v41 = vpop.f32.mrf.mxu2 }
 0x3ff   :  { %v1858_v61 = vadd.f32 %v4400_v50, %v1857_v41  ;;  %v1970_v3 = vpop.f32.mrf.mxu3  ;;  %2248 = vmatmul.f32.gmra.mxu1 %v2158_v60 }
 0x401   :  { %v1971_v18 = vadd.f32 %v1970_v3, %v1858_v61  ;;  %v4501_v61 = vand.u32 127, %v2312_v7 }
 0x402   :  { %v2087_v63 = vpop.f32.mrf.mxu0 }
 0x403   :  { %v2010_v43 = vmax.f32 %v1971_v18, 0.0  ;;  %v2088_v20 = vadd.f32 %v4451_v45, %v2087_v63  ;;  %vm2314_vm2 = vcmp.ge.s32.totalorder %v4501_v61, 16 }
 0x405   :  { %v2159_v33 = vmax.f32 %v2088_v20, 0.0  ;;  %2134 = vmatmul.f32.gmra.mxu0 %v2010_v43 }
 0x406   :  { %v1860_v12 = vpop.f32.mrf.mxu2 }
 0x407   :  { %v1861_v51 = vadd.f32 %v4400_v50, %v1860_v12  ;;  %v1973_v48 = vpop.f32.mrf.mxu3  ;;  %2251 = vmatmul.f32.gmra.mxu1 %v2159_v33 }
 0x409   :  { %v1974_v19 = vadd.f32 %v1973_v48, %v1861_v51 }
 0x40a   :  { %v2090_v5 = vpop.f32.mrf.mxu0 }
 0x40b   :  { %v2011_v58 = vmax.f32 %v1974_v19, 0.0  ;;  %v2091_v25 = vadd.f32 %v4451_v45, %v2090_v5 }
 0x40d   :  { %v2160_v24 = vmax.f32 %v2091_v25, 0.0  ;;  %2137 = vmatmul.f32.gmra.mxu0 %v2011_v58 }
 0x40e   :  { %v1863_v17 = vpop.f32.mrf.mxu2 }
 0x40f   :  { %v1864_v39 = vadd.f32 %v4400_v50, %v1863_v17  ;;  %v1976_v10 = vpop.f32.mrf.mxu3  ;;  %2254 = vmatmul.f32.gmra.mxu1 %v2160_v24 }
 0x411   :  { %v1977_v11 = vadd.f32 %v1976_v10, %v1864_v39 }
 0x412   :  { %v2093_v21 = vpop.f32.mrf.mxu0 }
 0x413   :  { %v2012_v46 = vmax.f32 %v1977_v11, 0.0  ;;  %v2094_v55 = vadd.f32 %v4451_v45, %v2093_v21 }
 0x415   :  { %v2161_v28 = vmax.f32 %v2094_v55, 0.0  ;;  %2140 = vmatmul.f32.gmra.mxu0 %v2012_v46 }
 0x416   :  { %v1866_v8 = vpop.f32.mrf.mxu2 }
 0x417   :  { %v1867_v53 = vadd.f32 %v4400_v50, %v1866_v8  ;;  %2257 = vmatmul.f32.gmra.mxu1 %v2161_v28  ;;  %v1979_v27 = vpop.f32.mrf.mxu3 }
 0x419   :  { %v1980_v49 = vadd.f32 %v1979_v27, %v1867_v53 }
 0x41a   :  { %v2096_v40 = vpop.f32.mrf.mxu0 }
 0x41b   :  { %v2013_v38 = vmax.f32 %v1980_v49, 0.0  ;;  %v2097_v9 = vadd.f32 %v4451_v45, %v2096_v40 }
 0x41d   :  { %v2162_v15 = vmax.f32 %v2097_v9, 0.0  ;;  %2143 = vmatmul.f32.vlgmr.msra.gmra.mxu2 %v2013_v38 }
 0x41f   :  { %2260 = vmatmul.f32.gmra.mxu1 %v2162_v15 }
 0x422   :  { %v2099_v26 = vpop.f32.mrf.mxu0 }
 0x423   :  { %v2100_v57 = vadd.f32 %v4451_v45, %v2099_v26 }
 0x424   :  { %v2216_v6 = vpop.f32.mrf.mxu1 }
 0x425   :  { %v2163_v50 = vmax.f32 %v2100_v57, 0.0  ;;  %v2217_v16 = vadd.f32 %v4487_v59, %v2216_v6 }
 0x427   :  { %v2347_v62 = vand.u32 2147483647, %v2217_v16  ;;  %2263 = vmatmul.f32.gmra.mxu1 %v2163_v50  ;;  %v2315_v5 = vmax.f32 %v2217_v16, 0.0 }
 0x429   :  { %v2379_v42 = vsub.f32 0.0, %v2347_v62 }
 0x42a   :  { %v2102_v13 = vpop.f32.mrf.mxu0 }
 0x42b   :  { %v2411_v31 = vmul.f32 1.442695, %v2379_v42  ;;  %v2103_v23 = vadd.f32 %v4451_v45, %v2102_v13 }
 0x42c   :  { %v2219_v34 = vpop.f32.mrf.mxu1 }
 0x42d   :  { %2975 = vpow2.f32 %v2411_v31  ;;  %v2164_v14 = vmax.f32 %v2103_v23, 0.0  ;;  %v4493_v29 = vadd.f32 %v4487_v59, %v2219_v34 }
 0x42f   :  { %v2348_v2 = vand.u32 2147483647, %v4493_v29  ;;  %2266 = vmatmul.f32.gmra.mxu1 %v2164_v14  ;;  %v2316_v26 = vmax.f32 %v4493_v29, 0.0 }
 0x431   :  { %v2380_v54 = vsub.f32 0.0, %v2348_v2 }
 0x432   :  { %v2105_v0 = vpop.f32.mrf.mxu0 }
 0x433   :  { %v2976_v4 = vpop.eup %2975  ;;  %v2413_v56 = vmul.f32 1.442695, %v2380_v54  ;;  %v2106_v35 = vadd.f32 %v4451_v45, %v2105_v0 }
 0x434   :  { %v2475_v32 = vadd.f32 1.0, %v2976_v4  ;;  %v2478_v37 = vmul.f32 -0.5, %v2976_v4  ;;  %v2222_v22 = vpop.f32.mrf.mxu1  ;;  %v2481_v30 = vand.u32 2147483647, %v2976_v4 }
 0x435   :  { %2977 = vpow2.f32 %v2413_v56  ;;  %v2165_v1 = vmax.f32 %v2106_v35, 0.0  ;;  %v4498_v36 = vadd.f32 %v4487_v59, %v2222_v22 }
 0x436   :  { %2979 = vlog2.f32 %v2475_v32  ;;  %v2479_v44 = vadd.f32 1.0, %v2478_v37  ;;  %vm2482_vm1 = vcmp.lt.f32.partialorder %v2481_v30, 0.0004427343 }
 0x437   :  { %v2349_v52 = vand.u32 2147483647, %v4498_v36  ;;  %2269 = vmatmul.f32.gmra.mxu1 %v2165_v1 }
 0x438   :  { %v2480_v43 = vmul.f32 %v2976_v4, %v2479_v44 }
 0x439   :  { %v2381_v47 = vsub.f32 0.0, %v2349_v52 }
 0x43a   :  { %v2108_v60 = vpop.f32.mrf.mxu0 }
 0x43b   :  { %v2978_v41 = vpop.eup %2977  ;;  %v2415_v3 = vmul.f32 1.442695, %v2381_v47  ;;  %v2109_v18 = vadd.f32 %v4451_v45, %v2108_v60 }
 0x43c   :  { %v2980_v63 = vpop.eup %2979  ;;  %v2484_v20 = vadd.f32 1.0, %v2978_v41  ;;  %v2487_v33 = vmul.f32 -0.5, %v2978_v41  ;;  %v2225_v12 = vpop.f32.mrf.mxu1  ;;  %v2490_v11 = vand.u32 2147483647, %v2978_v41 }
 0x43d   :  { %v2477_v51 = vmul.f32 0.6931472, %v2980_v63  ;;  %2981 = vpow2.f32 %v2415_v3  ;;  %v2166_v48 = vmax.f32 %v2109_v18, 0.0  ;;  %v4505_v19 = vadd.f32 %v4487_v59, %v2225_v12 }
 0x43e   :  { %2983 = vlog2.f32 %v2484_v20  ;;  %v2488_v17 = vadd.f32 1.0, %v2487_v33  ;;  %vm2491_vm3 = vcmp.lt.f32.partialorder %v2490_v11, 0.0004427343 }
 0x43f   :  { %v2483_v58 = vsel %vm2482_vm1, %v2480_v43, %v2477_v51  ;;  %v2350_v25 = vand.u32 2147483647, %v4505_v19  ;;  %2272 = vmatmul.f32.gmra.mxu1 %v2166_v48 }
 0x440   :  { %v2763_v24 = vadd.f32 %v2483_v58, %v2315_v5  ;;  %v2489_v53 = vmul.f32 %v2978_v41, %v2488_v17 }
 0x441   :  { %v2382_v39 = vsub.f32 0.0, %v2350_v25 }
 0x442   :  { %v2795_v10 = vsel %vm2314_vm2, %v2763_v24, %v2217_v16  ;;  %v2111_v21 = vpop.f32.mrf.mxu0 }
 0x443   :  { %v2982_v46 = vpop.eup %2981  ;;  %2827 = vst [vmem:[#allocation11] sm:$0xff] %v2795_v10  ;;  %v2417_v55 = vmul.f32 1.442695, %v2382_v39  ;;  %v2112_v28 = vadd.f32 %v4451_v45, %v2111_v21 }
 0x444   :  { %v2984_v8 = vpop.eup %2983  ;;  %v2493_v27 = vadd.f32 1.0, %v2982_v46  ;;  %v2496_v49 = vmul.f32 -0.5, %v2982_v46  ;;  %v2228_v40 = vpop.f32.mrf.mxu1  ;;  %v2499_v13 = vand.u32 2147483647, %v2982_v46 }
 0x445   :  { %v2486_v38 = vmul.f32 0.6931472, %v2984_v8  ;;  %2985 = vpow2.f32 %v2417_v55  ;;  %v2167_v9 = vmax.f32 %v2112_v28, 0.0  ;;  %v4513_v15 = vadd.f32 %v4487_v59, %v2228_v40 }
 0x446   :  { %2987 = vlog2.f32 %v2493_v27  ;;  %v2497_v16 = vadd.f32 1.0, %v2496_v49  ;;  %vm2500_vm4 = vcmp.lt.f32.partialorder %v2499_v13, 0.0004427343 }
 0x447   :  { %v2492_v57 = vsel %vm2491_vm3, %v2489_v53, %v2486_v38  ;;  %v2351_v6 = vand.u32 2147483647, %v4513_v15  ;;  %2275 = vmatmul.f32.gmra.mxu1 %v2167_v9 }
 0x448   :  { %v2764_v50 = vadd.f32 %v2492_v57, %v2316_v26  ;;  %v2498_v54 = vmul.f32 %v2982_v46, %v2497_v16 }
 0x449   :  { %v2383_v62 = vsub.f32 0.0, %v2351_v6 }
 0x44a   :  { %v2796_v42 = vsel %vm2314_vm2, %v2764_v50, %v4493_v29  ;;  %v2114_v31 = vpop.f32.mrf.mxu0  ;;  %v2317_v29 = vmax.f32 %v4498_v36, 0.0 }
 0x44b   :  { %v2986_v23 = vpop.eup %2985  ;;  %2828 = vst [vmem:[#allocation11 + $0x8] sm:$0xff] %v2796_v42  ;;  %v2419_v34 = vmul.f32 1.442695, %v2383_v62  ;;  %v2115_v14 = vadd.f32 %v4451_v45, %v2114_v31 }
 0x44c   :  { %v2988_v2 = vpop.eup %2987  ;;  %v2502_v0 = vadd.f32 1.0, %v2986_v23  ;;  %v2505_v4 = vmul.f32 -0.5, %v2986_v23  ;;  %v2231_v56 = vpop.f32.mrf.mxu1  ;;  %v2508_v30 = vand.u32 2147483647, %v2986_v23 }
 0x44d   :  { %v2495_v35 = vmul.f32 0.6931472, %v2988_v2  ;;  %2989 = vpow2.f32 %v2419_v34  ;;  %v2168_v32 = vmax.f32 %v2115_v14, 0.0  ;;  %v4522_v37 = vadd.f32 %v4487_v59, %v2231_v56 }
 0x44e   :  { %2991 = vlog2.f32 %v2502_v0  ;;  %v2506_v52 = vadd.f32 1.0, %v2505_v4  ;;  %vm2509_vm5 = vcmp.lt.f32.partialorder %v2508_v30, 0.0004427343 }
 0x44f   :  { %v2501_v22 = vsel %vm2500_vm4, %v2498_v54, %v2495_v35  ;;  %v2352_v1 = vand.u32 2147483647, %v4522_v37  ;;  %2278 = vmatmul.f32.gmra.mxu1 %v2168_v32 }
 0x450   :  { %v2765_v7 = vadd.f32 %v2501_v22, %v2317_v29  ;;  %v2507_v43 = vmul.f32 %v2986_v23, %v2506_v52 }
 0x451   :  { %v2384_v44 = vsub.f32 0.0, %v2352_v1 }
 0x452   :  { %v2797_v47 = vsel %vm2314_vm2, %v2765_v7, %v4498_v36  ;;  %v2117_v60 = vpop.f32.mrf.mxu0  ;;  %v2318_v36 = vmax.f32 %v4505_v19, 0.0 }
 0x453   :  { %v2990_v41 = vpop.eup %2989  ;;  %2829 = vst [vmem:[#allocation11 + $0x10] sm:$0xff] %v2797_v47  ;;  %v2421_v3 = vmul.f32 1.442695, %v2384_v44  ;;  %v2118_v18 = vadd.f32 %v4451_v45, %v2117_v60 }
 0x454   :  { %v2992_v63 = vpop.eup %2991  ;;  %v2511_v20 = vadd.f32 1.0, %v2990_v41  ;;  %v2514_v33 = vmul.f32 -0.5, %v2990_v41  ;;  %v2234_v12 = vpop.f32.mrf.mxu1  ;;  %v2517_v11 = vand.u32 2147483647, %v2990_v41 }
 0x455   :  { %v2504_v51 = vmul.f32 0.6931472, %v2992_v63  ;;  %2993 = vpow2.f32 %v2421_v3  ;;  %v2169_v48 = vmax.f32 %v2118_v18, 0.0  ;;  %v4531_v5 = vadd.f32 %v4487_v59, %v2234_v12 }
 0x456   :  { %2995 = vlog2.f32 %v2511_v20  ;;  %v2515_v17 = vadd.f32 1.0, %v2514_v33  ;;  %vm2518_vm6 = vcmp.lt.f32.partialorder %v2517_v11, 0.0004427343 }
 0x457   :  { %v2510_v58 = vsel %vm2509_vm5, %v2507_v43, %v2504_v51  ;;  %v2353_v25 = vand.u32 2147483647, %v4531_v5  ;;  %2281 = vmatmul.f32.gmra.mxu1 %v2169_v48 }
 0x458   :  { %v2766_v24 = vadd.f32 %v2510_v58, %v2318_v36  ;;  %v2516_v53 = vmul.f32 %v2990_v41, %v2515_v17 }
 0x459   :  { %v2385_v39 = vsub.f32 0.0, %v2353_v25 }
 0x45a   :  { %v2798_v10 = vsel %vm2314_vm2, %v2766_v24, %v4505_v19  ;;  %v2120_v21 = vpop.f32.mrf.mxu0  ;;  %v2319_v19 = vmax.f32 %v4513_v15, 0.0 }
 0x45b   :  { %v2994_v46 = vpop.eup %2993  ;;  %2830 = vst [vmem:[#allocation11 + $0x18] sm:$0xff] %v2798_v10  ;;  %v2423_v55 = vmul.f32 1.442695, %v2385_v39  ;;  %v2121_v28 = vadd.f32 %v4451_v45, %v2120_v21 }
 0x45c   :  { %v2996_v8 = vpop.eup %2995  ;;  %v2520_v27 = vadd.f32 1.0, %v2994_v46  ;;  %v2523_v49 = vmul.f32 -0.5, %v2994_v46  ;;  %v2237_v40 = vpop.f32.mrf.mxu1  ;;  %v2526_v13 = vand.u32 2147483647, %v2994_v46 }
 0x45d   :  { %v2513_v38 = vmul.f32 0.6931472, %v2996_v8  ;;  %2997 = vpow2.f32 %v2423_v55  ;;  %v2170_v9 = vmax.f32 %v2121_v28, 0.0  ;;  %v4540_v26 = vadd.f32 %v4487_v59, %v2237_v40 }
 0x45e   :  { %2999 = vlog2.f32 %v2520_v27  ;;  %v2524_v16 = vadd.f32 1.0, %v2523_v49  ;;  %vm2527_vm7 = vcmp.lt.f32.partialorder %v2526_v13, 0.0004427343 }
 0x45f   :  { %v2519_v57 = vsel %vm2518_vm6, %v2516_v53, %v2513_v38  ;;  %v2354_v6 = vand.u32 2147483647, %v4540_v26  ;;  %2284 = vmatmul.f32.gmra.mxu1 %v2170_v9 }
 0x460   :  { %v2767_v50 = vadd.f32 %v2519_v57, %v2319_v19  ;;  %v2525_v54 = vmul.f32 %v2994_v46, %v2524_v16 }
 0x461   :  { %v2386_v62 = vsub.f32 0.0, %v2354_v6 }
 0x462   :  { %v2799_v42 = vsel %vm2314_vm2, %v2767_v50, %v4513_v15  ;;  %v2123_v31 = vpop.f32.mrf.mxu0  ;;  %v2320_v15 = vmax.f32 %v4522_v37, 0.0 }
 0x463   :  { %v2998_v23 = vpop.eup %2997  ;;  %2831 = vst [vmem:[#allocation11 + $0x20] sm:$0xff] %v2799_v42  ;;  %v2425_v34 = vmul.f32 1.442695, %v2386_v62  ;;  %v2124_v14 = vadd.f32 %v4451_v45, %v2123_v31 }
 0x464   :  { %v3000_v2 = vpop.eup %2999  ;;  %v2529_v0 = vadd.f32 1.0, %v2998_v23  ;;  %v2532_v4 = vmul.f32 -0.5, %v2998_v23  ;;  %v2240_v56 = vpop.f32.mrf.mxu1  ;;  %v2535_v30 = vand.u32 2147483647, %v2998_v23 }
 0x465   :  { %v2522_v35 = vmul.f32 0.6931472, %v3000_v2  ;;  %3001 = vpow2.f32 %v2425_v34  ;;  %v2171_v32 = vmax.f32 %v2124_v14, 0.0  ;;  %v4549_v29 = vadd.f32 %v4487_v59, %v2240_v56 }
 0x466   :  { %3003 = vlog2.f32 %v2529_v0  ;;  %v2533_v52 = vadd.f32 1.0, %v2532_v4  ;;  %vm2536_vm8 = vcmp.lt.f32.partialorder %v2535_v30, 0.0004427343 }
 0x467   :  { %v2528_v22 = vsel %vm2527_vm7, %v2525_v54, %v2522_v35  ;;  %v2355_v1 = vand.u32 2147483647, %v4549_v29  ;;  %2287 = vmatmul.f32.gmra.mxu1 %v2171_v32 }
 0x468   :  { %v2768_v7 = vadd.f32 %v2528_v22, %v2320_v15  ;;  %v2534_v43 = vmul.f32 %v2998_v23, %v2533_v52 }
 0x469   :  { %v2387_v44 = vsub.f32 0.0, %v2355_v1 }
 0x46a   :  { %v2800_v47 = vsel %vm2314_vm2, %v2768_v7, %v4522_v37  ;;  %v2126_v60 = vpop.f32.mrf.mxu0  ;;  %v2321_v37 = vmax.f32 %v4531_v5, 0.0 }
 0x46b   :  { %v3002_v41 = vpop.eup %3001  ;;  %2832 = vst [vmem:[#allocation11 + $0x28] sm:$0xff] %v2800_v47  ;;  %v2427_v3 = vmul.f32 1.442695, %v2387_v44  ;;  %v2127_v18 = vadd.f32 %v4451_v45, %v2126_v60 }
 0x46c   :  { %v3004_v63 = vpop.eup %3003  ;;  %v2538_v20 = vadd.f32 1.0, %v3002_v41  ;;  %v2541_v33 = vmul.f32 -0.5, %v3002_v41  ;;  %v2243_v12 = vpop.f32.mrf.mxu1  ;;  %v2544_v11 = vand.u32 2147483647, %v3002_v41 }
 0x46d   :  { %v2531_v51 = vmul.f32 0.6931472, %v3004_v63  ;;  %3005 = vpow2.f32 %v2427_v3  ;;  %v2172_v48 = vmax.f32 %v2127_v18, 0.0  ;;  %v4558_v36 = vadd.f32 %v4487_v59, %v2243_v12 }
 0x46e   :  { %3007 = vlog2.f32 %v2538_v20  ;;  %v2542_v17 = vadd.f32 1.0, %v2541_v33  ;;  %vm2545_vm9 = vcmp.lt.f32.partialorder %v2544_v11, 0.0004427343 }
 0x46f   :  { %v2537_v58 = vsel %vm2536_vm8, %v2534_v43, %v2531_v51  ;;  %v2356_v25 = vand.u32 2147483647, %v4558_v36  ;;  %2290 = vmatmul.f32.gmra.mxu1 %v2172_v48 }
 0x470   :  { %v2769_v24 = vadd.f32 %v2537_v58, %v2321_v37  ;;  %v2543_v53 = vmul.f32 %v3002_v41, %v2542_v17 }
 0x471   :  { %v2388_v39 = vsub.f32 0.0, %v2356_v25 }
 0x472   :  { %v2801_v10 = vsel %vm2314_vm2, %v2769_v24, %v4531_v5  ;;  %v2129_v21 = vpop.f32.mrf.mxu0  ;;  %v2322_v5 = vmax.f32 %v4540_v26, 0.0 }
 0x473   :  { %v3006_v46 = vpop.eup %3005  ;;  %2833 = vst [vmem:[#allocation11 + $0x30] sm:$0xff] %v2801_v10  ;;  %v2429_v55 = vmul.f32 1.442695, %v2388_v39  ;;  %v2130_v28 = vadd.f32 %v4451_v45, %v2129_v21 }
 0x474   :  { %v3008_v8 = vpop.eup %3007  ;;  %v2547_v27 = vadd.f32 1.0, %v3006_v46  ;;  %v2550_v49 = vmul.f32 -0.5, %v3006_v46  ;;  %v2246_v40 = vpop.f32.mrf.mxu1  ;;  %v2553_v13 = vand.u32 2147483647, %v3006_v46 }
 0x475   :  { %v2540_v38 = vmul.f32 0.6931472, %v3008_v8  ;;  %3009 = vpow2.f32 %v2429_v55  ;;  %v2173_v9 = vmax.f32 %v2130_v28, 0.0  ;;  %v4567_v19 = vadd.f32 %v4487_v59, %v2246_v40 }
 0x476   :  { %3011 = vlog2.f32 %v2547_v27  ;;  %v2551_v16 = vadd.f32 1.0, %v2550_v49  ;;  %vm2554_vm10 = vcmp.lt.f32.partialorder %v2553_v13, 0.0004427343 }
 0x477   :  { %v2546_v57 = vsel %vm2545_vm9, %v2543_v53, %v2540_v38  ;;  %v2357_v6 = vand.u32 2147483647, %v4567_v19  ;;  %2293 = vmatmul.f32.gmra.mxu1 %v2173_v9 }
 0x478   :  { %v2770_v50 = vadd.f32 %v2546_v57, %v2322_v5  ;;  %v2552_v54 = vmul.f32 %v3006_v46, %v2551_v16 }
 0x479   :  { %v2389_v62 = vsub.f32 0.0, %v2357_v6 }
 0x47a   :  { %v2802_v42 = vsel %vm2314_vm2, %v2770_v50, %v4540_v26  ;;  %v2132_v31 = vpop.f32.mrf.mxu0  ;;  %v2323_v26 = vmax.f32 %v4549_v29, 0.0 }
 0x47b   :  { %v3010_v23 = vpop.eup %3009  ;;  %2834 = vst [vmem:[#allocation11 + $0x38] sm:$0xff] %v2802_v42  ;;  %v2431_v34 = vmul.f32 1.442695, %v2389_v62  ;;  %v2133_v14 = vadd.f32 %v4451_v45, %v2132_v31 }
 0x47c   :  { %v3012_v2 = vpop.eup %3011  ;;  %v2556_v0 = vadd.f32 1.0, %v3010_v23  ;;  %v2559_v4 = vmul.f32 -0.5, %v3010_v23  ;;  %v2249_v56 = vpop.f32.mrf.mxu1  ;;  %v2562_v30 = vand.u32 2147483647, %v3010_v23 }
 0x47d   :  { %v2549_v35 = vmul.f32 0.6931472, %v3012_v2  ;;  %3013 = vpow2.f32 %v2431_v34  ;;  %v2174_v32 = vmax.f32 %v2133_v14, 0.0  ;;  %v4576_v15 = vadd.f32 %v4487_v59, %v2249_v56 }
 0x47e   :  { %3015 = vlog2.f32 %v2556_v0  ;;  %v2560_v52 = vadd.f32 1.0, %v2559_v4  ;;  %vm2563_vm11 = vcmp.lt.f32.partialorder %v2562_v30, 0.0004427343 }
 0x47f   :  { %v2555_v22 = vsel %vm2554_vm10, %v2552_v54, %v2549_v35  ;;  %v2358_v1 = vand.u32 2147483647, %v4576_v15  ;;  %2296 = vmatmul.f32.gmra.mxu1 %v2174_v32 }
 0x480   :  { %v2771_v7 = vadd.f32 %v2555_v22, %v2323_v26  ;;  %v2561_v43 = vmul.f32 %v3010_v23, %v2560_v52 }
 0x481   :  { %v2390_v44 = vsub.f32 0.0, %v2358_v1 }
 0x482   :  { %v2803_v47 = vsel %vm2314_vm2, %v2771_v7, %v4549_v29  ;;  %v2135_v60 = vpop.f32.mrf.mxu0  ;;  %v2324_v29 = vmax.f32 %v4558_v36, 0.0 }
 0x483   :  { %v3014_v41 = vpop.eup %3013  ;;  %2835 = vst [vmem:[#allocation11 + $0x40] sm:$0xff] %v2803_v47  ;;  %v2433_v3 = vmul.f32 1.442695, %v2390_v44  ;;  %v2136_v18 = vadd.f32 %v4451_v45, %v2135_v60 }
 0x484   :  { %v3016_v63 = vpop.eup %3015  ;;  %v2565_v20 = vadd.f32 1.0, %v3014_v41  ;;  %v2568_v33 = vmul.f32 -0.5, %v3014_v41  ;;  %v2252_v12 = vpop.f32.mrf.mxu1  ;;  %v2571_v11 = vand.u32 2147483647, %v3014_v41 }
 0x485   :  { %v2558_v51 = vmul.f32 0.6931472, %v3016_v63  ;;  %3017 = vpow2.f32 %v2433_v3  ;;  %v2175_v48 = vmax.f32 %v2136_v18, 0.0  ;;  %v4585_v37 = vadd.f32 %v4487_v59, %v2252_v12 }
 0x486   :  { %3019 = vlog2.f32 %v2565_v20  ;;  %v2569_v17 = vadd.f32 1.0, %v2568_v33  ;;  %vm2572_vm12 = vcmp.lt.f32.partialorder %v2571_v11, 0.0004427343 }
 0x487   :  { %v2564_v58 = vsel %vm2563_vm11, %v2561_v43, %v2558_v51  ;;  %v2359_v25 = vand.u32 2147483647, %v4585_v37  ;;  %2299 = vmatmul.f32.gmra.mxu1 %v2175_v48  ;;  %v2327_v12 = vmax.f32 %v4585_v37, 0.0 }
 0x488   :  { %v2772_v24 = vadd.f32 %v2564_v58, %v2324_v29  ;;  %v2570_v53 = vmul.f32 %v3014_v41, %v2569_v17 }
 0x489   :  { %v2391_v39 = vsub.f32 0.0, %v2359_v25 }
 0x48a   :  { %v2804_v10 = vsel %vm2314_vm2, %v2772_v24, %v4558_v36  ;;  %v2138_v21 = vpop.f32.mrf.mxu0  ;;  %v2325_v36 = vmax.f32 %v4567_v19, 0.0  ;;  %v3103_v24 = vld [vmem:[%s4772_s10] ss:$0 sm:$0xff] }
 0x48b   :  { %v3018_v46 = vpop.eup %3017  ;;  %2836 = vst [vmem:[#allocation11 + $0x48] sm:$0xff] %v2804_v10  ;;  %v2435_v55 = vmul.f32 1.442695, %v2391_v39  ;;  %v2139_v28 = vadd.f32 %v4451_v45, %v2138_v21 }
 0x48c   :  { %v3020_v8 = vpop.eup %3019  ;;  %v2574_v27 = vadd.f32 1.0, %v3018_v46  ;;  %v2577_v49 = vmul.f32 -0.5, %v3018_v46  ;;  %v2255_v40 = vpop.f32.mrf.mxu1  ;;  %v2580_v13 = vand.u32 2147483647, %v3018_v46 }
 0x48d   :  { %v2567_v38 = vmul.f32 0.6931472, %v3020_v8  ;;  %3021 = vpow2.f32 %v2435_v55  ;;  %v2176_v9 = vmax.f32 %v2139_v28, 0.0  ;;  %v4594_v5 = vadd.f32 %v4487_v59, %v2255_v40 }
 0x48e   :  { %3023 = vlog2.f32 %v2574_v27  ;;  %v2578_v16 = vadd.f32 1.0, %v2577_v49  ;;  %vm2581_vm13 = vcmp.lt.f32.partialorder %v2580_v13, 0.0004427343 }
 0x48f   :  { %v2573_v57 = vsel %vm2572_vm12, %v2570_v53, %v2567_v38  ;;  %v2360_v6 = vand.u32 2147483647, %v4594_v5  ;;  %2302 = vmatmul.f32.gmra.mxu1 %v2176_v9  ;;  %v2328_v38 = vmax.f32 %v4594_v5, 0.0 }
 0x490   :  { %v2773_v50 = vadd.f32 %v2573_v57, %v2325_v36  ;;  %v2579_v54 = vmul.f32 %v3018_v46, %v2578_v16 }
 0x491   :  { %v2392_v62 = vsub.f32 0.0, %v2360_v6 }
 0x492   :  { %v2805_v42 = vsel %vm2314_vm2, %v2773_v50, %v4567_v19  ;;  %v2141_v31 = vpop.f32.mrf.mxu0  ;;  %v2326_v19 = vmax.f32 %v4576_v15, 0.0 }
 0x493   :  { %v3022_v23 = vpop.eup %3021  ;;  %2837 = vst [vmem:[#allocation11 + $0x50] sm:$0xff] %v2805_v42  ;;  %v2437_v34 = vmul.f32 1.442695, %v2392_v62  ;;  %v2142_v14 = vadd.f32 %v4451_v45, %v2141_v31 }
 0x494   :  { %v3024_v2 = vpop.eup %3023  ;;  %v2583_v0 = vadd.f32 1.0, %v3022_v23  ;;  %v2586_v4 = vmul.f32 -0.5, %v3022_v23  ;;  %v2258_v56 = vpop.f32.mrf.mxu1  ;;  %v2589_v47 = vand.u32 2147483647, %v3022_v23 }
 0x495   :  { %v2576_v35 = vmul.f32 0.6931472, %v3024_v2  ;;  %3025 = vpow2.f32 %v2437_v34  ;;  %v2177_v32 = vmax.f32 %v2142_v14, 0.0  ;;  %v4603_v26 = vadd.f32 %v4487_v59, %v2258_v56 }
 0x496   :  { %3027 = vlog2.f32 %v2583_v0  ;;  %v2587_v7 = vadd.f32 1.0, %v2586_v4  ;;  %vm2590_vm14 = vcmp.lt.f32.partialorder %v2589_v47, 0.0004427343 }
 0x497   :  { %v2582_v22 = vsel %vm2581_vm13, %v2579_v54, %v2576_v35  ;;  %v2361_v1 = vand.u32 2147483647, %v4603_v26  ;;  %2305 = vmatmul.f32.gmra.mxu1 %v2177_v32  ;;  %v2329_v0 = vmax.f32 %v4603_v26, 0.0 }
 0x498   :  { %v2774_v45 = vadd.f32 %v2582_v22, %v2326_v19  ;;  %v2588_v20 = vmul.f32 %v3022_v23, %v2587_v7 }
 0x499   :  { %v2393_v52 = vsub.f32 0.0, %v2361_v1 }
 0x49a   :  { %v2806_v44 = vsel %vm2314_vm2, %v2774_v45, %v4576_v15 }
 0x49b   :  { %v3026_v30 = vpop.eup %3025  ;;  %2838 = vst [vmem:[#allocation11 + $0x58] sm:$0xff] %v2806_v44  ;;  %v2439_v60 = vmul.f32 1.442695, %v2393_v52 }
 0x49c   :  { %v3028_v41 = vpop.eup %3027  ;;  %v2592_v3 = vadd.f32 1.0, %v3026_v30  ;;  %v2595_v18 = vmul.f32 -0.5, %v3026_v30  ;;  %v2261_v63 = vpop.f32.mrf.mxu1  ;;  %v2598_v10 = vand.u32 2147483647, %v3026_v30 }
 0x49d   :  { %v2585_v43 = vmul.f32 0.6931472, %v3028_v41  ;;  %3029 = vpow2.f32 %v2439_v60  ;;  %v4611_v33 = vadd.f32 %v4487_v59, %v2261_v63 }
 0x49e   :  { %3031 = vlog2.f32 %v2592_v3  ;;  %v2596_v29 = vadd.f32 1.0, %v2595_v18  ;;  %vm2599_vm15 = vcmp.lt.f32.partialorder %v2598_v10, 0.0004427343 }
 0x49f   :  { %v2591_v51 = vsel %vm2590_vm14, %v2588_v20, %v2585_v43  ;;  %v2362_v15 = vand.u32 2147483647, %v4611_v33  ;;  %v2330_v3 = vmax.f32 %v4611_v33, 0.0 }
 0x4a0   :  { %v2775_v48 = vadd.f32 %v2591_v51, %v2327_v12  ;;  %v2144_v58 = vpop.f32.mrf.mxu2  ;;  %v2597_v28 = vmul.f32 %v3026_v30, %v2596_v29 }
 0x4a1   :  { %v2394_v25 = vsub.f32 0.0, %v2362_v15  ;;  %v2145_v17 = vadd.f32 %v3103_v24, %v2144_v58 }
 0x4a2   :  { %v2807_v39 = vsel %vm2314_vm2, %v2775_v48, %v4585_v37 }
 0x4a3   :  { %v3030_v11 = vpop.eup %3029  ;;  %2839 = vst [vmem:[#allocation11 + $0x60] sm:$0xff] %v2807_v39  ;;  %v2441_v21 = vmul.f32 1.442695, %v2394_v25  ;;  %v2178_v46 = vmax.f32 %v2145_v17, 0.0 }
 0x4a4   :  { %v3032_v55 = vpop.eup %3031  ;;  %v2601_v8 = vadd.f32 1.0, %v3030_v11  ;;  %v2264_v53 = vpop.f32.mrf.mxu1  ;;  %v2604_v49 = vmul.f32 -0.5, %v3030_v11  ;;  %v2607_v16 = vand.u32 2147483647, %v3030_v11 }
 0x4a5   :  { %v2594_v27 = vmul.f32 0.6931472, %v3032_v55  ;;  %3033 = vpow2.f32 %v2441_v21  ;;  %v4622_v40 = vadd.f32 %v4487_v59, %v2264_v53  ;;  %2308 = vmatmul.f32.gmra.mxu1 %v2178_v46 }
 0x4a6   :  { %3035 = vlog2.f32 %v2601_v8  ;;  %v2605_v57 = vadd.f32 1.0, %v2604_v49  ;;  %vm2608_vm0 = vcmp.lt.f32.partialorder %v2607_v16, 0.0004427343 }
 0x4a7   :  { %v2600_v37 = vsel %vm2599_vm15, %v2597_v28, %v2594_v27  ;;  %v2363_v9 = vand.u32 2147483647, %v4622_v40 }
 0x4a8   :  { %v2776_v36 = vadd.f32 %v2600_v37, %v2328_v38  ;;  %v2606_v2 = vmul.f32 %v3030_v11, %v2605_v57  ;;  %v2331_v11 = vmax.f32 %v4622_v40, 0.0 }
 0x4a9   :  { %v2395_v6 = vsub.f32 0.0, %v2363_v9 }
 0x4aa   :  { %v2808_v50 = vsel %vm2314_vm2, %v2776_v36, %v4594_v5 }
 0x4ab   :  { %v3034_v62 = vpop.eup %3033  ;;  %2840 = vst [vmem:[#allocation11 + $0x68] sm:$0xff] %v2808_v50  ;;  %v2443_v42 = vmul.f32 1.442695, %v2395_v6 }
 0x4ac   :  { %v3036_v13 = vpop.eup %3035  ;;  %v2610_v31 = vadd.f32 1.0, %v3034_v62  ;;  %v2613_v23 = vmul.f32 -0.5, %v3034_v62  ;;  %v2267_v34 = vpop.f32.mrf.mxu1  ;;  %v2616_v22 = vand.u32 2147483647, %v3034_v62 }
 0x4ad   :  { %v2603_v14 = vmul.f32 0.6931472, %v3036_v13  ;;  %3037 = vpow2.f32 %v2443_v42  ;;  %v4630_v54 = vadd.f32 %v4487_v59, %v2267_v34 }
 0x4ae   :  { %3039 = vlog2.f32 %v2610_v31  ;;  %v2614_v35 = vadd.f32 1.0, %v2613_v23  ;;  %vm2617_vm1 = vcmp.lt.f32.partialorder %v2616_v22, 0.0004427343 }
 0x4af   :  { %v2609_v4 = vsel %vm2608_vm0, %v2606_v2, %v2603_v14  ;;  %v2364_v5 = vand.u32 2147483647, %v4630_v54  ;;  %v2332_v16 = vmax.f32 %v4630_v54, 0.0 }
 0x4b0   :  { %v2777_v56 = vadd.f32 %v2609_v4, %v2329_v0  ;;  %v2615_v52 = vmul.f32 %v3034_v62, %v2614_v35 }
 0x4b1   :  { %v2396_v32 = vsub.f32 0.0, %v2364_v5 }
 0x4b2   :  { %v2809_v19 = vsel %vm2314_vm2, %v2777_v56, %v4603_v26 }
 0x4b3   :  { %v3038_v1 = vpop.eup %3037  ;;  %2841 = vst [vmem:[#allocation11 + $0x70] sm:$0xff] %v2809_v19  ;;  %v2445_v45 = vmul.f32 1.442695, %v2396_v32 }
 0x4b4   :  { %v3040_v7 = vpop.eup %3039  ;;  %v2619_v44 = vadd.f32 1.0, %v3038_v1  ;;  %v2270_v47 = vpop.f32.mrf.mxu1  ;;  %v2622_v60 = vmul.f32 -0.5, %v3038_v1  ;;  %v2625_v51 = vand.u32 2147483647, %v3038_v1 }
 0x4b5   :  { %v2612_v30 = vmul.f32 0.6931472, %v3040_v7  ;;  %3041 = vpow2.f32 %v2445_v45  ;;  %v4638_v41 = vadd.f32 %v4487_v59, %v2270_v47 }
 0x4b6   :  { %3043 = vlog2.f32 %v2619_v44  ;;  %v2623_v43 = vadd.f32 1.0, %v2622_v60  ;;  %vm2626_vm3 = vcmp.lt.f32.partialorder %v2625_v51, 0.0004427343 }
 0x4b7   :  { %v2618_v18 = vsel %vm2617_vm1, %v2615_v52, %v2612_v30  ;;  %v2365_v26 = vand.u32 2147483647, %v4638_v41  ;;  %v2333_v22 = vmax.f32 %v4638_v41, 0.0 }
 0x4b8   :  { %v2778_v63 = vadd.f32 %v2618_v18, %v2330_v3  ;;  %v2624_v39 = vmul.f32 %v3038_v1, %v2623_v43 }
 0x4b9   :  { %v2397_v20 = vsub.f32 0.0, %v2365_v26 }
 0x4ba   :  { %v2810_v12 = vsel %vm2314_vm2, %v2778_v63, %v4611_v33 }
 0x4bb   :  { %v3042_v15 = vpop.eup %3041  ;;  %2842 = vst [vmem:[#allocation11 + $0x78] sm:$0xff] %v2810_v12  ;;  %v2447_v48 = vmul.f32 1.442695, %v2397_v20 }
 0x4bc   :  { %v3044_v29 = vpop.eup %3043  ;;  %v2628_v58 = vadd.f32 1.0, %v3042_v15  ;;  %v2631_v25 = vmul.f32 -0.5, %v3042_v15  ;;  %v2273_v24 = vpop.f32.mrf.mxu1  ;;  %v2634_v53 = vand.u32 2147483647, %v3042_v15 }
 0x4bd   :  { %v2621_v17 = vmul.f32 0.6931472, %v3044_v29  ;;  %3045 = vpow2.f32 %v2447_v48  ;;  %v4646_v10 = vadd.f32 %v4487_v59, %v2273_v24 }
 0x4be   :  { %3047 = vlog2.f32 %v2628_v58  ;;  %v2632_v55 = vadd.f32 1.0, %v2631_v25  ;;  %vm2635_vm4 = vcmp.lt.f32.partialorder %v2634_v53, 0.0004427343 }
 0x4bf   :  { %v2627_v21 = vsel %vm2626_vm3, %v2624_v39, %v2621_v17  ;;  %v2366_v33 = vand.u32 2147483647, %v4646_v10  ;;  %v2334_v51 = vmax.f32 %v4646_v10, 0.0 }
 0x4c0   :  { %v2779_v46 = vadd.f32 %v2627_v21, %v2331_v11  ;;  %v2633_v37 = vmul.f32 %v3042_v15, %v2632_v55 }
 0x4c1   :  { %v2398_v28 = vsub.f32 0.0, %v2366_v33 }
 0x4c2   :  { %v2811_v8 = vsel %vm2314_vm2, %v2779_v46, %v4622_v40 }
 0x4c3   :  { %v3046_v27 = vpop.eup %3045  ;;  %2843 = vst [vmem:[#allocation11 + $0x80] sm:$0xff] %v2811_v8  ;;  %v2449_v49 = vmul.f32 1.442695, %v2398_v28  ;;  %v4680_v28 = vld [vmem:[%s4774_s12] ss:$0 sm:$0xff]  ;;  %s3266_s12 = smov [#allocation11]  }
 0x4c4   :  { %v3048_v38 = vpop.eup %3047  ;;  %v2637_v9 = vadd.f32 1.0, %v3046_v27  ;;  %v2276_v36 = vpop.f32.mrf.mxu1  ;;  %v2640_v6 = vmul.f32 -0.5, %v3046_v27  ;;  %v2643_v34 = vand.u32 2147483647, %v3046_v27  ;;  %s2863_s0 = sshll.u32 %s3266_s12, 4  ;;  %s2864_s0 = int_to_ptr.vmem [resolvable:$true] %s2863_s0 }
 0x4c5   :  { %v2630_v57 = vmul.f32 0.6931472, %v3048_v38  ;;  %3049 = vpow2.f32 %v2449_v49  ;;  %v4654_v50 = vadd.f32 %v4487_v59, %v2276_v36 }
 0x4c6   :  { %3051 = vlog2.f32 %v2637_v9  ;;  %v2641_v13 = vadd.f32 1.0, %v2640_v6  ;;  %vm2644_vm5 = vcmp.lt.f32.partialorder %v2643_v34, 0.0004427343 }
 0x4c7   :  { %v2636_v62 = vsel %vm2635_vm4, %v2633_v37, %v2630_v57  ;;  %v2367_v40 = vand.u32 2147483647, %v4654_v50 }
 0x4c8   :  { %v2780_v42 = vadd.f32 %v2636_v62, %v2332_v16  ;;  %v2642_v32 = vmul.f32 %v3046_v27, %v2641_v13 }
 0x4c9   :  { %v2399_v31 = vsub.f32 0.0, %v2367_v40 }
 0x4ca   :  { %v2812_v23 = vsel %vm2314_vm2, %v2780_v42, %v4630_v54 }
 0x4cb   :  { %v3050_v14 = vpop.eup %3049  ;;  %2844 = vst [vmem:[#allocation11 + $0x88] sm:$0xff] %v2812_v23  ;;  %v2451_v2 = vmul.f32 1.442695, %v2399_v31 }
 0x4cc   :  { %v3052_v0 = vpop.eup %3051  ;;  %v2646_v4 = vadd.f32 1.0, %v3050_v14  ;;  %v2649_v5 = vmul.f32 -0.5, %v3050_v14  ;;  %v2279_v56 = vpop.f32.mrf.mxu1  ;;  %v2652_v47 = vand.u32 2147483647, %v3050_v14 }
 0x4cd   :  { %v2639_v35 = vmul.f32 0.6931472, %v3052_v0  ;;  %3053 = vpow2.f32 %v2451_v2  ;;  %v4662_v19 = vadd.f32 %v4487_v59, %v2279_v56 }
 0x4ce   :  { %3055 = vlog2.f32 %v2646_v4  ;;  %v2650_v7 = vadd.f32 1.0, %v2649_v5  ;;  %vm2653_vm6 = vcmp.lt.f32.partialorder %v2652_v47, 0.0004427343 }
 0x4cf   :  { %v2645_v1 = vsel %vm2644_vm5, %v2642_v32, %v2639_v35  ;;  %v2368_v54 = vand.u32 2147483647, %v4662_v19  ;;  %v2336_v34 = vmax.f32 %v4662_v19, 0.0 }
 0x4d0   :  { %v2781_v45 = vadd.f32 %v2645_v1, %v2333_v22  ;;  %v2651_v18 = vmul.f32 %v3050_v14, %v2650_v7 }
 0x4d1   :  { %v2400_v52 = vsub.f32 0.0, %v2368_v54 }
 0x4d2   :  { %v2813_v44 = vsel %vm2314_vm2, %v2781_v45, %v4638_v41 }
 0x4d3   :  { %v3054_v30 = vpop.eup %3053  ;;  %2845 = vst [vmem:[#allocation11 + $0x90] sm:$0xff] %v2813_v44  ;;  %v2453_v60 = vmul.f32 1.442695, %v2400_v52 }
 0x4d4   :  { %v3056_v3 = vpop.eup %3055  ;;  %v2655_v26 = vadd.f32 1.0, %v3054_v30  ;;  %v2282_v63 = vpop.f32.mrf.mxu1  ;;  %v2658_v20 = vmul.f32 -0.5, %v3054_v30  ;;  %v2661_v24 = vand.u32 2147483647, %v3054_v30 }
 0x4d5   :  { %v2648_v43 = vmul.f32 0.6931472, %v3056_v3  ;;  %3057 = vpow2.f32 %v2453_v60  ;;  %v4670_v12 = vadd.f32 %v4487_v59, %v2282_v63 }
 0x4d6   :  { %3059 = vlog2.f32 %v2655_v26  ;;  %v2659_v29 = vadd.f32 1.0, %v2658_v20  ;;  %vm2662_vm7 = vcmp.lt.f32.partialorder %v2661_v24, 0.0004427343 }
 0x4d7   :  { %v2654_v15 = vsel %vm2653_vm6, %v2651_v18, %v2648_v43  ;;  %v2369_v41 = vand.u32 2147483647, %v4670_v12  ;;  %v2337_v47 = vmax.f32 %v4670_v12, 0.0 }
 0x4d8   :  { %v2782_v48 = vadd.f32 %v2654_v15, %v2334_v51  ;;  %v2660_v55 = vmul.f32 %v3054_v30, %v2659_v29 }
 0x4d9   :  { %v2401_v58 = vsub.f32 0.0, %v2369_v41 }
 0x4da   :  { %v2814_v25 = vsel %vm2314_vm2, %v2782_v48, %v4646_v10  ;;  %v2335_v10 = vmax.f32 %v4654_v50, 0.0 }
 0x4db   :  { %v3058_v17 = vpop.eup %3057  ;;  %2846 = vst [vmem:[#allocation11 + $0x98] sm:$0xff] %v2814_v25  ;;  %v2455_v39 = vmul.f32 1.442695, %v2401_v58 }
 0x4dc   :  { %v3060_v59 = vpop.eup %3059  ;;  %v2664_v11 = vadd.f32 1.0, %v3058_v17  ;;  %v2667_v21 = vmul.f32 -0.5, %v3058_v17  ;;  %v2285_v33 = vpop.f32.mrf.mxu1  ;;  %v2670_v36 = vand.u32 2147483647, %v3058_v17 }
 0x4dd   :  { %v2657_v46 = vmul.f32 0.6931472, %v3060_v59  ;;  %3061 = vpow2.f32 %v2455_v39  ;;  %v4683_v8 = vadd.f32 %v4680_v28, %v2285_v33 }
 0x4de   :  { %3063 = vlog2.f32 %v2664_v11  ;;  %v2668_v38 = vadd.f32 1.0, %v2667_v21  ;;  %vm2671_vm8 = vcmp.lt.f32.partialorder %v2670_v36, 0.0004427343 }
 0x4df   :  { %v2663_v53 = vsel %vm2662_vm7, %v2660_v55, %v2657_v46  ;;  %v2370_v27 = vand.u32 2147483647, %v4683_v8  ;;  %v2338_v24 = vmax.f32 %v4683_v8, 0.0 }
 0x4e0   :  { %v2783_v49 = vadd.f32 %v2663_v53, %v2335_v10  ;;  %v2669_v62 = vmul.f32 %v3058_v17, %v2668_v38 }
 0x4e1   :  { %v2402_v37 = vsub.f32 0.0, %v2370_v27 }
 0x4e2   :  { %v2815_v9 = vsel %vm2314_vm2, %v2783_v49, %v4654_v50 }
 0x4e3   :  { %v3062_v57 = vpop.eup %3061  ;;  %2847 = vst [vmem:[#allocation11 + $0xa0] sm:$0xff] %v2815_v9  ;;  %v2457_v6 = vmul.f32 1.442695, %v2402_v37 }
 0x4e4   :  { %v3064_v16 = vpop.eup %3063  ;;  %v2673_v40 = vadd.f32 1.0, %v3062_v57  ;;  %v2288_v42 = vpop.f32.mrf.mxu1  ;;  %v2676_v31 = vmul.f32 -0.5, %v3062_v57  ;;  %v2679_v56 = vand.u32 2147483647, %v3062_v57 }
 0x4e5   :  { %v2666_v13 = vmul.f32 0.6931472, %v3064_v16  ;;  %3065 = vpow2.f32 %v2457_v6  ;;  %v4691_v23 = vadd.f32 %v4680_v28, %v2288_v42 }
 0x4e6   :  { %3067 = vlog2.f32 %v2673_v40  ;;  %v2677_v0 = vadd.f32 1.0, %v2676_v31  ;;  %vm2680_vm9 = vcmp.lt.f32.partialorder %v2679_v56, 0.0004427343 }
 0x4e7   :  { %v2672_v14 = vsel %vm2671_vm8, %v2669_v62, %v2666_v13  ;;  %v2371_v50 = vand.u32 2147483647, %v4691_v23  ;;  %v2339_v36 = vmax.f32 %v4691_v23, 0.0 }
 0x4e8   :  { %v2784_v2 = vadd.f32 %v2672_v14, %v2336_v34  ;;  %v2678_v52 = vmul.f32 %v3062_v57, %v2677_v0 }
 0x4e9   :  { %v2403_v4 = vsub.f32 0.0, %v2371_v50 }
 0x4ea   :  { %v2816_v5 = vsel %vm2314_vm2, %v2784_v2, %v4662_v19 }
 0x4eb   :  { %v3066_v35 = vpop.eup %3065  ;;  %2848 = vst [vmem:[#allocation11 + $0xa8] sm:$0xff] %v2816_v5  ;;  %v2459_v32 = vmul.f32 1.442695, %v2403_v4 }
 0x4ec   :  { %v3068_v22 = vpop.eup %3067  ;;  %v2682_v1 = vadd.f32 1.0, %v3066_v35  ;;  %v2685_v54 = vmul.f32 -0.5, %v3066_v35  ;;  %v2291_v45 = vpop.f32.mrf.mxu1  ;;  %v2688_v63 = vand.u32 2147483647, %v3066_v35 }
 0x4ed   :  { %v2675_v7 = vmul.f32 0.6931472, %v3068_v22  ;;  %3069 = vpow2.f32 %v2459_v32  ;;  %v4699_v44 = vadd.f32 %v4680_v28, %v2291_v45 }
 0x4ee   :  { %3071 = vlog2.f32 %v2682_v1  ;;  %v2686_v3 = vadd.f32 1.0, %v2685_v54  ;;  %vm2689_vm10 = vcmp.lt.f32.partialorder %v2688_v63, 0.0004427343 }
 0x4ef   :  { %v2681_v30 = vsel %vm2680_vm9, %v2678_v52, %v2675_v7  ;;  %v2372_v19 = vand.u32 2147483647, %v4699_v44  ;;  %v2340_v56 = vmax.f32 %v4699_v44, 0.0 }
 0x4f0   :  { %v2785_v60 = vadd.f32 %v2681_v30, %v2337_v47  ;;  %v2687_v15 = vmul.f32 %v3066_v35, %v2686_v3 }
 0x4f1   :  { %v2404_v18 = vsub.f32 0.0, %v2372_v19 }
 0x4f2   :  { %v2817_v26 = vsel %vm2314_vm2, %v2785_v60, %v4670_v12 }
 0x4f3   :  { %v3070_v43 = vpop.eup %3069  ;;  %2849 = vst [vmem:[#allocation11 + $0xb0] sm:$0xff] %v2817_v26  ;;  %v2461_v20 = vmul.f32 1.442695, %v2404_v18 }
 0x4f4   :  { %v3072_v51 = vpop.eup %3071  ;;  %v2691_v41 = vadd.f32 1.0, %v3070_v43  ;;  %v2294_v48 = vpop.f32.mrf.mxu1  ;;  %v2694_v58 = vmul.f32 -0.5, %v3070_v43  ;;  %v2697_v33 = vand.u32 2147483647, %v3070_v43 }
 0x4f5   :  { %v2684_v29 = vmul.f32 0.6931472, %v3072_v51  ;;  %3073 = vpow2.f32 %v2461_v20  ;;  %v4707_v25 = vadd.f32 %v4680_v28, %v2294_v48 }
 0x4f6   :  { %3075 = vlog2.f32 %v2691_v41  ;;  %v2695_v59 = vadd.f32 1.0, %v2694_v58  ;;  %vm2698_vm11 = vcmp.lt.f32.partialorder %v2697_v33, 0.0004427343 }
 0x4f7   :  { %v2690_v17 = vsel %vm2689_vm10, %v2687_v15, %v2684_v29  ;;  %v2373_v12 = vand.u32 2147483647, %v4707_v25  ;;  %v2341_v63 = vmax.f32 %v4707_v25, 0.0 }
 0x4f8   :  { %v2786_v39 = vadd.f32 %v2690_v17, %v2338_v24  ;;  %v2696_v37 = vmul.f32 %v3070_v43, %v2695_v59 }
 0x4f9   :  { %v2405_v11 = vsub.f32 0.0, %v2373_v12 }
 0x4fa   :  { %v2818_v21 = vsel %vm2314_vm2, %v2786_v39, %v4683_v8 }
 0x4fb   :  { %v3074_v46 = vpop.eup %3073  ;;  %2850 = vst [vmem:[#allocation11 + $0xb8] sm:$0xff] %v2818_v21  ;;  %v2463_v55 = vmul.f32 1.442695, %v2405_v11 }
 0x4fc   :  { %v3076_v10 = vpop.eup %3075  ;;  %v2700_v53 = vadd.f32 1.0, %v3074_v46  ;;  %v2703_v27 = vmul.f32 -0.5, %v3074_v46  ;;  %v2297_v49 = vpop.f32.mrf.mxu1  ;;  %v2706_v42 = vand.u32 2147483647, %v3074_v46 }
 0x4fd   :  { %v2693_v38 = vmul.f32 0.6931472, %v3076_v10  ;;  %3077 = vpow2.f32 %v2463_v55  ;;  %v4715_v9 = vadd.f32 %v4680_v28, %v2297_v49 }
 0x4fe   :  { %3079 = vlog2.f32 %v2700_v53  ;;  %v2704_v16 = vadd.f32 1.0, %v2703_v27  ;;  %vm2707_vm12 = vcmp.lt.f32.partialorder %v2706_v42, 0.0004427343 }
 0x4ff   :  { %v2699_v57 = vsel %vm2698_vm11, %v2696_v37, %v2693_v38  ;;  %v2374_v8 = vand.u32 2147483647, %v4715_v9  ;;  %v2342_v33 = vmax.f32 %v4715_v9, 0.0 }
 0x500   :  { %v2787_v6 = vadd.f32 %v2699_v57, %v2339_v36  ;;  %v2705_v14 = vmul.f32 %v3074_v46, %v2704_v16 }
 0x501   :  { %v2406_v62 = vsub.f32 0.0, %v2374_v8 }
 0x502   :  { %v2819_v40 = vsel %vm2314_vm2, %v2787_v6, %v4691_v23 }
 0x503   :  { %v3078_v13 = vpop.eup %3077  ;;  %2851 = vst [vmem:[#allocation11 + $0xc0] sm:$0xff] %v2819_v40  ;;  %v2465_v31 = vmul.f32 1.442695, %v2406_v62 }
 0x504   :  { %v3080_v34 = vpop.eup %3079  ;;  %v2709_v50 = vadd.f32 1.0, %v3078_v13  ;;  %v2300_v2 = vpop.f32.mrf.mxu1  ;;  %v2712_v4 = vmul.f32 -0.5, %v3078_v13  ;;  %v2715_v45 = vand.u32 2147483647, %v3078_v13 }
 0x505   :  { %v2702_v0 = vmul.f32 0.6931472, %v3080_v34  ;;  %3081 = vpow2.f32 %v2465_v31  ;;  %v4723_v5 = vadd.f32 %v4680_v28, %v2300_v2 }
 0x506   :  { %3083 = vlog2.f32 %v2709_v50  ;;  %v2713_v22 = vadd.f32 1.0, %v2712_v4  ;;  %vm2716_vm13 = vcmp.lt.f32.partialorder %v2715_v45, 0.0004427343 }
 0x507   :  { %v2708_v35 = vsel %vm2707_vm12, %v2705_v14, %v2702_v0  ;;  %v2375_v23 = vand.u32 2147483647, %v4723_v5  ;;  %v2343_v62 = vmax.f32 %v4723_v5, 0.0 }
 0x508   :  { %v2788_v32 = vadd.f32 %v2708_v35, %v2340_v56  ;;  %v2714_v18 = vmul.f32 %v3078_v13, %v2713_v22 }
 0x509   :  { %v2407_v1 = vsub.f32 0.0, %v2375_v23 }
 0x50a   :  { %v2820_v54 = vsel %vm2314_vm2, %v2788_v32, %v4699_v44 }
 0x50b   :  { %v3082_v7 = vpop.eup %3081  ;;  %2852 = vst [vmem:[#allocation11 + $0xc8] sm:$0xff] %v2820_v54  ;;  %v2467_v52 = vmul.f32 1.442695, %v2407_v1 }
 0x50c   :  { %v3084_v47 = vpop.eup %3083  ;;  %v2718_v30 = vadd.f32 1.0, %v3082_v7  ;;  %v2721_v19 = vmul.f32 -0.5, %v3082_v7  ;;  %v2303_v60 = vpop.f32.mrf.mxu1  ;;  %v2724_v48 = vand.u32 2147483647, %v3082_v7 }
 0x50d   :  { %v2711_v3 = vmul.f32 0.6931472, %v3084_v47  ;;  %3085 = vpow2.f32 %v2467_v52  ;;  %v4731_v26 = vadd.f32 %v4680_v28, %v2303_v60 }
 0x50e   :  { %3087 = vlog2.f32 %v2718_v30  ;;  %v2722_v51 = vadd.f32 1.0, %v2721_v19  ;;  %vm2725_vm14 = vcmp.lt.f32.partialorder %v2724_v48, 0.0004427343 }
 0x50f   :  { %v2717_v43 = vsel %vm2716_vm13, %v2714_v18, %v2711_v3  ;;  %v2376_v44 = vand.u32 2147483647, %v4731_v26  ;;  %v2344_v32 = vmax.f32 %v4731_v26, 0.0 }
 0x510   :  { %v2789_v20 = vadd.f32 %v2717_v43, %v2341_v63  ;;  %v2723_v17 = vmul.f32 %v3082_v7, %v2722_v51 }
 0x511   :  { %v2408_v15 = vsub.f32 0.0, %v2376_v44 }
 0x512   :  { %v2821_v41 = vsel %vm2314_vm2, %v2789_v20, %v4707_v25 }
 0x513   :  { %v3086_v29 = vpop.eup %3085  ;;  %2853 = vst [vmem:[#allocation11 + $0xd0] sm:$0xff] %v2821_v41  ;;  %v2469_v58 = vmul.f32 1.442695, %v2408_v15 }
 0x514   :  { %v3088_v24 = vpop.eup %3087  ;;  %v2727_v12 = vadd.f32 1.0, %v3086_v29  ;;  %v2306_v39 = vpop.f32.mrf.mxu1  ;;  %v2730_v11 = vmul.f32 -0.5, %v3086_v29  ;;  %v2733_v49 = vand.u32 2147483647, %v3086_v29 }
 0x515   :  { %v2720_v59 = vmul.f32 0.6931472, %v3088_v24  ;;  %3089 = vpow2.f32 %v2469_v58  ;;  %v2307_v21 = vadd.f32 %v4680_v28, %v2306_v39 }
 0x516   :  { %3091 = vlog2.f32 %v2727_v12  ;;  %v2731_v10 = vadd.f32 1.0, %v2730_v11  ;;  %vm2734_vm15 = vcmp.lt.f32.partialorder %v2733_v49, 0.0004427343 }
 0x517   :  { %v2726_v46 = vsel %vm2725_vm14, %v2723_v17, %v2720_v59  ;;  %v2377_v55 = vand.u32 2147483647, %v2307_v21  ;;  %v2345_v19 = vmax.f32 %v2307_v21, 0.0 }
 0x518   :  { %v2790_v25 = vadd.f32 %v2726_v46, %v2342_v33  ;;  %v2732_v6 = vmul.f32 %v3086_v29, %v2731_v10 }
 0x519   :  { %v2409_v53 = vsub.f32 0.0, %v2377_v55 }
 0x51a   :  { %v2822_v27 = vsel %vm2314_vm2, %v2790_v25, %v4715_v9 }
 0x51b   :  { %v3090_v38 = vpop.eup %3089  ;;  %2854 = vst [vmem:[#allocation11 + $0xd8] sm:$0xff] %v2822_v27  ;;  %v2471_v37 = vmul.f32 1.442695, %v2409_v53 }
 0x51c   :  { %v3092_v36 = vpop.eup %3091  ;;  %v2736_v57 = vadd.f32 1.0, %v3090_v38  ;;  %v2739_v16 = vmul.f32 -0.5, %v3090_v38  ;;  %v2742_v31 = vand.u32 2147483647, %v3090_v38 }
 0x51d   :  { %v2729_v8 = vmul.f32 0.6931472, %v3092_v36  ;;  %3093 = vpow2.f32 %v2471_v37 }
 0x51e   :  { %3095 = vlog2.f32 %v2736_v57  ;;  %v2740_v13 = vadd.f32 1.0, %v2739_v16  ;;  %vm2743_vm0 = vcmp.lt.f32.partialorder %v2742_v31, 0.0004427343 }
 0x51f   :  { %v2735_v40 = vsel %vm2734_vm15, %v2732_v6, %v2729_v8 }
 0x520   :  { %v2791_v42 = vadd.f32 %v2735_v40, %v2343_v62  ;;  %v2741_v56 = vmul.f32 %v3090_v38, %v2740_v13 }
 0x522   :  { %v2823_v9 = vsel %vm2314_vm2, %v2791_v42, %v4723_v5  ;;  %v2309_v34 = vpop.f32.mrf.mxu1 }
 0x523   :  { %v3094_v14 = vpop.eup %3093  ;;  %2855 = vst [vmem:[#allocation11 + $0xe0] sm:$0xff] %v2823_v9  ;;  %v2310_v50 = vadd.f32 %v4680_v28, %v2309_v34 }
 0x524   :  { %v3096_v2 = vpop.eup %3095  ;;  %v2745_v0 = vadd.f32 1.0, %v3094_v14  ;;  %v2748_v35 = vmul.f32 -0.5, %v3094_v14  ;;  %v2751_v28 = vand.u32 2147483647, %v3094_v14 }
 0x525   :  { %v2738_v4 = vmul.f32 0.6931472, %v3096_v2  ;;  %v2378_v23 = vand.u32 2147483647, %v2310_v50  ;;  %v2346_v48 = vmax.f32 %v2310_v50, 0.0 }
 0x526   :  { %3097 = vlog2.f32 %v2745_v0  ;;  %v2749_v5 = vadd.f32 1.0, %v2748_v35  ;;  %vm2752_vm1 = vcmp.lt.f32.partialorder %v2751_v28, 0.0004427343 }
 0x527   :  { %v2744_v22 = vsel %vm2743_vm0, %v2741_v56, %v2738_v4  ;;  %v2410_v1 = vsub.f32 0.0, %v2378_v23 }
 0x528   :  { %v2792_v54 = vadd.f32 %v2744_v22, %v2344_v32  ;;  %v2750_v30 = vmul.f32 %v3094_v14, %v2749_v5 }
 0x529   :  { %v2473_v45 = vmul.f32 1.442695, %v2410_v1 }
 0x52a   :  { %v2824_v7 = vsel %vm2314_vm2, %v2792_v54, %v4731_v26 }
 0x52b   :  { %2856 = vst [vmem:[#allocation11 + $0xe8] sm:$0xff] %v2824_v7  ;;  %3099 = vpow2.f32 %v2473_v45 }
 0x52c   :  { %v3098_v52 = vpop.eup %3097 }
 0x52d   :  { %v2747_v47 = vmul.f32 0.6931472, %v3098_v52 }
 0x52f   :  { %v2753_v60 = vsel %vm2752_vm1, %v2750_v30, %v2747_v47 }
 0x530   :  { %v2793_v3 = vadd.f32 %v2753_v60, %v2345_v19 }
 0x531   :  { %v3100_v18 = vpop.eup %3099 }
 0x532   :  { %v2825_v63 = vsel %vm2314_vm2, %v2793_v3, %v2307_v21  ;;  %v2754_v43 = vadd.f32 1.0, %v3100_v18  ;;  %v2757_v44 = vmul.f32 -0.5, %v3100_v18  ;;  %v2760_v26 = vand.u32 2147483647, %v3100_v18 }
 0x533   :  { %2857 = vst [vmem:[#allocation11 + $0xf0] sm:$0xff] %v2825_v63 }
 0x534   :  { %3101 = vlog2.f32 %v2754_v43  ;;  %v2758_v20 = vadd.f32 1.0, %v2757_v44  ;;  %vm2761_vm3 = vcmp.lt.f32.partialorder %v2760_v26, 0.0004427343 }
 0x536   :  { %v2759_v41 = vmul.f32 %v3100_v18, %v2758_v20 }
 0x53a   :  { %v3102_v51 = vpop.eup %3101 }
 0x53b   :  { %v2756_v15 = vmul.f32 0.6931472, %v3102_v51 }
 0x53d   :  { %v2762_v29 = vsel %vm2761_vm3, %v2759_v41, %v2756_v15 }
 0x53e   :  { %v2794_v58 = vadd.f32 %v2762_v29, %v2346_v48 }
 0x540   :  { %v2826_v24 = vsel %vm2314_vm2, %v2794_v58, %v2310_v50 }
 0x541   :  { %2858 = vst [vmem:[#allocation11 + $0xf8] sm:$0xff] %v2826_v24 }
 0x542   :  { %2871 = dma.vmem_to_hbm [thread:$0]  %s2864_s0, 4096, %s2866_s23, [#allocation4], %s3261_s20, %s3261_s20, %s3262_s21  }
 0x543   :  { %3255 = dma.done.wait [#allocation4], 4096  }
 0x544   :  { %3256 = vsyncadd [#allocation4], 4294963200 }
 0x545   :  { %2876 = vsyncpa [#allocation3], 1 }
 0x546   :  { %2877 = vsyncpa [#allocation6], 1 }
 0x547   :  { %2878 = vsyncpa [#allocation9], 1 }
 0x548   :  { %2879 = vsyncpa [#allocation4], 1 }

</bundles_post_ra>
